<compile_context>
chip_gen: v7x
topology: tpu7x:2x2x1
jax: 0.10.0
libtpu: 0.0.40
codegen_flags: <defaults>
</compile_context>

<pallas_src>
import numpy as np
import jax
import jax.numpy as jnp
from jax.experimental import pallas as pl
from jax.experimental.pallas import tpu as pltpu


# Scaled-down VGG13 feature stack: 3 blocks of (conv3x3+ReLU, conv3x3+ReLU, maxpool2x2).
_BLOCK_SPATIAL = (16, 8, 4)                                   # conv input H=W per block
_CONV_CHANNELS = ((3, 8), (8, 8), (8, 16), (16, 16), (16, 32), (32, 32))
_FEATURE_LEN = 64                                             # analog of VGG's 4096-d feature
_FLAT = 32 * 2 * 2                                            # (H, W, C) flatten after pool 3


# ----------------------------------------------------------------------------
# Parameter init (deterministic synthetic -- no checkpoint load)
# ----------------------------------------------------------------------------
def _dense_init(key, fan_in, fan_out):
    kw, kb = jax.random.split(key)
    scale = 1.0 / jnp.sqrt(jnp.float32(fan_in))
    w = jax.random.normal(kw, (fan_in, fan_out), jnp.float32) * scale
    b = jax.random.normal(kb, (fan_out,), jnp.float32) * 0.01
    return w, b


def _conv_init(key, cin, cout):
    kw, kb = jax.random.split(key)
    scale = 1.0 / jnp.sqrt(jnp.float32(9 * cin))
    w = jax.random.normal(kw, (3, 3, cin, cout), jnp.float32) * scale   # (dy, dx, Cin, Cout)
    b = jax.random.normal(kb, (cout,), jnp.float32) * 0.01
    return w, b


def init_params(key, in_ch=3, num_classes=40):
    chans = list(_CONV_CHANNELS)
    chans[0] = (in_ch, chans[0][1])
    keys = jax.random.split(key, len(chans) + 3)
    convs = [_conv_init(keys[i], ci, co) for i, (ci, co) in enumerate(chans)]
    # fc1 rows are ordered (h2, w2, c) == (H, W, C) flatten of the 2x2x32 pooled map.
    fc1 = _dense_init(keys[len(chans)], _FLAT, _FEATURE_LEN)
    fc2 = _dense_init(keys[len(chans) + 1], _FEATURE_LEN, _FEATURE_LEN)
    cls = _dense_init(keys[len(chans) + 2], _FEATURE_LEN, num_classes)
    return {"convs": convs, "fc1": fc1, "fc2": fc2, "cls": cls}


# ----------------------------------------------------------------------------
# Structural operand builders (run once, outside the kernel)
#
# In-kernel activation layout:  value[(view*Hp + h_p), (w_p*C + c)]
#   h_p in [0, Hp), w_p in [0, Wp), Hp = H+2, Wp = W+2 (spatial zero padding),
#   plus one extra zero "margin" row at the top/bottom of each buffer so the
#   three dy-shifted slices never read out of bounds.
# ----------------------------------------------------------------------------
def _stacked_conv_weight(k, wd):
    """3x3 conv as ONE matmul: dx taps + W zero padding folded into a banded matrix,
    the 3 dy taps stacked along K -> (3*Wp*Cin, Wp*Cout), bf16."""
    cin, cout = int(k.shape[2]), int(k.shape[3])
    wp = wd + 2
    a = np.zeros((3, wp, wp), np.float32)            # a[dx, w_in, w_out]
    cols = np.arange(1, wd + 1)                      # interior output columns
    for dx in range(3):
        a[dx, cols + dx - 1, cols] = 1.0
    big = jnp.einsum("xio,yxcd->yicod", jnp.asarray(a), k)     # (dy, w_in, ci, w_out, co)
    return big.reshape(3 * wp * cin, wp * cout).astype(jnp.bfloat16)


def _bias_lanes(b, wd):
    """Bias broadcast to the (w_p, c) lane layout, zero on the W padding lanes (f32)."""
    cout = b.shape[0]
    z = jnp.zeros((cout,), jnp.float32)
    return jnp.concatenate([z, jnp.tile(b, wd), z]).reshape(1, (wd + 2) * cout)


def _row_mask(n_img, hd):
    """1 on real rows, 0 on the per-image H zero-padding rows (re-zeroes them after a conv)."""
    m = np.zeros((n_img, hd + 2, 1), np.float32)
    m[:, 1:hd + 1, :] = 1.0
    return jnp.asarray(m.reshape(n_img * (hd + 2), 1))


def _pool_mats(wd, c, n_img, last):
    """2x2/stride-2 maxpool as (lane-selection matmul, row-repack matmul).
    The W-pair max is done in-kernel by a lane-shifted elementwise max, so only ONE
    column-selection matrix is needed (was an even/odd pair of matmuls before)."""
    wo = ho = wd // 2
    hp = wd + 2
    wsel = wo * c if last else (wo + 2) * c
    sel = np.zeros(((hp - 1) * c, wsel), np.float32)
    for w2 in range(wo):
        tgt = w2 if last else w2 + 1
        for ch in range(c):
            sel[(2 * w2 + 1) * c + ch, tgt * c + ch] = 1.0
    if last:
        # Map directly to the FC layout: rows ordered (h2, view), lanes (w2, c) -- no padding.
        rs = np.zeros((ho * n_img, n_img * hp - 1), np.float32)
        for h2 in range(ho):
            for i in range(n_img):
                rs[h2 * n_img + i, i * hp + 2 * h2 + 1] = 1.0
    else:
        # Map into the next block's padded layout (zero rows at its padding positions).
        hpo = ho + 2
        rs = np.zeros((n_img * hpo, n_img * hp - 1), np.float32)
        for i in range(n_img):
            for h2 in range(ho):
                rs[i * hpo + h2 + 1, i * hp + 2 * h2 + 1] = 1.0
    return jnp.asarray(sel).astype(jnp.bfloat16), jnp.asarray(rs).astype(jnp.bfloat16)


def _build_operands(params, views):
    convs = params["convs"]
    ops = []
    for blk, sp in enumerate(_BLOCK_SPATIAL):
        for which in range(2):
            k, b = convs[2 * blk + which]
            ops.append(_stacked_conv_weight(k, sp))
            ops.append(_bias_lanes(b, sp))
    for sp in _BLOCK_SPATIAL:
        ops.append(_row_mask(views, sp))
    for blk, sp in enumerate(_BLOCK_SPATIAL):
        c = int(convs[2 * blk + 1][0].shape[-1])
        sel, rs = _pool_mats(sp, c, views, last=(blk == len(_BLOCK_SPATIAL) - 1))
        ops += [sel, rs]
    w1, b1 = params["fc1"]
    w2, b2 = params["fc2"]
    wc, bc = params["cls"]
    ops += [w1.astype(jnp.bfloat16), b1.reshape(1, -1),
            w2.astype(jnp.bfloat16), b2.reshape(1, -1),
            wc.astype(jnp.bfloat16), bc.reshape(1, -1)]
    return ops


# ----------------------------------------------------------------------------
# Forward pass: whole network in one pallas_call, grid over batch (parallel on v7x)
# ----------------------------------------------------------------------------
def mvcnn_forward(params, x):
    """x: (batch, views, C, H, W) -> logits (batch, num_classes)."""
    bsz, views, cin, hh, ww = map(int, x.shape)
    num_classes = int(params["cls"][0].shape[1])
    n_blocks = len(_BLOCK_SPATIAL)
    bf16, f32 = jnp.bfloat16, jnp.float32

    conv_shapes = [(int(k.shape[2]), int(k.shape[3])) for k, _ in params["convs"]]
    pool_c = [conv_shapes[2 * blk + 1][1] for blk in range(n_blocks)]
    ops = _build_operands(params, views)

    # Glue: pack the NCHW multi-view input into the padded row layout, one row-block per
    # sample: rows = [margin, (view, h_p)..., margin], lanes = (w_p, channel).
    hp0, wp0 = hh + 2, ww + 2
    xn = jnp.transpose(x, (0, 1, 3, 4, 2))                               # (B, V, H, W, C)
    xp = jnp.pad(xn, ((0, 0), (0, 0), (1, 1), (1, 1), (0, 0)))           # spatial zero pad
    xin = xp.reshape(bsz, views * hp0, wp0 * cin)
    xin = jnp.pad(xin, ((0, 0), (1, 1), (0, 0)))                         # margin rows

    # VMEM scratch: padded input buffer for conv 1..5 (conv 0 reads the kernel input).
    # Kept f32 so all sublane-offset slices/stores are on an unpacked dtype; values are
    # cast to bf16 right before each matmul.
    scratch = []
    for j in range(1, 2 * n_blocks):
        sp = _BLOCK_SPATIAL[j // 2]
        c_in = conv_shapes[j][0]
        scratch.append(pltpu.VMEM((views * (sp + 2) + 2, (sp + 2) * c_in), f32))

    def kernel(*refs):
        refs = list(refs)
        i = 0
        x_ref = refs[i]; i += 1
        conv_w, conv_b = [], []
        for _ in range(2 * n_blocks):
            conv_w.append(refs[i]); conv_b.append(refs[i + 1]); i += 2
        masks = refs[i:i + n_blocks]; i += n_blocks
        pool_ops = []
        for _ in range(n_blocks):
            pool_ops.append((refs[i], refs[i + 1])); i += 2
        w1_ref, b1_ref, w2_ref, b2_ref, wc_ref, bc_ref = refs[i:i + 6]; i += 6
        out_ref = refs[i]; i += 1
        bufs = refs[i:]

        # Margin rows must be zero on EVERY grid step (scratch is stale/uninitialized and
        # NaN garbage would otherwise leak through 0*NaN in the mask / repack matmuls).
        for buf in bufs:
            rows, lanes = buf.shape
            zrow = jnp.zeros((1, lanes), f32)
            buf[0:1, :] = zrow
            buf[rows - 1:rows, :] = zrow

        def conv(src_ref, w_ref, b_ref, mask_ref):
            # 3x3 same-pad conv + bias + ReLU as ONE bf16 matmul: the three dy taps are
            # stacked along K via a lane-concat of the row-shifted views (im2col in vregs).
            n = src_ref.shape[0] - 2
            lhs = jnp.concatenate(
                [src_ref[0:n, :], src_ref[1:n + 1, :], src_ref[2:n + 2, :]], axis=-1)
            acc = jnp.dot(lhs.astype(bf16), w_ref[...], preferred_element_type=f32)
            act = jnp.maximum(acc + b_ref[...], 0.0)
            if mask_ref is not None:                 # re-zero the per-image H padding rows
                act = act * mask_ref[...]
            return act

        def pool(z, c, sel_ref, rs_ref):
            # 2x2 maxpool, stride 2, in VMEM: H-pair max (sublane shift) -> W-pair max
            # (lane shift) -> one lane-selection matmul -> one row-repack matmul.
            nr = z.shape[0]
            y = jnp.maximum(z[0:nr - 1, :], z[1:nr, :])
            ym = jnp.maximum(y[:, :-c], y[:, c:])
            cols = jnp.dot(ym.astype(bf16), sel_ref[...], preferred_element_type=f32)
            return jnp.dot(rs_ref[...], cols.astype(bf16), preferred_element_type=f32)

        src = x_ref
        xf = None
        for blk in range(n_blocks):
            ca, cb = 2 * blk, 2 * blk + 1
            act = conv(src, conv_w[ca], conv_b[ca], masks[blk])
            dst = bufs[cb - 1]
            dst[1:1 + act.shape[0], :] = act
            z = conv(dst, conv_w[cb], conv_b[cb], None)
            q = pool(z, pool_c[blk], *pool_ops[blk])
            if blk + 1 < n_blocks:
                nxt = bufs[cb]
                nxt[1:1 + q.shape[0], :] = q
                src = nxt
            else:
                xf = q            # (2*views, 2*C_last), rows ordered (h2, view), lanes (w2, c)

        # fc_features: Linear+ReLU x2 (the (H,W,C) flatten is a lane concat of the h2 halves).
        v = xf.shape[0] // 2
        lhs_fc = jnp.concatenate([xf[0:v, :], xf[v:2 * v, :]], axis=-1).astype(bf16)
        f = jnp.maximum(jnp.dot(lhs_fc, w1_ref[...], preferred_element_type=f32)
                        + b1_ref[...], 0.0)
        f = jnp.maximum(jnp.dot(f.astype(bf16), w2_ref[...], preferred_element_type=f32)
                        + b2_ref[...], 0.0)

        # max over views (torch.max(x_view, 1)) fused with the classifier Linear.
        fmax = jnp.max(f, axis=0, keepdims=True)
        out_ref[...] = (jnp.dot(fmax.astype(bf16), wc_ref[...], preferred_element_type=f32)
                        + bc_ref[...])

    rows_in, lanes_in = views * hp0 + 2, wp0 * cin
    in_specs = [pl.BlockSpec((None, rows_in, lanes_in), lambda b: (b, 0, 0))]
    in_specs += [pl.BlockSpec(o.shape, lambda b: (0, 0)) for o in ops]
    out_specs = pl.BlockSpec((None, 1, num_classes), lambda b: (b, 0, 0))

    # Advisory cost for XLA scheduling around the fused call (conv + fc matmuls dominate).
    flops = 0
    for j, (ci, co) in enumerate(conv_shapes):
        hp = _BLOCK_SPATIAL[j // 2] + 2
        flops += 2 * (views * hp) * (3 * hp * ci) * (hp * co)
    flops += 2 * views * (_FLAT * _FEATURE_LEN + _FEATURE_LEN * _FEATURE_LEN)
    flops += 2 * _FEATURE_LEN * num_classes
    flops *= bsz
    bytes_accessed = int(xin.size * xin.dtype.itemsize
                         + sum(int(o.size) * o.dtype.itemsize for o in ops)
                         + bsz * num_classes * 4)

    out = pl.pallas_call(
        kernel,
        out_shape=jax.ShapeDtypeStruct((bsz, 1, num_classes), jnp.float32),
        grid=(bsz,),
        in_specs=in_specs,
        out_specs=out_specs,
        scratch_shapes=scratch,
        compiler_params=pltpu.CompilerParams(
            dimension_semantics=("parallel",),
            vmem_limit_bytes=32 * 1024 * 1024),
        cost_estimate=pl.CostEstimate(flops=int(flops), transcendentals=0,
                                      bytes_accessed=bytes_accessed),
    )(xin, *ops)
    return out.reshape(bsz, num_classes)


# ----------------------------------------------------------------------------
if __name__ == "__main__":
    key = jax.random.PRNGKey(0)
    k_param, k_x = jax.random.split(key)

    batch, views, chans, spatial = 2, 3, 3, 16
    num_classes = 40

    params = init_params(k_param, in_ch=chans, num_classes=num_classes)
    x = jax.random.normal(k_x, (batch, views, chans, spatial, spatial), jnp.float32)

    logits = mvcnn_forward(params, x)
    logits = jax.block_until_ready(logits)

    assert logits.shape == (batch, num_classes), logits.shape
    assert bool(jnp.all(jnp.isfinite(logits)))
    print("KERNEL_OK")
</pallas_src>

<mosaic_0001>
module attributes {stable_mosaic.version = 11 : i64} {
  func.func @kernel(%arg0: i32, %arg1: memref<1x56x54xf32, #tpu.memory_space<vmem>>, %arg2: memref<162x144xbf16, #tpu.memory_space<vmem>>, %arg3: memref<1x144xf32, #tpu.memory_space<vmem>>, %arg4: memref<432x144xbf16, #tpu.memory_space<vmem>>, %arg5: memref<1x144xf32, #tpu.memory_space<vmem>>, %arg6: memref<240x160xbf16, #tpu.memory_space<vmem>>, %arg7: memref<1x160xf32, #tpu.memory_space<vmem>>, %arg8: memref<480x160xbf16, #tpu.memory_space<vmem>>, %arg9: memref<1x160xf32, #tpu.memory_space<vmem>>, %arg10: memref<288x192xbf16, #tpu.memory_space<vmem>>, %arg11: memref<1x192xf32, #tpu.memory_space<vmem>>, %arg12: memref<576x192xbf16, #tpu.memory_space<vmem>>, %arg13: memref<1x192xf32, #tpu.memory_space<vmem>>, %arg14: memref<54x1xf32, #tpu.memory_space<vmem>>, %arg15: memref<30x1xf32, #tpu.memory_space<vmem>>, %arg16: memref<18x1xf32, #tpu.memory_space<vmem>>, %arg17: memref<136x80xbf16, #tpu.memory_space<vmem>>, %arg18: memref<30x53xbf16, #tpu.memory_space<vmem>>, %arg19: memref<144x96xbf16, #tpu.memory_space<vmem>>, %arg20: memref<18x29xbf16, #tpu.memory_space<vmem>>, %arg21: memref<160x64xbf16, #tpu.memory_space<vmem>>, %arg22: memref<6x17xbf16, #tpu.memory_space<vmem>>, %arg23: memref<128x64xbf16, #tpu.memory_space<vmem>>, %arg24: memref<1x64xf32, #tpu.memory_space<vmem>>, %arg25: memref<64x64xbf16, #tpu.memory_space<vmem>>, %arg26: memref<1x64xf32, #tpu.memory_space<vmem>>, %arg27: memref<64x40xbf16, #tpu.memory_space<vmem>>, %arg28: memref<1x40xf32, #tpu.memory_space<vmem>>, %arg29: memref<1x1x40xf32, #tpu.memory_space<vmem>>, %arg30: memref<56x144xf32, #tpu.memory_space<vmem>>, %arg31: memref<32x80xf32, #tpu.memory_space<vmem>>, %arg32: memref<32x160xf32, #tpu.memory_space<vmem>>, %arg33: memref<20x96xf32, #tpu.memory_space<vmem>>, %arg34: memref<20x192xf32, #tpu.memory_space<vmem>>) attributes {dimension_semantics = [#tpu.dimension_semantics<parallel>], iteration_bounds = array<i64: 2>, scalar_prefetch = 0 : i64, scratch_operands = 5 : i64, tpu.core_type = #tpu.core_type<tc>, window_params = [{transform_indices = @transform_0, window_bounds = array<i64: 1, 56, 54>}, {pipeline_mode = #tpu.pipeline_mode<synchronous>, transform_indices = @transform_1, window_bounds = array<i64: 162, 144>}, {pipeline_mode = #tpu.pipeline_mode<synchronous>, transform_indices = @transform_2, window_bounds = array<i64: 1, 144>}, {pipeline_mode = #tpu.pipeline_mode<synchronous>, transform_indices = @transform_3, window_bounds = array<i64: 432, 144>}, {pipeline_mode = #tpu.pipeline_mode<synchronous>, transform_indices = @transform_4, window_bounds = array<i64: 1, 144>}, {pipeline_mode = #tpu.pipeline_mode<synchronous>, transform_indices = @transform_5, window_bounds = array<i64: 240, 160>}, {pipeline_mode = #tpu.pipeline_mode<synchronous>, transform_indices = @transform_6, window_bounds = array<i64: 1, 160>}, {pipeline_mode = #tpu.pipeline_mode<synchronous>, transform_indices = @transform_7, window_bounds = array<i64: 480, 160>}, {pipeline_mode = #tpu.pipeline_mode<synchronous>, transform_indices = @transform_8, window_bounds = array<i64: 1, 160>}, {pipeline_mode = #tpu.pipeline_mode<synchronous>, transform_indices = @transform_9, window_bounds = array<i64: 288, 192>}, {pipeline_mode = #tpu.pipeline_mode<synchronous>, transform_indices = @transform_10, window_bounds = array<i64: 1, 192>}, {pipeline_mode = #tpu.pipeline_mode<synchronous>, transform_indices = @transform_11, window_bounds = array<i64: 576, 192>}, {pipeline_mode = #tpu.pipeline_mode<synchronous>, transform_indices = @transform_12, window_bounds = array<i64: 1, 192>}, {pipeline_mode = #tpu.pipeline_mode<synchronous>, transform_indices = @transform_13, window_bounds = array<i64: 54, 1>}, {pipeline_mode = #tpu.pipeline_mode<synchronous>, transform_indices = @transform_14, window_bounds = array<i64: 30, 1>}, {pipeline_mode = #tpu.pipeline_mode<synchronous>, transform_indices = @transform_15, window_bounds = array<i64: 18, 1>}, {pipeline_mode = #tpu.pipeline_mode<synchronous>, transform_indices = @transform_16, window_bounds = array<i64: 136, 80>}, {pipeline_mode = #tpu.pipeline_mode<synchronous>, transform_indices = @transform_17, window_bounds = array<i64: 30, 53>}, {pipeline_mode = #tpu.pipeline_mode<synchronous>, transform_indices = @transform_18, window_bounds = array<i64: 144, 96>}, {pipeline_mode = #tpu.pipeline_mode<synchronous>, transform_indices = @transform_19, window_bounds = array<i64: 18, 29>}, {pipeline_mode = #tpu.pipeline_mode<synchronous>, transform_indices = @transform_20, window_bounds = array<i64: 160, 64>}, {pipeline_mode = #tpu.pipeline_mode<synchronous>, transform_indices = @transform_21, window_bounds = array<i64: 6, 17>}, {pipeline_mode = #tpu.pipeline_mode<synchronous>, transform_indices = @transform_22, window_bounds = array<i64: 128, 64>}, {pipeline_mode = #tpu.pipeline_mode<synchronous>, transform_indices = @transform_23, window_bounds = array<i64: 1, 64>}, {pipeline_mode = #tpu.pipeline_mode<synchronous>, transform_indices = @transform_24, window_bounds = array<i64: 64, 64>}, {pipeline_mode = #tpu.pipeline_mode<synchronous>, transform_indices = @transform_25, window_bounds = array<i64: 1, 64>}, {pipeline_mode = #tpu.pipeline_mode<synchronous>, transform_indices = @transform_26, window_bounds = array<i64: 64, 40>}, {pipeline_mode = #tpu.pipeline_mode<synchronous>, transform_indices = @transform_27, window_bounds = array<i64: 1, 40>}, {transform_indices = @transform_28, window_bounds = array<i64: 1, 1, 40>}]} {
    %cst = arith.constant 0.000000e+00 : f32
    %0 = vector.broadcast %cst : f32 to vector<1x144xf32>
    %c0 = arith.constant 0 : index
    %c0_0 = arith.constant 0 : index
    %1 = vector.load %arg30[%c0, %c0_0] : memref<56x144xf32, #tpu.memory_space<vmem>>, vector<1x144xf32>
    tpu.vector_store %arg30[%c0, %c0_0], %0 {strides = array<i32>} : memref<56x144xf32, #tpu.memory_space<vmem>>, vector<1x144xf32>,
    %c55 = arith.constant 55 : index
    %c0_1 = arith.constant 0 : index
    %2 = vector.load %arg30[%c55, %c0_1] : memref<56x144xf32, #tpu.memory_space<vmem>>, vector<1x144xf32>
    tpu.vector_store %arg30[%c55, %c0_1], %0 {strides = array<i32>} : memref<56x144xf32, #tpu.memory_space<vmem>>, vector<1x144xf32>,
    %cst_2 = arith.constant 0.000000e+00 : f32
    %3 = vector.broadcast %cst_2 : f32 to vector<1x80xf32>
    %c0_3 = arith.constant 0 : index
    %c0_4 = arith.constant 0 : index
    %4 = vector.load %arg31[%c0_3, %c0_4] : memref<32x80xf32, #tpu.memory_space<vmem>>, vector<1x80xf32>
    tpu.vector_store %arg31[%c0_3, %c0_4], %3 {strides = array<i32>} : memref<32x80xf32, #tpu.memory_space<vmem>>, vector<1x80xf32>,
    %c31 = arith.constant 31 : index
    %c0_5 = arith.constant 0 : index
    %5 = vector.load %arg31[%c31, %c0_5] : memref<32x80xf32, #tpu.memory_space<vmem>>, vector<1x80xf32>
    tpu.vector_store %arg31[%c31, %c0_5], %3 {strides = array<i32>} : memref<32x80xf32, #tpu.memory_space<vmem>>, vector<1x80xf32>,
    %cst_6 = arith.constant 0.000000e+00 : f32
    %6 = vector.broadcast %cst_6 : f32 to vector<1x160xf32>
    %c0_7 = arith.constant 0 : index
    %c0_8 = arith.constant 0 : index
    %7 = vector.load %arg32[%c0_7, %c0_8] : memref<32x160xf32, #tpu.memory_space<vmem>>, vector<1x160xf32>
    tpu.vector_store %arg32[%c0_7, %c0_8], %6 {strides = array<i32>} : memref<32x160xf32, #tpu.memory_space<vmem>>, vector<1x160xf32>,
    %c31_9 = arith.constant 31 : index
    %c0_10 = arith.constant 0 : index
    %8 = vector.load %arg32[%c31_9, %c0_10] : memref<32x160xf32, #tpu.memory_space<vmem>>, vector<1x160xf32>
    tpu.vector_store %arg32[%c31_9, %c0_10], %6 {strides = array<i32>} : memref<32x160xf32, #tpu.memory_space<vmem>>, vector<1x160xf32>,
    %cst_11 = arith.constant 0.000000e+00 : f32
    %9 = vector.broadcast %cst_11 : f32 to vector<1x96xf32>
    %c0_12 = arith.constant 0 : index
    %c0_13 = arith.constant 0 : index
    %10 = vector.load %arg33[%c0_12, %c0_13] : memref<20x96xf32, #tpu.memory_space<vmem>>, vector<1x96xf32>
    tpu.vector_store %arg33[%c0_12, %c0_13], %9 {strides = array<i32>} : memref<20x96xf32, #tpu.memory_space<vmem>>, vector<1x96xf32>,
    %c19 = arith.constant 19 : index
    %c0_14 = arith.constant 0 : index
    %11 = vector.load %arg33[%c19, %c0_14] : memref<20x96xf32, #tpu.memory_space<vmem>>, vector<1x96xf32>
    tpu.vector_store %arg33[%c19, %c0_14], %9 {strides = array<i32>} : memref<20x96xf32, #tpu.memory_space<vmem>>, vector<1x96xf32>,
    %cst_15 = arith.constant 0.000000e+00 : f32
    %12 = vector.broadcast %cst_15 : f32 to vector<1x192xf32>
    %c0_16 = arith.constant 0 : index
    %c0_17 = arith.constant 0 : index
    %13 = vector.load %arg34[%c0_16, %c0_17] : memref<20x192xf32, #tpu.memory_space<vmem>>, vector<1x192xf32>
    tpu.vector_store %arg34[%c0_16, %c0_17], %12 {strides = array<i32>} : memref<20x192xf32, #tpu.memory_space<vmem>>, vector<1x192xf32>,
    %c19_18 = arith.constant 19 : index
    %c0_19 = arith.constant 0 : index
    %14 = vector.load %arg34[%c19_18, %c0_19] : memref<20x192xf32, #tpu.memory_space<vmem>>, vector<1x192xf32>
    tpu.vector_store %arg34[%c19_18, %c0_19], %12 {strides = array<i32>} : memref<20x192xf32, #tpu.memory_space<vmem>>, vector<1x192xf32>,
    %c0_20 = arith.constant 0 : index
    %c0_21 = arith.constant 0 : index
    %c0_22 = arith.constant 0 : index
    %15 = vector.load %arg1[%c0_20, %c0_21, %c0_22] : memref<1x56x54xf32, #tpu.memory_space<vmem>>, vector<1x54x54xf32>
    %16 = vector.shape_cast %15 : vector<1x54x54xf32> to vector<54x54xf32>
    %c0_23 = arith.constant 0 : index
    %c1 = arith.constant 1 : index
    %c0_24 = arith.constant 0 : index
    %17 = vector.load %arg1[%c0_23, %c1, %c0_24] : memref<1x56x54xf32, #tpu.memory_space<vmem>>, vector<1x54x54xf32>
    %18 = vector.shape_cast %17 : vector<1x54x54xf32> to vector<54x54xf32>
    %c0_25 = arith.constant 0 : index
    %c2 = arith.constant 2 : index
    %c0_26 = arith.constant 0 : index
    %19 = vector.load %arg1[%c0_25, %c2, %c0_26] : memref<1x56x54xf32, #tpu.memory_space<vmem>>, vector<1x54x54xf32>
    %20 = vector.shape_cast %19 : vector<1x54x54xf32> to vector<54x54xf32>
    %21 = tpu.concatenate %16, %18, %20 in 1 : vector<54x54xf32>, vector<54x54xf32>, vector<54x54xf32> -> vector<54x162xf32>
    %22 = arith.truncf %21 : vector<54x162xf32> to vector<54x162xbf16>
    %c0_27 = arith.constant 0 : index
    %c0_28 = arith.constant 0 : index
    %23 = vector.load %arg2[%c0_27, %c0_28] : memref<162x144xbf16, #tpu.memory_space<vmem>>, vector<162x144xbf16>
    %cst_29 = arith.constant dense<0.000000e+00> : vector<54x144xf32>
    %24 = tpu.matmul %22, %23, %cst_29 {dimension_numbers = #tpu.dot_dimension_numbers<[1], [0], [0], [1], [0, 0, 1, 1], [], []>} : vector<54x162xbf16>, vector<162x144xbf16>, vector<54x144xf32> -> vector<54x144xf32>
    %c0_30 = arith.constant 0 : index
    %c0_31 = arith.constant 0 : index
    %25 = vector.load %arg3[%c0_30, %c0_31] : memref<1x144xf32, #tpu.memory_space<vmem>>, vector<1x144xf32>
    %26 = vector.broadcast %25 : vector<1x144xf32> to vector<54x144xf32>
    %27 = arith.addf %24, %26 : vector<54x144xf32>
    %cst_32 = arith.constant 0.000000e+00 : f32
    %28 = vector.broadcast %cst_32 : f32 to vector<54x144xf32>
    %29 = arith.maximumf %27, %28 : vector<54x144xf32>
    %c0_33 = arith.constant 0 : index
    %c0_34 = arith.constant 0 : index
    %30 = vector.load %arg14[%c0_33, %c0_34] : memref<54x1xf32, #tpu.memory_space<vmem>>, vector<54x1xf32>
    %31 = vector.broadcast %30 : vector<54x1xf32> to vector<54x144xf32>
    %32 = arith.mulf %29, %31 : vector<54x144xf32>
    %c1_35 = arith.constant 1 : index
    %c0_36 = arith.constant 0 : index
    %33 = vector.load %arg30[%c1_35, %c0_36] : memref<56x144xf32, #tpu.memory_space<vmem>>, vector<54x144xf32>
    tpu.vector_store %arg30[%c1_35, %c0_36], %32 {strides = array<i32>} : memref<56x144xf32, #tpu.memory_space<vmem>>, vector<54x144xf32>,
    %c0_37 = arith.constant 0 : index
    %c0_38 = arith.constant 0 : index
    %34 = vector.load %arg30[%c0_37, %c0_38] : memref<56x144xf32, #tpu.memory_space<vmem>>, vector<54x144xf32>
    %c1_39 = arith.constant 1 : index
    %c0_40 = arith.constant 0 : index
    %35 = vector.load %arg30[%c1_39, %c0_40] : memref<56x144xf32, #tpu.memory_space<vmem>>, vector<54x144xf32>
    %c2_41 = arith.constant 2 : index
    %c0_42 = arith.constant 0 : index
    %36 = vector.load %arg30[%c2_41, %c0_42] : memref<56x144xf32, #tpu.memory_space<vmem>>, vector<54x144xf32>
    %37 = tpu.concatenate %34, %35, %36 in 1 : vector<54x144xf32>, vector<54x144xf32>, vector<54x144xf32> -> vector<54x432xf32>
    %38 = arith.truncf %37 : vector<54x432xf32> to vector<54x432xbf16>
    %c0_43 = arith.constant 0 : index
    %c0_44 = arith.constant 0 : index
    %39 = vector.load %arg4[%c0_43, %c0_44] : memref<432x144xbf16, #tpu.memory_space<vmem>>, vector<432x144xbf16>
    %cst_45 = arith.constant dense<0.000000e+00> : vector<54x144xf32>
    %40 = tpu.matmul %38, %39, %cst_45 {dimension_numbers = #tpu.dot_dimension_numbers<[1], [0], [0], [1], [0, 0, 1, 1], [], []>} : vector<54x432xbf16>, vector<432x144xbf16>, vector<54x144xf32> -> vector<54x144xf32>
    %c0_46 = arith.constant 0 : index
    %c0_47 = arith.constant 0 : index
    %41 = vector.load %arg5[%c0_46, %c0_47] : memref<1x144xf32, #tpu.memory_space<vmem>>, vector<1x144xf32>
    %42 = vector.broadcast %41 : vector<1x144xf32> to vector<54x144xf32>
    %43 = arith.addf %40, %42 : vector<54x144xf32>
    %cst_48 = arith.constant 0.000000e+00 : f32
    %44 = vector.broadcast %cst_48 : f32 to vector<54x144xf32>
    %45 = arith.maximumf %43, %44 : vector<54x144xf32>
    %46 = vector.extract_strided_slice %45 {offsets = [0, 0], sizes = [53, 144], strides = [1, 1]} : vector<54x144xf32> to vector<53x144xf32>
    %47 = vector.extract_strided_slice %45 {offsets = [1, 0], sizes = [53, 144], strides = [1, 1]} : vector<54x144xf32> to vector<53x144xf32>
    %48 = arith.maximumf %46, %47 : vector<53x144xf32>
    %49 = vector.extract_strided_slice %48 {offsets = [0, 0], sizes = [53, 136], strides = [1, 1]} : vector<53x144xf32> to vector<53x136xf32>
    %50 = vector.extract_strided_slice %48 {offsets = [0, 8], sizes = [53, 136], strides = [1, 1]} : vector<53x144xf32> to vector<53x136xf32>
    %51 = arith.maximumf %49, %50 : vector<53x136xf32>
    %52 = arith.truncf %51 : vector<53x136xf32> to vector<53x136xbf16>
    %c0_49 = arith.constant 0 : index
    %c0_50 = arith.constant 0 : index
    %53 = vector.load %arg17[%c0_49, %c0_50] : memref<136x80xbf16, #tpu.memory_space<vmem>>, vector<136x80xbf16>
    %cst_51 = arith.constant dense<0.000000e+00> : vector<53x80xf32>
    %54 = tpu.matmul %52, %53, %cst_51 {dimension_numbers = #tpu.dot_dimension_numbers<[1], [0], [0], [1], [0, 0, 1, 1], [], []>} : vector<53x136xbf16>, vector<136x80xbf16>, vector<53x80xf32> -> vector<53x80xf32>
    %c0_52 = arith.constant 0 : index
    %c0_53 = arith.constant 0 : index
    %55 = vector.load %arg18[%c0_52, %c0_53] : memref<30x53xbf16, #tpu.memory_space<vmem>>, vector<30x53xbf16>
    %56 = arith.truncf %54 : vector<53x80xf32> to vector<53x80xbf16>
    %cst_54 = arith.constant dense<0.000000e+00> : vector<30x80xf32>
    %57 = tpu.matmul %55, %56, %cst_54 {dimension_numbers = #tpu.dot_dimension_numbers<[1], [0], [0], [1], [0, 0, 1, 1], [], []>} : vector<30x53xbf16>, vector<53x80xbf16>, vector<30x80xf32> -> vector<30x80xf32>
    %c1_55 = arith.constant 1 : index
    %c0_56 = arith.constant 0 : index
    %58 = vector.load %arg31[%c1_55, %c0_56] : memref<32x80xf32, #tpu.memory_space<vmem>>, vector<30x80xf32>
    tpu.vector_store %arg31[%c1_55, %c0_56], %57 {strides = array<i32>} : memref<32x80xf32, #tpu.memory_space<vmem>>, vector<30x80xf32>,
    %c0_57 = arith.constant 0 : index
    %c0_58 = arith.constant 0 : index
    %59 = vector.load %arg31[%c0_57, %c0_58] : memref<32x80xf32, #tpu.memory_space<vmem>>, vector<30x80xf32>
    %c1_59 = arith.constant 1 : index
    %c0_60 = arith.constant 0 : index
    %60 = vector.load %arg31[%c1_59, %c0_60] : memref<32x80xf32, #tpu.memory_space<vmem>>, vector<30x80xf32>
    %c2_61 = arith.constant 2 : index
    %c0_62 = arith.constant 0 : index
    %61 = vector.load %arg31[%c2_61, %c0_62] : memref<32x80xf32, #tpu.memory_space<vmem>>, vector<30x80xf32>
    %62 = tpu.concatenate %59, %60, %61 in 1 : vector<30x80xf32>, vector<30x80xf32>, vector<30x80xf32> -> vector<30x240xf32>
    %63 = arith.truncf %62 : vector<30x240xf32> to vector<30x240xbf16>
    %c0_63 = arith.constant 0 : index
    %c0_64 = arith.constant 0 : index
    %64 = vector.load %arg6[%c0_63, %c0_64] : memref<240x160xbf16, #tpu.memory_space<vmem>>, vector<240x160xbf16>
    %cst_65 = arith.constant dense<0.000000e+00> : vector<30x160xf32>
    %65 = tpu.matmul %63, %64, %cst_65 {dimension_numbers = #tpu.dot_dimension_numbers<[1], [0], [0], [1], [0, 0, 1, 1], [], []>} : vector<30x240xbf16>, vector<240x160xbf16>, vector<30x160xf32> -> vector<30x160xf32>
    %c0_66 = arith.constant 0 : index
    %c0_67 = arith.constant 0 : index
    %66 = vector.load %arg7[%c0_66, %c0_67] : memref<1x160xf32, #tpu.memory_space<vmem>>, vector<1x160xf32>
    %67 = vector.broadcast %66 : vector<1x160xf32> to vector<30x160xf32>
    %68 = arith.addf %65, %67 : vector<30x160xf32>
    %cst_68 = arith.constant 0.000000e+00 : f32
    %69 = vector.broadcast %cst_68 : f32 to vector<30x160xf32>
    %70 = arith.maximumf %68, %69 : vector<30x160xf32>
    %c0_69 = arith.constant 0 : index
    %c0_70 = arith.constant 0 : index
    %71 = vector.load %arg15[%c0_69, %c0_70] : memref<30x1xf32, #tpu.memory_space<vmem>>, vector<30x1xf32>
    %72 = vector.broadcast %71 : vector<30x1xf32> to vector<30x160xf32>
    %73 = arith.mulf %70, %72 : vector<30x160xf32>
    %c1_71 = arith.constant 1 : index
    %c0_72 = arith.constant 0 : index
    %74 = vector.load %arg32[%c1_71, %c0_72] : memref<32x160xf32, #tpu.memory_space<vmem>>, vector<30x160xf32>
    tpu.vector_store %arg32[%c1_71, %c0_72], %73 {strides = array<i32>} : memref<32x160xf32, #tpu.memory_space<vmem>>, vector<30x160xf32>,
    %c0_73 = arith.constant 0 : index
    %c0_74 = arith.constant 0 : index
    %75 = vector.load %arg32[%c0_73, %c0_74] : memref<32x160xf32, #tpu.memory_space<vmem>>, vector<30x160xf32>
    %c1_75 = arith.constant 1 : index
    %c0_76 = arith.constant 0 : index
    %76 = vector.load %arg32[%c1_75, %c0_76] : memref<32x160xf32, #tpu.memory_space<vmem>>, vector<30x160xf32>
    %c2_77 = arith.constant 2 : index
    %c0_78 = arith.constant 0 : index
    %77 = vector.load %arg32[%c2_77, %c0_78] : memref<32x160xf32, #tpu.memory_space<vmem>>, vector<30x160xf32>
    %78 = tpu.concatenate %75, %76, %77 in 1 : vector<30x160xf32>, vector<30x160xf32>, vector<30x160xf32> -> vector<30x480xf32>
    %79 = arith.truncf %78 : vector<30x480xf32> to vector<30x480xbf16>
    %c0_79 = arith.constant 0 : index
    %c0_80 = arith.constant 0 : index
    %80 = vector.load %arg8[%c0_79, %c0_80] : memref<480x160xbf16, #tpu.memory_space<vmem>>, vector<480x160xbf16>
    %cst_81 = arith.constant dense<0.000000e+00> : vector<30x160xf32>
    %81 = tpu.matmul %79, %80, %cst_81 {dimension_numbers = #tpu.dot_dimension_numbers<[1], [0], [0], [1], [0, 0, 1, 1], [], []>} : vector<30x480xbf16>, vector<480x160xbf16>, vector<30x160xf32> -> vector<30x160xf32>
    %c0_82 = arith.constant 0 : index
    %c0_83 = arith.constant 0 : index
    %82 = vector.load %arg9[%c0_82, %c0_83] : memref<1x160xf32, #tpu.memory_space<vmem>>, vector<1x160xf32>
    %83 = vector.broadcast %82 : vector<1x160xf32> to vector<30x160xf32>
    %84 = arith.addf %81, %83 : vector<30x160xf32>
    %cst_84 = arith.constant 0.000000e+00 : f32
    %85 = vector.broadcast %cst_84 : f32 to vector<30x160xf32>
    %86 = arith.maximumf %84, %85 : vector<30x160xf32>
    %87 = vector.extract_strided_slice %86 {offsets = [0, 0], sizes = [29, 160], strides = [1, 1]} : vector<30x160xf32> to vector<29x160xf32>
    %88 = vector.extract_strided_slice %86 {offsets = [1, 0], sizes = [29, 160], strides = [1, 1]} : vector<30x160xf32> to vector<29x160xf32>
    %89 = arith.maximumf %87, %88 : vector<29x160xf32>
    %90 = vector.extract_strided_slice %89 {offsets = [0, 0], sizes = [29, 144], strides = [1, 1]} : vector<29x160xf32> to vector<29x144xf32>
    %91 = vector.extract_strided_slice %89 {offsets = [0, 16], sizes = [29, 144], strides = [1, 1]} : vector<29x160xf32> to vector<29x144xf32>
    %92 = arith.maximumf %90, %91 : vector<29x144xf32>
    %93 = arith.truncf %92 : vector<29x144xf32> to vector<29x144xbf16>
    %c0_85 = arith.constant 0 : index
    %c0_86 = arith.constant 0 : index
    %94 = vector.load %arg19[%c0_85, %c0_86] : memref<144x96xbf16, #tpu.memory_space<vmem>>, vector<144x96xbf16>
    %cst_87 = arith.constant dense<0.000000e+00> : vector<29x96xf32>
    %95 = tpu.matmul %93, %94, %cst_87 {dimension_numbers = #tpu.dot_dimension_numbers<[1], [0], [0], [1], [0, 0, 1, 1], [], []>} : vector<29x144xbf16>, vector<144x96xbf16>, vector<29x96xf32> -> vector<29x96xf32>
    %c0_88 = arith.constant 0 : index
    %c0_89 = arith.constant 0 : index
    %96 = vector.load %arg20[%c0_88, %c0_89] : memref<18x29xbf16, #tpu.memory_space<vmem>>, vector<18x29xbf16>
    %97 = arith.truncf %95 : vector<29x96xf32> to vector<29x96xbf16>
    %cst_90 = arith.constant dense<0.000000e+00> : vector<18x96xf32>
    %98 = tpu.matmul %96, %97, %cst_90 {dimension_numbers = #tpu.dot_dimension_numbers<[1], [0], [0], [1], [0, 0, 1, 1], [], []>} : vector<18x29xbf16>, vector<29x96xbf16>, vector<18x96xf32> -> vector<18x96xf32>
    %c1_91 = arith.constant 1 : index
    %c0_92 = arith.constant 0 : index
    %99 = vector.load %arg33[%c1_91, %c0_92] : memref<20x96xf32, #tpu.memory_space<vmem>>, vector<18x96xf32>
    tpu.vector_store %arg33[%c1_91, %c0_92], %98 {strides = array<i32>} : memref<20x96xf32, #tpu.memory_space<vmem>>, vector<18x96xf32>,
    %c0_93 = arith.constant 0 : index
    %c0_94 = arith.constant 0 : index
    %100 = vector.load %arg33[%c0_93, %c0_94] : memref<20x96xf32, #tpu.memory_space<vmem>>, vector<18x96xf32>
    %c1_95 = arith.constant 1 : index
    %c0_96 = arith.constant 0 : index
    %101 = vector.load %arg33[%c1_95, %c0_96] : memref<20x96xf32, #tpu.memory_space<vmem>>, vector<18x96xf32>
    %c2_97 = arith.constant 2 : index
    %c0_98 = arith.constant 0 : index
    %102 = vector.load %arg33[%c2_97, %c0_98] : memref<20x96xf32, #tpu.memory_space<vmem>>, vector<18x96xf32>
    %103 = tpu.concatenate %100, %101, %102 in 1 : vector<18x96xf32>, vector<18x96xf32>, vector<18x96xf32> -> vector<18x288xf32>
    %104 = arith.truncf %103 : vector<18x288xf32> to vector<18x288xbf16>
    %c0_99 = arith.constant 0 : index
    %c0_100 = arith.constant 0 : index
    %105 = vector.load %arg10[%c0_99, %c0_100] : memref<288x192xbf16, #tpu.memory_space<vmem>>, vector<288x192xbf16>
    %cst_101 = arith.constant dense<0.000000e+00> : vector<18x192xf32>
    %106 = tpu.matmul %104, %105, %cst_101 {dimension_numbers = #tpu.dot_dimension_numbers<[1], [0], [0], [1], [0, 0, 1, 1], [], []>} : vector<18x288xbf16>, vector<288x192xbf16>, vector<18x192xf32> -> vector<18x192xf32>
    %c0_102 = arith.constant 0 : index
    %c0_103 = arith.constant 0 : index
    %107 = vector.load %arg11[%c0_102, %c0_103] : memref<1x192xf32, #tpu.memory_space<vmem>>, vector<1x192xf32>
    %108 = vector.broadcast %107 : vector<1x192xf32> to vector<18x192xf32>
    %109 = arith.addf %106, %108 : vector<18x192xf32>
    %cst_104 = arith.constant 0.000000e+00 : f32
    %110 = vector.broadcast %cst_104 : f32 to vector<18x192xf32>
    %111 = arith.maximumf %109, %110 : vector<18x192xf32>
    %c0_105 = arith.constant 0 : index
    %c0_106 = arith.constant 0 : index
    %112 = vector.load %arg16[%c0_105, %c0_106] : memref<18x1xf32, #tpu.memory_space<vmem>>, vector<18x1xf32>
    %113 = vector.broadcast %112 : vector<18x1xf32> to vector<18x192xf32>
    %114 = arith.mulf %111, %113 : vector<18x192xf32>
    %c1_107 = arith.constant 1 : index
    %c0_108 = arith.constant 0 : index
    %115 = vector.load %arg34[%c1_107, %c0_108] : memref<20x192xf32, #tpu.memory_space<vmem>>, vector<18x192xf32>
    tpu.vector_store %arg34[%c1_107, %c0_108], %114 {strides = array<i32>} : memref<20x192xf32, #tpu.memory_space<vmem>>, vector<18x192xf32>,
    %c0_109 = arith.constant 0 : index
    %c0_110 = arith.constant 0 : index
    %116 = vector.load %arg34[%c0_109, %c0_110] : memref<20x192xf32, #tpu.memory_space<vmem>>, vector<18x192xf32>
    %c1_111 = arith.constant 1 : index
    %c0_112 = arith.constant 0 : index
    %117 = vector.load %arg34[%c1_111, %c0_112] : memref<20x192xf32, #tpu.memory_space<vmem>>, vector<18x192xf32>
    %c2_113 = arith.constant 2 : index
    %c0_114 = arith.constant 0 : index
    %118 = vector.load %arg34[%c2_113, %c0_114] : memref<20x192xf32, #tpu.memory_space<vmem>>, vector<18x192xf32>
    %119 = tpu.concatenate %116, %117, %118 in 1 : vector<18x192xf32>, vector<18x192xf32>, vector<18x192xf32> -> vector<18x576xf32>
    %120 = arith.truncf %119 : vector<18x576xf32> to vector<18x576xbf16>
    %c0_115 = arith.constant 0 : index
    %c0_116 = arith.constant 0 : index
    %121 = vector.load %arg12[%c0_115, %c0_116] : memref<576x192xbf16, #tpu.memory_space<vmem>>, vector<576x192xbf16>
    %cst_117 = arith.constant dense<0.000000e+00> : vector<18x192xf32>
    %122 = tpu.matmul %120, %121, %cst_117 {dimension_numbers = #tpu.dot_dimension_numbers<[1], [0], [0], [1], [0, 0, 1, 1], [], []>} : vector<18x576xbf16>, vector<576x192xbf16>, vector<18x192xf32> -> vector<18x192xf32>
    %c0_118 = arith.constant 0 : index
    %c0_119 = arith.constant 0 : index
    %123 = vector.load %arg13[%c0_118, %c0_119] : memref<1x192xf32, #tpu.memory_space<vmem>>, vector<1x192xf32>
    %124 = vector.broadcast %123 : vector<1x192xf32> to vector<18x192xf32>
    %125 = arith.addf %122, %124 : vector<18x192xf32>
    %cst_120 = arith.constant 0.000000e+00 : f32
    %126 = vector.broadcast %cst_120 : f32 to vector<18x192xf32>
    %127 = arith.maximumf %125, %126 : vector<18x192xf32>
    %128 = vector.extract_strided_slice %127 {offsets = [0, 0], sizes = [17, 192], strides = [1, 1]} : vector<18x192xf32> to vector<17x192xf32>
    %129 = vector.extract_strided_slice %127 {offsets = [1, 0], sizes = [17, 192], strides = [1, 1]} : vector<18x192xf32> to vector<17x192xf32>
    %130 = arith.maximumf %128, %129 : vector<17x192xf32>
    %131 = vector.extract_strided_slice %130 {offsets = [0, 0], sizes = [17, 160], strides = [1, 1]} : vector<17x192xf32> to vector<17x160xf32>
    %132 = vector.extract_strided_slice %130 {offsets = [0, 32], sizes = [17, 160], strides = [1, 1]} : vector<17x192xf32> to vector<17x160xf32>
    %133 = arith.maximumf %131, %132 : vector<17x160xf32>
    %134 = arith.truncf %133 : vector<17x160xf32> to vector<17x160xbf16>
    %c0_121 = arith.constant 0 : index
    %c0_122 = arith.constant 0 : index
    %135 = vector.load %arg21[%c0_121, %c0_122] : memref<160x64xbf16, #tpu.memory_space<vmem>>, vector<160x64xbf16>
    %cst_123 = arith.constant dense<0.000000e+00> : vector<17x64xf32>
    %136 = tpu.matmul %134, %135, %cst_123 {dimension_numbers = #tpu.dot_dimension_numbers<[1], [0], [0], [1], [0, 0, 1, 1], [], []>} : vector<17x160xbf16>, vector<160x64xbf16>, vector<17x64xf32> -> vector<17x64xf32>
    %c0_124 = arith.constant 0 : index
    %c0_125 = arith.constant 0 : index
    %137 = vector.load %arg22[%c0_124, %c0_125] : memref<6x17xbf16, #tpu.memory_space<vmem>>, vector<6x17xbf16>
    %138 = arith.truncf %136 : vector<17x64xf32> to vector<17x64xbf16>
    %cst_126 = arith.constant dense<0.000000e+00> : vector<6x64xf32>
    %139 = tpu.matmul %137, %138, %cst_126 {dimension_numbers = #tpu.dot_dimension_numbers<[1], [0], [0], [1], [0, 0, 1, 1], [], []>} : vector<6x17xbf16>, vector<17x64xbf16>, vector<6x64xf32> -> vector<6x64xf32>
    %140 = vector.extract_strided_slice %139 {offsets = [0, 0], sizes = [3, 64], strides = [1, 1]} : vector<6x64xf32> to vector<3x64xf32>
    %141 = vector.extract_strided_slice %139 {offsets = [3, 0], sizes = [3, 64], strides = [1, 1]} : vector<6x64xf32> to vector<3x64xf32>
    %142 = tpu.concatenate %140, %141 in 1 : vector<3x64xf32>, vector<3x64xf32> -> vector<3x128xf32>
    %143 = arith.truncf %142 : vector<3x128xf32> to vector<3x128xbf16>
    %c0_127 = arith.constant 0 : index
    %c0_128 = arith.constant 0 : index
    %144 = vector.load %arg23[%c0_127, %c0_128] : memref<128x64xbf16, #tpu.memory_space<vmem>>, vector<128x64xbf16>
    %cst_129 = arith.constant dense<0.000000e+00> : vector<3x64xf32>
    %145 = tpu.matmul %143, %144, %cst_129 {dimension_numbers = #tpu.dot_dimension_numbers<[1], [0], [0], [1], [0, 0, 1, 1], [], []>} : vector<3x128xbf16>, vector<128x64xbf16>, vector<3x64xf32> -> vector<3x64xf32>
    %c0_130 = arith.constant 0 : index
    %c0_131 = arith.constant 0 : index
    %146 = vector.load %arg24[%c0_130, %c0_131] : memref<1x64xf32, #tpu.memory_space<vmem>>, vector<1x64xf32>
    %147 = vector.broadcast %146 : vector<1x64xf32> to vector<3x64xf32>
    %148 = arith.addf %145, %147 : vector<3x64xf32>
    %cst_132 = arith.constant 0.000000e+00 : f32
    %149 = vector.broadcast %cst_132 : f32 to vector<3x64xf32>
    %150 = arith.maximumf %148, %149 : vector<3x64xf32>
    %151 = arith.truncf %150 : vector<3x64xf32> to vector<3x64xbf16>
    %c0_133 = arith.constant 0 : index
    %c0_134 = arith.constant 0 : index
    %152 = vector.load %arg25[%c0_133, %c0_134] : memref<64x64xbf16, #tpu.memory_space<vmem>>, vector<64x64xbf16>
    %cst_135 = arith.constant dense<0.000000e+00> : vector<3x64xf32>
    %153 = tpu.matmul %151, %152, %cst_135 {dimension_numbers = #tpu.dot_dimension_numbers<[1], [0], [0], [1], [0, 0, 1, 1], [], []>} : vector<3x64xbf16>, vector<64x64xbf16>, vector<3x64xf32> -> vector<3x64xf32>
    %c0_136 = arith.constant 0 : index
    %c0_137 = arith.constant 0 : index
    %154 = vector.load %arg26[%c0_136, %c0_137] : memref<1x64xf32, #tpu.memory_space<vmem>>, vector<1x64xf32>
    %155 = vector.broadcast %154 : vector<1x64xf32> to vector<3x64xf32>
    %156 = arith.addf %153, %155 : vector<3x64xf32>
    %cst_138 = arith.constant 0.000000e+00 : f32
    %157 = vector.broadcast %cst_138 : f32 to vector<3x64xf32>
    %158 = arith.maximumf %156, %157 : vector<3x64xf32>
    %cst_139 = arith.constant dense<0xFF800000> : vector<64xf32>
    %159 = vector.multi_reduction <maximumf>, %158, %cst_139 [0] : vector<3x64xf32> to vector<64xf32>
    %160 = vector.shape_cast %159 : vector<64xf32> to vector<1x64xf32>
    %161 = arith.truncf %160 : vector<1x64xf32> to vector<1x64xbf16>
    %c0_140 = arith.constant 0 : index
    %c0_141 = arith.constant 0 : index
    %162 = vector.load %arg27[%c0_140, %c0_141] : memref<64x40xbf16, #tpu.memory_space<vmem>>, vector<64x40xbf16>
    %cst_142 = arith.constant dense<0.000000e+00> : vector<1x40xf32>
    %163 = tpu.matmul %161, %162, %cst_142 {dimension_numbers = #tpu.dot_dimension_numbers<[1], [0], [0], [1], [0, 0, 1, 1], [], []>} : vector<1x64xbf16>, vector<64x40xbf16>, vector<1x40xf32> -> vector<1x40xf32>
    %c0_143 = arith.constant 0 : index
    %c0_144 = arith.constant 0 : index
    %164 = vector.load %arg28[%c0_143, %c0_144] : memref<1x40xf32, #tpu.memory_space<vmem>>, vector<1x40xf32>
    %165 = arith.addf %163, %164 : vector<1x40xf32>
    %c0_145 = arith.constant 0 : index
    %c0_146 = arith.constant 0 : index
    %c0_147 = arith.constant 0 : index
    %166 = vector.load %arg29[%c0_145, %c0_146, %c0_147] : memref<1x1x40xf32, #tpu.memory_space<vmem>>, vector<1x1x40xf32>
    %167 = vector.shape_cast %166 : vector<1x1x40xf32> to vector<1x40xf32>
    %168 = vector.shape_cast %165 : vector<1x40xf32> to vector<1x1x40xf32>
    tpu.vector_store %arg29[%c0_145, %c0_146, %c0_147], %168 {strides = array<i32>} : memref<1x1x40xf32, #tpu.memory_space<vmem>>, vector<1x1x40xf32>,
    return
  }
  func.func @transform_0(%arg0: i32) -> (i32, i32, i32) {
    %c0_i32 = arith.constant 0 : i32
    %c0_i32_0 = arith.constant 0 : i32
    %c0_i32_1 = arith.constant 0 : i32
    return %arg0, %c0_i32, %c0_i32_0 : i32, i32, i32
  }
  func.func @transform_1(%arg0: i32) -> (i32, i32) {
    %c0_i32 = arith.constant 0 : i32
    %c0_i32_0 = arith.constant 0 : i32
    %c0_i32_1 = arith.constant 0 : i32
    return %c0_i32, %c0_i32_0 : i32, i32
  }
  func.func @transform_2(%arg0: i32) -> (i32, i32) {
    %c0_i32 = arith.constant 0 : i32
    %c0_i32_0 = arith.constant 0 : i32
    %c0_i32_1 = arith.constant 0 : i32
    return %c0_i32, %c0_i32_0 : i32, i32
  }
  func.func @transform_3(%arg0: i32) -> (i32, i32) {
    %c0_i32 = arith.constant 0 : i32
    %c0_i32_0 = arith.constant 0 : i32
    %c0_i32_1 = arith.constant 0 : i32
    return %c0_i32, %c0_i32_0 : i32, i32
  }
  func.func @transform_4(%arg0: i32) -> (i32, i32) {
    %c0_i32 = arith.constant 0 : i32
    %c0_i32_0 = arith.constant 0 : i32
    %c0_i32_1 = arith.constant 0 : i32
    return %c0_i32, %c0_i32_0 : i32, i32
  }
  func.func @transform_5(%arg0: i32) -> (i32, i32) {
    %c0_i32 = arith.constant 0 : i32
    %c0_i32_0 = arith.constant 0 : i32
    %c0_i32_1 = arith.constant 0 : i32
    return %c0_i32, %c0_i32_0 : i32, i32
  }
  func.func @transform_6(%arg0: i32) -> (i32, i32) {
    %c0_i32 = arith.constant 0 : i32
    %c0_i32_0 = arith.constant 0 : i32
    %c0_i32_1 = arith.constant 0 : i32
    return %c0_i32, %c0_i32_0 : i32, i32
  }
  func.func @transform_7(%arg0: i32) -> (i32, i32) {
    %c0_i32 = arith.constant 0 : i32
    %c0_i32_0 = arith.constant 0 : i32
    %c0_i32_1 = arith.constant 0 : i32
    return %c0_i32, %c0_i32_0 : i32, i32
  }
  func.func @transform_8(%arg0: i32) -> (i32, i32) {
    %c0_i32 = arith.constant 0 : i32
    %c0_i32_0 = arith.constant 0 : i32
    %c0_i32_1 = arith.constant 0 : i32
    return %c0_i32, %c0_i32_0 : i32, i32
  }
  func.func @transform_9(%arg0: i32) -> (i32, i32) {
    %c0_i32 = arith.constant 0 : i32
    %c0_i32_0 = arith.constant 0 : i32
    %c0_i32_1 = arith.constant 0 : i32
    return %c0_i32, %c0_i32_0 : i32, i32
  }
  func.func @transform_10(%arg0: i32) -> (i32, i32) {
    %c0_i32 = arith.constant 0 : i32
    %c0_i32_0 = arith.constant 0 : i32
    %c0_i32_1 = arith.constant 0 : i32
    return %c0_i32, %c0_i32_0 : i32, i32
  }
  func.func @transform_11(%arg0: i32) -> (i32, i32) {
    %c0_i32 = arith.constant 0 : i32
    %c0_i32_0 = arith.constant 0 : i32
    %c0_i32_1 = arith.constant 0 : i32
    return %c0_i32, %c0_i32_0 : i32, i32
  }
  func.func @transform_12(%arg0: i32) -> (i32, i32) {
    %c0_i32 = arith.constant 0 : i32
    %c0_i32_0 = arith.constant 0 : i32
    %c0_i32_1 = arith.constant 0 : i32
    return %c0_i32, %c0_i32_0 : i32, i32
  }
  func.func @transform_13(%arg0: i32) -> (i32, i32) {
    %c0_i32 = arith.constant 0 : i32
    %c0_i32_0 = arith.constant 0 : i32
    %c0_i32_1 = arith.constant 0 : i32
    return %c0_i32, %c0_i32_0 : i32, i32
  }
  func.func @transform_14(%arg0: i32) -> (i32, i32) {
    %c0_i32 = arith.constant 0 : i32
    %c0_i32_0 = arith.constant 0 : i32
    %c0_i32_1 = arith.constant 0 : i32
    return %c0_i32, %c0_i32_0 : i32, i32
  }
  func.func @transform_15(%arg0: i32) -> (i32, i32) {
    %c0_i32 = arith.constant 0 : i32
    %c0_i32_0 = arith.constant 0 : i32
    %c0_i32_1 = arith.constant 0 : i32
    return %c0_i32, %c0_i32_0 : i32, i32
  }
  func.func @transform_16(%arg0: i32) -> (i32, i32) {
    %c0_i32 = arith.constant 0 : i32
    %c0_i32_0 = arith.constant 0 : i32
    %c0_i32_1 = arith.constant 0 : i32
    return %c0_i32, %c0_i32_0 : i32, i32
  }
  func.func @transform_17(%arg0: i32) -> (i32, i32) {
    %c0_i32 = arith.constant 0 : i32
    %c0_i32_0 = arith.constant 0 : i32
    %c0_i32_1 = arith.constant 0 : i32
    return %c0_i32, %c0_i32_0 : i32, i32
  }
  func.func @transform_18(%arg0: i32) -> (i32, i32) {
    %c0_i32 = arith.constant 0 : i32
    %c0_i32_0 = arith.constant 0 : i32
    %c0_i32_1 = arith.constant 0 : i32
    return %c0_i32, %c0_i32_0 : i32, i32
  }
  func.func @transform_19(%arg0: i32) -> (i32, i32) {
    %c0_i32 = arith.constant 0 : i32
    %c0_i32_0 = arith.constant 0 : i32
    %c0_i32_1 = arith.constant 0 : i32
    return %c0_i32, %c0_i32_0 : i32, i32
  }
  func.func @transform_20(%arg0: i32) -> (i32, i32) {
    %c0_i32 = arith.constant 0 : i32
    %c0_i32_0 = arith.constant 0 : i32
    %c0_i32_1 = arith.constant 0 : i32
    return %c0_i32, %c0_i32_0 : i32, i32
  }
  func.func @transform_21(%arg0: i32) -> (i32, i32) {
    %c0_i32 = arith.constant 0 : i32
    %c0_i32_0 = arith.constant 0 : i32
    %c0_i32_1 = arith.constant 0 : i32
    return %c0_i32, %c0_i32_0 : i32, i32
  }
  func.func @transform_22(%arg0: i32) -> (i32, i32) {
    %c0_i32 = arith.constant 0 : i32
    %c0_i32_0 = arith.constant 0 : i32
    %c0_i32_1 = arith.constant 0 : i32
    return %c0_i32, %c0_i32_0 : i32, i32
  }
  func.func @transform_23(%arg0: i32) -> (i32, i32) {
    %c0_i32 = arith.constant 0 : i32
    %c0_i32_0 = arith.constant 0 : i32
    %c0_i32_1 = arith.constant 0 : i32
    return %c0_i32, %c0_i32_0 : i32, i32
  }
  func.func @transform_24(%arg0: i32) -> (i32, i32) {
    %c0_i32 = arith.constant 0 : i32
    %c0_i32_0 = arith.constant 0 : i32
    %c0_i32_1 = arith.constant 0 : i32
    return %c0_i32, %c0_i32_0 : i32, i32
  }
  func.func @transform_25(%arg0: i32) -> (i32, i32) {
    %c0_i32 = arith.constant 0 : i32
    %c0_i32_0 = arith.constant 0 : i32
    %c0_i32_1 = arith.constant 0 : i32
    return %c0_i32, %c0_i32_0 : i32, i32
  }
  func.func @transform_26(%arg0: i32) -> (i32, i32) {
    %c0_i32 = arith.constant 0 : i32
    %c0_i32_0 = arith.constant 0 : i32
    %c0_i32_1 = arith.constant 0 : i32
    return %c0_i32, %c0_i32_0 : i32, i32
  }
  func.func @transform_27(%arg0: i32) -> (i32, i32) {
    %c0_i32 = arith.constant 0 : i32
    %c0_i32_0 = arith.constant 0 : i32
    %c0_i32_1 = arith.constant 0 : i32
    return %c0_i32, %c0_i32_0 : i32, i32
  }
  func.func @transform_28(%arg0: i32) -> (i32, i32, i32) {
    %c0_i32 = arith.constant 0 : i32
    %c0_i32_0 = arith.constant 0 : i32
    %c0_i32_1 = arith.constant 0 : i32
    return %arg0, %c0_i32, %c0_i32_0 : i32, i32, i32
  }
}

</mosaic_0001>

<bundles_post_ra>
// kernel: tpu_custom_call.1
= control target key start
LH: loop header
LB: loop body
LE: loop exit
PB: predicated region body
PF: predicated region fallthrough
CT: control target
= control target key end

     0   :  { %s8839_s0 = inlined_call_operand.vmem [shape: f32[2,56,54], index: 0, kind: input, shape index: {}]   ;;  %s8840_s1 = inlined_call_operand.vmem [shape: bf16[162,144], index: 1, kind: input, shape index: {}]   ;;  %s8841_s2 = inlined_call_operand.vmem [shape: f32[1,144], index: 2, kind: input, shape index: {}]   ;;  %s8842_s3 = inlined_call_operand.vmem [shape: bf16[432,144], index: 3, kind: input, shape index: {}]   ;;  %s8843_s4 = inlined_call_operand.vmem [shape: f32[1,144], index: 4, kind: input, shape index: {}]   ;;  %s8844_s5 = inlined_call_operand.vmem [shape: bf16[240,160], index: 5, kind: input, shape index: {}]   ;;  %s8845_s6 = inlined_call_operand.vmem [shape: f32[1,160], index: 6, kind: input, shape index: {}]   ;;  %s8846_s7 = inlined_call_operand.vmem [shape: bf16[480,160], index: 7, kind: input, shape index: {}]   ;;  %s8847_s8 = inlined_call_operand.vmem [shape: f32[1,160], index: 8, kind: input, shape index: {}]   ;;  %s8848_s9 = inlined_call_operand.vmem [shape: bf16[288,192], index: 9, kind: input, shape index: {}]   ;;  %s8849_s10 = inlined_call_operand.vmem [shape: f32[1,192], index: 10, kind: input, shape index: {}]   ;;  %s8850_s11 = inlined_call_operand.vmem [shape: bf16[576,192], index: 11, kind: input, shape index: {}]   ;;  %s8851_s12 = inlined_call_operand.vmem [shape: f32[1,192], index: 12, kind: input, shape index: {}]   ;;  %s8852_s13 = inlined_call_operand.vmem [shape: f32[54,1], index: 13, kind: input, shape index: {}]   ;;  %s8853_s14 = inlined_call_operand.vmem [shape: f32[30,1], index: 14, kind: input, shape index: {}]   ;;  %s8854_s15 = inlined_call_operand.vmem [shape: f32[18,1], index: 15, kind: input, shape index: {}]   ;;  %s8855_s16 = inlined_call_operand.vmem [shape: bf16[136,80], index: 16, kind: input, shape index: {}]   ;;  %s8856_s17 = inlined_call_operand.vmem [shape: bf16[30,53], index: 17, kind: input, shape index: {}]   ;;  %s8857_s18 = inlined_call_operand.vmem [shape: bf16[144,96], index: 18, kind: input, shape index: {}]   ;;  %s8858_s19 = inlined_call_operand.vmem [shape: bf16[18,29], index: 19, kind: input, shape index: {}]   ;;  %s8859_s20 = inlined_call_operand.vmem [shape: bf16[160,64], index: 20, kind: input, shape index: {}]   ;;  %s8860_s21 = inlined_call_operand.vmem [shape: bf16[6,17], index: 21, kind: input, shape index: {}]   ;;  %s8861_s22 = inlined_call_operand.vmem [shape: bf16[128,64], index: 22, kind: input, shape index: {}]   ;;  %s8862_s23 = inlined_call_operand.vmem [shape: f32[1,64], index: 23, kind: input, shape index: {}]   ;;  %s8863_s24 = inlined_call_operand.vmem [shape: bf16[64,64], index: 24, kind: input, shape index: {}]   ;;  %s8864_s25 = inlined_call_operand.vmem [shape: f32[1,64], index: 25, kind: input, shape index: {}]   ;;  %s8865_s26 = inlined_call_operand.vmem [shape: bf16[64,40], index: 26, kind: input, shape index: {}]   ;;  %s8866_s27 = inlined_call_operand.vmem [shape: f32[1,40], index: 27, kind: input, shape index: {}]   ;;  %s8867_s28 = inlined_call_operand.hbm [shape: f32[2,1,40], index: 28, kind: output, shape index: {}]  }
   0x1   :  { %8890 = sst [smem:[#allocation17_spill]] %s8839_s0 }
   0x2   :  { %8891 = sst [smem:[#allocation18_spill]] %s8840_s1 }
   0x3   :  { %8892 = sst [smem:[#allocation19_spill]] %s8841_s2 }
   0x4   :  { %8893 = sst [smem:[#allocation20_spill]] %s8842_s3 }
   0x5   :  { %8894 = sst [smem:[#allocation21_spill]] %s8843_s4 }
   0x6   :  { %8895 = sst [smem:[#allocation22_spill]] %s8844_s5 }
   0x7   :  { %8896 = sst [smem:[#allocation23_spill]] %s8845_s6 }
   0x8   :  { %8897 = sst [smem:[#allocation24_spill]] %s8846_s7 }
   0x9   :  { %8898 = sst [smem:[#allocation25_spill]] %s8847_s8 }
   0xa   :  { %8899 = sst [smem:[#allocation26_spill]] %s8848_s9 }
   0xb   :  { %8900 = sst [smem:[#allocation27_spill]] %s8849_s10 }
   0xc   :  { %8901 = sst [smem:[#allocation28_spill]] %s8850_s11 }
   0xd   :  { %8902 = sst [smem:[#allocation29_spill]] %s8851_s12 }
   0xe   :  { %8903 = sst [smem:[#allocation30_spill]] %s8866_s27 }
   0xf   :  { %8904 = sst [smem:[#allocation31_spill]] %s8867_s28 }
  0x10   :  { %33 = vsyncpa [#allocation8], 0 }
  0x11   :  { %35 = vsyncpa [#allocation8 + $0x1], 0  ;;  %s7035_s8 = smov 0   ;;  %s7037_s5 = smov 0  }
  0x12   :  { %s7039_s9 = smov 0   ;;  %s7041_s30 = smov 0  }
  0x13 LB: > { %8905 = sst [smem:[#allocation10_spill]] %s6862_s8  ;;  %s7056_s3 = sadd.s32 4294967295, %s6874_s30   ;;  %s6874_s30 = sphi %s7041_s30, %s8936_s30   ;;  %s6870_s9 = sphi %s7039_s9, %s8938_s9   ;;  %s6866_s5 = sphi %s7037_s5, %s8940_s5   ;;  %s6862_s8 = sphi %s7035_s8, %s8939_s8  }
  0x14   : > { %8906 = sst [smem:[#allocation11_spill]] %s6870_s9  ;;  %s5504_s6 = sadd.s32 4294967294, %s6874_s30  }
  0x15   : > { %8907 = sst [smem:[#allocation12_spill]] %s6874_s30  ;;  %s7060_s10 = sadd.s32 1, %s6874_s30  }
  0x16   : > { %8908 = sst [smem:[#allocation13_spill]] %s7060_s10  ;;  %s641_s0 = sadd.s32 1, %s6870_s9 }
  0x17   : > { %s638_s11 = ssub.s32 %s6874_s30, %s7060_s10  ;;  %p651_p0 = scmp.ne.s32.totalorder %s6870_s9, %s6866_s5 }
  0x18   : > { %p639_p1 = scmp.eq.s32.totalorder %s638_s11, 0  ;;  %p652_p2 = scmp.eq.s32.totalorder %s7056_s3, 1 }
  0x19   : > { %p657_p3 = scmp.ne.s32.totalorder %s6866_s5, %s6862_s8  ;;  %p658_p4 = scmp.eq.s32.totalorder %s5504_s6, 1 }
  0x1a   : > { %s7071_s29 = scalar_select %p639_p1, %s6870_s9, %s641_s0  }
  0x1b   : > { %p7073_p5 = por %p652_p2, %p651_p0  ;;  %p7077_p6 = por %p658_p4, %p657_p3 }
  0x1c   : > { %8909 = sst [smem:[#allocation14_spill]] %s7071_s29  ;;  %p5507_p7 = scmp.ge.s32.totalorder %s6874_s30, 1 }
  0x1d   : > { %s8910_s2 = scalar_select %p7073_p5, 1, 0 }
  0x1e   : > { %s8912_s7 = scalar_select %p7077_p6, 1, 0 }
  0x1f   : > { %8911 = sst [smem:[#allocation15_spill]] %s8910_s2  ;;  %p765_p8 = scmp.lt.s32.totalorder %s6874_s30, 3 }
  0x20   : > { %8913 = sst [smem:[#allocation16_spill]] %s8912_s7 }
  0x21   : > { %p766_p9 = pnand %p5507_p7, %p765_p8 }
  0x22   : > { %p838_p10 = scmp.lt.s32.totalorder (!%p766_p9), %s7056_s3, 1  ;;  %s8914_s4 = sld [smem:[#allocation18_spill]] (!%p766_p9)  ;;  %v1218_v38 = vld [vmem:[%s8852_s13 + $0x8] sm:$0xff] (!%p766_p9)  ;;  %v6878_v41 = vmov (!%p766_p9), 0   ;;  %v1217_v42 = vld [vmem:[%s8852_s13] sm:$0xff] (!%p766_p9)  ;;  %v1219_v43 = vld [vmem:[%s8852_s13 + $0x10] sm:$0xff] (!%p766_p9) }
  0x23   : > { %769 = sbr.rel (%p766_p9) target bundleno = 4909 (0x132d), region = 132  ;;  %s8915_s0 = sld [smem:[#allocation17_spill]] (!%p766_p9)  ;;  %6138 = vset.pattern.permute.xlu1 (!%p766_p9), %v6878_v41  ;;  %6137 = vset.pattern.permute.xlu0 (!%p766_p9), %v6878_v41  ;;  %v1221_v45 = vld [vmem:[%s8852_s13 + $0x20] sm:$0xff] (!%p766_p9)  ;;  %v1220_v46 = vld [vmem:[%s8852_s13 + $0x18] sm:$0xff] (!%p766_p9)  ;;  %vm1125_vm0 = vcmask (!%p766_p9), 1040384   ;;  %v1222_v49 = vld [vmem:[%s8852_s13 + $0x28] sm:$0xff] (!%p766_p9) }
  0x24   : > { %s6876_s27 = smov (!%p766_p9), 54   ;;  %s6877_s7 = smov (!%p766_p9), 108   ;;  %v1223_v50 = vld [vmem:[%s8852_s13 + $0x30] sm:$0x3f] (!%p766_p9)  ;;  %vm950_vm1 = vcmask (!%p766_p9), 441344   ;;  %vm958_vm2 = vcmask (!%p766_p9), 883712  }
  0x25   : > { %vm1112_vm3 = vcmask (!%p766_p9), 277504   ;;  %s8916_s1 = sld [smem:[#allocation20_spill]] (!%p766_p9)  ;;  %s8917_s9 = sld [smem:[#allocation19_spill]] (!%p766_p9)  ;;  %vm1328_vm5 = vcmask (!%p766_p9), 130049   ;;  %vm1331_vm6 = vcmask (!%p766_p9), 130048   ;;  %vm1380_vm7 = vcmask (!%p766_p9), 1046528  }
  0x26   : > { %vm1460_vm8 = vcmask (!%p766_p9), 1045504   ;;  %vm1342_vm9 = vcmask (!%p766_p9), 129024   ;;  %s6881_s30 = smov (!%p766_p9), 32   ;;  %vm1515_vm10 = vcmask (!%p766_p9), 261120   ;;  %vm1903_vm11 = vcmask (!%p766_p9), 392192   ;;  %s8918_s12 = sld [smem:[#allocation21_spill]] (!%p766_p9) }
  0x27   : > { %vm2307_vm12 = vcmask (!%p766_p9), 1043456   ;;  %s6882_s10 = smov (!%p766_p9), 120   ;;  %vm2182_vm13 = vcmask (!%p766_p9), 982016   ;;  %vm2294_vm14 = vcmask (!%p766_p9), 64512   ;;  %vm2393_vm15 = vcmask (!%p766_p9), 433152   ;;  %s8928_s6 = sld [smem:[#allocation29_spill]] (!%p766_p9) }
  0x28   : > { %v6354_v0 = vld [vmem:[%s8914_s4 + $0x4] ss:$8 sps:$4 sm:$0xff] (!%p766_p9)   ;;  %v6356_v1 = vld [vmem:[%s8914_s4] ss:$8 sps:$4 sm:$0xff] (!%p766_p9)   ;;  %v6357_v2 = vld [vmem:[%s8914_s4 + $0x14] ss:$8 sps:$4 sm:$0xff] (!%p766_p9)  }
  0x29   : > { %1132 = vmatprep.subr.bf16.mxu0 (!%p766_p9), %v6354_v0  ;;  %v6359_v3 = vld [vmem:[%s8914_s4 + $0x10] ss:$8 sps:$4 sm:$0xff] (!%p766_p9)   ;;  %v6360_v4 = vld [vmem:[%s8914_s4 + $0x24] ss:$8 sps:$4 sm:$0xff] (!%p766_p9)   ;;  %v6362_v5 = vld [vmem:[%s8914_s4 + $0x20] ss:$8 sps:$4 sm:$0xff] (!%p766_p9)  }
  0x2a   : > { %s839_s11 = scalar_select %p838_p10, %s7056_s3, 1  ;;  %1133 = vmatpush1.bf16.msra.mxu0 %v6356_v1  ;;  %v6363_v6 = vld [vmem:[%s8914_s4 + $0x34] ss:$8 sps:$4 sm:$0xff]   ;;  %v6365_v18 = vld [vmem:[%s8914_s4 + $0x30] ss:$8 sps:$4 sm:$0xff]  }
  0x2b   : > { %1134 = vmatprep.subr.bf16.mxu0 %v6357_v2  ;;  %v6366_v19 = vld [vmem:[%s8914_s4 + $0x44] ss:$8 sps:$4 sm:$0xff]   ;;  %v6368_v27 = vld [vmem:[%s8914_s4 + $0x40] ss:$8 sps:$4 sm:$0xff]   ;;  %v6369_v28 = vld [vmem:[%s8914_s4 + $0x54] ss:$8 sps:$4 sm:$0xff]  }
  0x2c   : > { %s6054_s8 = smul.u32 56, %s839_s11  ;;  %v6371_v31 = vld [vmem:[%s8914_s4 + $0x50] ss:$8 sps:$4 sm:$0xff]   ;;  %v6372_v32 = vld [vmem:[%s8914_s4 + $0x64] ss:$8 sps:$4 sm:$0xff]   ;;  %s836_s11 = sand.u32 1, %s6866_s5  }
  0x2d   : > { %v6374_v33 = vld [vmem:[%s8914_s4 + $0x60] ss:$8 sps:$4 sm:$0xff]   ;;  %v6375_v34 = vld [vmem:[%s8914_s4 + $0x74] ss:$8 sps:$4 sm:$0xff]   ;;  %v6377_v35 = vld [vmem:[%s8914_s4 + $0x70] ss:$8 sps:$4 sm:$0xff]  }
  0x2e   : > { %s7103_s28 = scalar_lea.vmem %s8915_s0, %s6054_s8  ;;  %1135 = vmatpush1.bf16.msra.mxu0 %v6359_v3  ;;  %v6378_v36 = vld [vmem:[%s8914_s4 + $0x84] ss:$8 sps:$4 sm:$0xff]   ;;  %v6380_v37 = vld [vmem:[%s8914_s4 + $0x80] ss:$8 sps:$4 sm:$0xff]   ;;  %v6381_v39 = vld [vmem:[%s8914_s4 + $0x94] ss:$8 sps:$4 sm:$0xff]  }
  0x2f   : > { %v880_v7 = vld [vmem:[%s7103_s28 + $0x1] sm:$0xff]  ;;  %v881_v8 = vld [vmem:[%s7103_s28 + $0x9] sm:$0xff]  ;;  %v882_v12 = vld [vmem:[%s7103_s28 + $0x11] sm:$0xff]  ;;  %1136 = vmatprep.subr.bf16.mxu0 %v6360_v4  ;;  %s8919_s0 = sld [smem:[#allocation22_spill]]  ;;  %s8923_s8 = sld [smem:[#allocation26_spill]] }
  0x30   : > { %v887_v9 = vld [vmem:[%s7103_s28 + $0x2] sm:$0xff]  ;;  %v6107_v10 = vpack.i.bf16 %v881_v8, %v880_v7  ;;  %v888_v11 = vld [vmem:[%s7103_s28 + $0xa] sm:$0xff]  ;;  %v883_v13 = vld [vmem:[%s7103_s28 + $0x19] sm:$0xff] }
  0x31   : > { %v6117_v14 = vpack.i.bf16 %v883_v13, %v882_v12  ;;  %v889_v15 = vld [vmem:[%s7103_s28 + $0x12] sm:$0xff]  ;;  %v890_v16 = vld [vmem:[%s7103_s28 + $0x1a] sm:$0xff]  ;;  %v6112_v17 = vpack.i.bf16 %v888_v11, %v887_v9  ;;  %v885_v22 = vld [vmem:[%s7103_s28 + $0x29] sm:$0xff] }
  0x32   : > { %6108 = vrot.lane.b32.xlu0 %v6107_v10, %s6876_s27  ;;  %v6122_v20 = vpack.i.bf16 %v890_v16, %v889_v15  ;;  %v884_v21 = vld [vmem:[%s7103_s28 + $0x21] sm:$0xff]  ;;  %1137 = vmatpush1.bf16.msra.mxu0 %v6362_v5  ;;  %v892_v24 = vld [vmem:[%s7103_s28 + $0x2a] sm:$0xff]  ;;  %v893_v30 = vld [vmem:[%s7103_s28 + $0x32] sm:$0x3f] }
  0x33   : > { %6118 = vrot.lane.b32.xlu1 %v6117_v14, %s6876_s27  ;;  %v891_v23 = vld [vmem:[%s7103_s28 + $0x22] sm:$0xff]  ;;  %1138 = vmatprep.subr.bf16.mxu0 %v6363_v6  ;;  %v6127_v25 = vpack.i.bf16 %v885_v22, %v884_v21  ;;  %v886_v29 = vld [vmem:[%s7103_s28 + $0x31] sm:$0x3f]  ;;  %v876_v0 = vld [vmem:[%s7103_s28 + $0x18] sm:$0xff] }
  0x34   : > { %v6132_v26 = vpack.i.bf16 %v892_v24, %v891_v23  ;;  %v994_v40 = vld [vmem:[%s8914_s4 + $0xa0] sm:$0x11]  ;;  %v6383_v44 = vld [vmem:[%s8914_s4 + $0x90] ss:$8 sps:$4 sm:$0xff]   ;;  %v874_v54 = vld [vmem:[%s7103_s28 + $0x8] sm:$0xff] }
  0x35   : > { %v5530_v47 = vcombine.high %v994_v40, %v994_v40  ;;  %v5529_v48 = vcombine.low %v994_v40, %v994_v40  ;;  %v873_v53 = vld [vmem:[%s7103_s28] sm:$0xff]  ;;  %v875_v63 = vld [vmem:[%s7103_s28 + $0x10] sm:$0xff]  ;;  %v878_v16 = vld [vmem:[%s7103_s28 + $0x28] sm:$0xff] }
  0x36   : > { %6113 = vrot.lane.b32.xlu0 %v6112_v17, %s6877_s7  ;;  %1139 = vmatpush1.bf16.msra.mxu0 %v6365_v18  ;;  %v877_v15 = vld [vmem:[%s7103_s28 + $0x20] sm:$0xff] }
  0x37   : > { %6123 = vrot.lane.b32.xlu1 %v6122_v20, %s6877_s7  ;;  %1140 = vmatprep.subr.bf16.mxu0 %v6366_v19  ;;  %v1127_v51 = vsel %vm1125_vm0, %v5529_v48, 0  ;;  %v6388_v40 = vld [vmem:[%s8916_s1] ss:$8 sps:$4 sm:$0xff]   ;;  %v6398_v48 = vld [vmem:[%s8916_s1 + $0x44] ss:$8 sps:$4 sm:$0xff]  }
  0x3a   : > { %6128 = vrot.lane.b32.xlu0 %v6127_v25, %s6876_s27  ;;  %1141 = vmatpush1.bf16.msra.mxu0 %v6368_v27 }
  0x3b   : > { %6133 = vrot.lane.b32.xlu1 %v6132_v26, %s6877_s7  ;;  %1142 = vmatprep.subr.bf16.mxu0 %v6369_v28 }
  0x3e   : > { %913 = vrot.lane.b32.xlu0 %v886_v29, %s6876_s27  ;;  %1143 = vmatpush1.bf16.msra.mxu0 %v6371_v31  ;;  %v879_v31 = vld [vmem:[%s7103_s28 + $0x30] sm:$0x3f]  ;;  %s8925_s27 = smov 64   ;;  %s8930_s28 = sld [smem:[#allocation30_spill]] }
  0x3f   : > { %941 = vrot.lane.b32.xlu1 %v893_v30, %s6877_s7  ;;  %1144 = vmatprep.subr.bf16.mxu0 %v6372_v32  ;;  %s6884_s7 = smov 80  }
  0x42   : > { %1145 = vmatpush1.bf16.msra.mxu0 %v6374_v33  ;;  %1226 = vperm.xlu0 %6137, %v1217_v42   ;;  %v6389_v42 = vld [vmem:[%s8916_s1 + $0x14] ss:$8 sps:$4 sm:$0xff]  }
  0x43   : > { %1146 = vmatprep.subr.bf16.mxu0 %v6375_v34  ;;  %1231 = vperm.xlu1 %6138, %v1218_v38   ;;  %v6879_v38 = vmov 0.0  }
  0x46   : > { %1147 = vmatpush1.bf16.msra.mxu0 %v6377_v35  ;;  %1241 = vperm.xlu0 %6137, %v1220_v46   ;;  %v6395_v46 = vld [vmem:[%s8916_s1 + $0x34] ss:$8 sps:$4 sm:$0xff]  }
  0x47   : > { %1148 = vmatprep.subr.bf16.mxu0 %v6378_v36  ;;  %1236 = vperm.xlu1 %6138, %v1219_v43   ;;  %v6391_v43 = vld [vmem:[%s8916_s1 + $0x10] ss:$8 sps:$4 sm:$0xff]  }
  0x4a   : > { %1149 = vmatpush1.bf16.msra.mxu0 %v6380_v37  ;;  %1251 = vperm.xlu0 %6137, %v1222_v49   ;;  %v844_v37 = vlaneseq  ;;  %v6400_v49 = vld [vmem:[%s8916_s1 + $0x40] ss:$8 sps:$4 sm:$0xff]  }
  0x4b   : > { %1150 = vmatprep.subr.bf16.mxu0 %v6381_v39  ;;  %1246 = vperm.xlu1 %6138, %v1221_v45   ;;  %v6386_v39 = vld [vmem:[%s8916_s1 + $0x4] ss:$8 sps:$4 sm:$0xff]   ;;  %v6394_v45 = vld [vmem:[%s8916_s1 + $0x20] ss:$8 sps:$4 sm:$0xff]  }
  0x4c   : > { %vm846_vm4 = vcmp.lt.s32.totalorder %v844_v37, 144  ;;  %1916 = vmatprep.subr.bf16.mxu1 %v6386_v39 }
  0x4d   : > { %851 = vst.msk [vmem:[#allocation2 + $0x67] ss:$8 sm:$0x3] %vm846_vm4, %v6879_v38  ;;  %848 = vst.msk [vmem:[#allocation2] ss:$8 sm:$0x3] %vm846_vm4, %v6879_v38  ;;  %1917 = vmatpush1.bf16.msra.mxu1 %v6388_v40 }
  0x4e   : > { %1151 = vmatpush1.bf16.msra.mxu0 %v6383_v44  ;;  %1918 = vmatprep.subr.bf16.mxu1 %v6389_v42  ;;  %v6392_v44 = vld [vmem:[%s8916_s1 + $0x24] ss:$8 sps:$4 sm:$0xff]   ;;  %v6431_v42 = vld [vmem:[%s8916_s1 + $0xf4] ss:$8 sps:$4 sm:$0xff]   ;;  %vm2456_vm4 = vcmask 654336  }
  0x4f   : > { %5531 = vmatprep.subr.msk.bf16.mxu0 %vm1125_vm0, %v5530_v47  ;;  %1256 = vperm.xlu1 %6138, %v1223_v50   ;;  %v6397_v47 = vld [vmem:[%s8916_s1 + $0x30] ss:$8 sps:$4 sm:$0xff]   ;;  %v6401_v50 = vld [vmem:[%s8916_s1 + $0x54] ss:$8 sps:$4 sm:$0xff]  }
  0x51   : > { %1919 = vmatpush1.bf16.msra.mxu1 %v6391_v43  ;;  %v6433_v43 = vld [vmem:[%s8916_s1 + $0xf0] ss:$8 sps:$4 sm:$0xff]  }
  0x52   : > { %1153 = vmatpush1.bf16.msra.mxu0 %v1127_v51  ;;  %1920 = vmatprep.subr.bf16.mxu1 %v6392_v44  ;;  %v6403_v51 = vld [vmem:[%s8916_s1 + $0x50] ss:$8 sps:$4 sm:$0xff]  }
  0x53   : > { %2311 = vmatprep.subr.bf16.mxu0 %v6878_v41 }
  0x55   : > { %1921 = vmatpush1.bf16.msra.mxu1 %v6394_v45 }
  0x56   : > { %1922 = vmatprep.subr.bf16.mxu1 %v6395_v46 }
  0x59   : > { %1923 = vmatpush1.bf16.msra.mxu1 %v6397_v47 }
  0x5a   : > { %1924 = vmatprep.subr.bf16.mxu1 %v6398_v48 }
  0x5d   : > { %1925 = vmatpush1.bf16.msra.mxu1 %v6400_v49 }
  0x5e   : > { %1926 = vmatprep.subr.bf16.mxu1 %v6401_v50 }
  0x61   : > { %1927 = vmatpush1.bf16.msra.mxu1 %v6403_v51 }
  0xa4   : > { %v6109_v52 = vpop.permute.xlu0 %6108 }
  0xa5   : > { %v6119_v55 = vpop.permute.xlu1 %6118  ;;  %v6111_v56 = vunpack.i.h.bf16 %v6109_v52  ;;  %v6110_v57 = vunpack.i.l.bf16 %v6109_v52  ;;  %v6404_v52 = vld [vmem:[%s8916_s1 + $0x64] ss:$8 sps:$4 sm:$0xff]  }
  0xa6   : > { %v6121_v61 = vunpack.i.h.bf16 %v6119_v55  ;;  %v6120_v62 = vunpack.i.l.bf16 %v6119_v55  ;;  %1928 = vmatprep.subr.bf16.mxu1 %v6404_v52  ;;  %v6409_v55 = vld [vmem:[%s8916_s1 + $0x70] ss:$8 sps:$4 sm:$0xff]  }
  0xa7   : > { %v951_v2 = vsel %vm950_vm1, %v873_v53, %v6110_v57  ;;  %v952_v3 = vsel %vm950_vm1, %v874_v54, %v6111_v56  ;;  %v6406_v53 = vld [vmem:[%s8916_s1 + $0x60] ss:$8 sps:$4 sm:$0xff]   ;;  %v6407_v54 = vld [vmem:[%s8916_s1 + $0x74] ss:$8 sps:$4 sm:$0xff]   ;;  %v6410_v56 = vld [vmem:[%s8916_s1 + $0x84] ss:$8 sps:$4 sm:$0xff]  }
  0xa8   : > { %v6114_v58 = vpop.permute.xlu0 %6113  ;;  %v953_v13 = vsel %vm950_vm1, %v875_v63, %v6120_v62  ;;  %v954_v14 = vsel %vm950_vm1, %v876_v0, %v6121_v61  ;;  %1929 = vmatpush1.bf16.msra.mxu1 %v6406_v53  ;;  %v6412_v57 = vld [vmem:[%s8916_s1 + $0x80] ss:$8 sps:$4 sm:$0xff]   ;;  %v6419_v62 = vld [vmem:[%s8916_s1 + $0xb4] ss:$8 sps:$4 sm:$0xff]   ;;  %v6421_v63 = vld [vmem:[%s8916_s1 + $0xb0] ss:$8 sps:$4 sm:$0xff]  }
  0xa9   : > { %v6116_v59 = vunpack.i.h.bf16 %v6114_v58  ;;  %v6115_v60 = vunpack.i.l.bf16 %v6114_v58  ;;  %v6124_v1 = vpop.permute.xlu1 %6123  ;;  %1930 = vmatprep.subr.bf16.mxu1 %v6407_v54  ;;  %v6413_v58 = vld [vmem:[%s8916_s1 + $0x94] ss:$8 sps:$4 sm:$0xff]   ;;  %v6418_v61 = vld [vmem:[%s8916_s1 + $0xa0] ss:$8 sps:$4 sm:$0xff]   ;;  %v6422_v0 = vld [vmem:[%s8916_s1 + $0xc4] ss:$8 sps:$4 sm:$0xff]  }
  0xaa   : > { %v6126_v4 = vunpack.i.h.bf16 %v6124_v1  ;;  %v6125_v5 = vunpack.i.l.bf16 %v6124_v1  ;;  %v998_v1 = vshrl.u32 %v844_v37, 7 }
  0xab   : > { %v967_v6 = vpack.c.bf16 %v6116_v59, %v6115_v60  ;;  %v959_v7 = vsel %vm958_vm2, %v951_v2, %v6115_v60  ;;  %v960_v8 = vsel %vm958_vm2, %v952_v3, %v6116_v59  ;;  %v6415_v59 = vld [vmem:[%s8916_s1 + $0x90] ss:$8 sps:$4 sm:$0xff]   ;;  %v6416_v60 = vld [vmem:[%s8916_s1 + $0xa4] ss:$8 sps:$4 sm:$0xff]   ;;  %v6424_v2 = vld [vmem:[%s8916_s1 + $0xc0] ss:$8 sps:$4 sm:$0xff]  }
  0xac   : > { %v969_v9 = vpack.c.bf16 %v6126_v4, %v6125_v5  ;;  %v966_v10 = vpack.c.bf16 %v960_v8, %v959_v7  ;;  %v6129_v11 = vpop.permute.xlu0 %6128  ;;  %v961_v21 = vsel %vm958_vm2, %v953_v13, %v6125_v5  ;;  %v962_v22 = vsel %vm958_vm2, %v954_v14, %v6126_v4  ;;  %1931 = vmatpush1.bf16.msra.mxu1 %v6409_v55  ;;  %v6425_v3 = vld [vmem:[%s8916_s1 + $0xd4] ss:$8 sps:$4 sm:$0xff]   ;;  %v995_v5 = vld [vmem:[%s8917_s9] sm:$0x3]  ;;  %v6427_v7 = vld [vmem:[%s8916_s1 + $0xd0] ss:$8 sps:$4 sm:$0xff]  }
  0xad   : > { %5532 = vmatprep.mubr.msk.bf16.mxu0 %vm1112_vm3, %v967_v6  ;;  %v6134_v12 = vpop.permute.xlu1 %6133  ;;  %v6131_v19 = vunpack.i.h.bf16 %v6129_v11  ;;  %v6130_v20 = vunpack.i.l.bf16 %v6129_v11  ;;  %v968_v24 = vpack.c.bf16 %v962_v22, %v961_v21  ;;  %1932 = vmatprep.subr.bf16.mxu1 %v6410_v56  ;;  %v7307_v4 = vsub.s32 0, %v998_v1  ;;  %v6428_v8 = vld [vmem:[%s8916_s1 + $0xe4] ss:$8 sps:$4 sm:$0xff]   ;;  %v6430_v11 = vld [vmem:[%s8916_s1 + $0xe0] ss:$8 sps:$4 sm:$0xff]   ;;  %s6880_s9 = smov 16  }
  0xae   : > { %1165 = vmatmul.mubr.bf16.vlgmr.msra.gmra.mrb[0].mxu0 %v966_v10  ;;  %v6136_v17 = vunpack.i.h.bf16 %v6134_v12  ;;  %v6135_v18 = vunpack.i.l.bf16 %v6134_v12  ;;  %v7312_v6 = vsub.s32 1, %v998_v1 }
  0xaf   : > { %5533 = vmatprep.mubr.msk.bf16.mxu0 %vm1112_vm3, %v969_v9  ;;  %v955_v25 = vsel %vm950_vm1, %v877_v15, %v6130_v20  ;;  %v956_v26 = vsel %vm950_vm1, %v878_v16, %v6131_v19  ;;  %v7321_v9 = vrot.slane %v995_v5, %v7307_v4 }
  0xb0   : > { %v971_v23 = vpack.c.bf16 %v6136_v17, %v6135_v18  ;;  %v963_v27 = vsel %vm958_vm2, %v955_v25, %v6135_v18  ;;  %v964_v28 = vsel %vm958_vm2, %v956_v26, %v6136_v17  ;;  %v914_v30 = vpop.permute.xlu0 %913  ;;  %1933 = vmatpush1.bf16.msra.mxu1 %v6412_v57  ;;  %v7324_v10 = vrot.slane %v995_v5, %v7312_v6 }
  0xb1   : > { %v942_v29 = vpop.permute.xlu1 %941  ;;  %v970_v32 = vpack.c.bf16 %v964_v28, %v963_v27  ;;  %v957_v34 = vsel %vm950_vm1, %v879_v31, %v914_v30  ;;  %1934 = vmatprep.subr.bf16.mxu1 %v6413_v58  ;;  %vm2400_vm1 = vcmask 1041408  }
  0xb2   : > { %v973_v33 = vpack.c.bf16 %v942_v29, %v942_v29  ;;  %v965_v35 = vsel %vm958_vm2, %v957_v34, %v942_v29  ;;  %vm2401_vm2 = vcmask 1042432  }
  0xb3   : > { %v972_v36 = vpack.c.bf16 %v965_v35, %v965_v35 }
  0xb4   : > { %1935 = vmatpush1.bf16.msra.mxu1 %v6415_v59  ;;  %v6436_v59 = vld [vmem:[%s8916_s1 + $0x104] ss:$8 sps:$4 sm:$0xff]  }
  0xb5   : > { %1936 = vmatprep.subr.bf16.mxu1 %v6416_v60 }
  0xb6   : > { %1175 = vmatmul.mubr.bf16.gmra.mrb[4].mxu0 %v968_v24 }
  0xb7   : > { %5534 = vmatprep.mubr.msk.bf16.mxu0 %vm1112_vm3, %v971_v23 }
  0xb8   : > { %1937 = vmatpush1.bf16.msra.mxu1 %v6418_v61 }
  0xb9   : > { %1938 = vmatprep.subr.bf16.mxu1 %v6419_v62 }
  0xbc   : > { %1939 = vmatpush1.bf16.msra.mxu1 %v6421_v63 }
  0xbd   : > { %1940 = vmatprep.subr.bf16.mxu1 %v6422_v0 }
  0xbe   : > { %1185 = vmatmul.mubr.bf16.gmra.mrb[8].mxu0 %v970_v32 }
  0xbf   : > { %5535 = vmatprep.mubr.msk.bf16.mxu0 %vm1112_vm3, %v973_v33  ;;  %vm853_vm3 = vcmask 647168  }
  0xc0   : > { %1941 = vmatpush1.bf16.msra.mxu1 %v6424_v2  ;;  %854 = vst.msk [vmem:[#allocation3] sm:$0x1] %vm853_vm3, %v6879_v38  ;;  %855 = vst.msk [vmem:[#allocation3 + $0x1f] sm:$0x1] %vm853_vm3, %v6879_v38  ;;  %vm866_vm3 = vcmp.lt.s32.totalorder %v844_v37, 192 }
  0xc1   : > { %1942 = vmatprep.subr.bf16.mxu1 %v6425_v3  ;;  %v1227_v22 = vpop.permute.xlu0 %1226  ;;  %868 = vst.msk [vmem:[#allocation6] ss:$8 sm:$0x3] %vm866_vm3, %v6879_v38  ;;  %871 = vst.msk [vmem:[#allocation6 + $0x23] ss:$8 sm:$0x3] %vm866_vm3, %v6879_v38 }
  0xc2   : > { %v1232_v25 = vpop.permute.xlu1 %1231 }
  0xc4   : > { %1943 = vmatpush1.bf16.msra.mxu1 %v6427_v7 }
  0xc5   : > { %1944 = vmatprep.subr.bf16.mxu1 %v6428_v8  ;;  %v1242_v54 = vpop.permute.xlu0 %1241 }
  0xc6   : > { %1195 = vmatmul.mubr.bf16.gmra.mrb[12].mxu0 %v972_v36  ;;  %v1237_v48 = vpop.permute.xlu1 %1236 }
  0xc8   : > { %1945 = vmatpush1.bf16.msra.mxu1 %v6430_v11 }
  0xc9   : > { %1946 = vmatprep.subr.bf16.mxu1 %v6431_v42 }
  0xcc   : > { %1947 = vmatpush1.bf16.msra.mxu1 %v6433_v43 }
  0xcd   : > { %1987 = vmatprep.subr.bf16.mxu1 %v6436_v59 }
 0x181   : > { %v1166_v12 = vpop.f32.mrb[0].mxu0 }
 0x182   : > { %v1167_v13 = vadd.f32 %v1166_v12, %v7321_v9  ;;  %v1168_v14 = vpop.f32.mrb[1].mxu0 }
 0x183   : > { %v1169_v15 = vadd.f32 %v1168_v14, %v7324_v10  ;;  %v1170_v16 = vpop.f32.mrb[2].mxu0 }
 0x184   : > { %v1203_v17 = vmax.f32 %v1167_v13, 0.0  ;;  %v1171_v18 = vadd.f32 %v1170_v16, %v7321_v9  ;;  %v1172_v19 = vpop.f32.mrb[3].mxu0 }
 0x185   : > { %v1204_v20 = vmax.f32 %v1169_v15, 0.0  ;;  %v1173_v21 = vadd.f32 %v1172_v19, %v7324_v10 }
 0x186   : > { %v1205_v23 = vmax.f32 %v1171_v18, 0.0  ;;  %v1259_v24 = vmul.f32 %v1227_v22, %v1203_v17 }
 0x187   : > { %v1206_v26 = vmax.f32 %v1173_v21, 0.0  ;;  %v1260_v27 = vmul.f32 %v1227_v22, %v1204_v20  ;;  %v1247_v20 = vpop.permute.xlu1 %1246 }
 0x188   : > { %v1261_v28 = vmul.f32 %v1232_v25, %v1205_v23  ;;  %v1287_v29 = vrot.slane %v1259_v24, 7 }
 0x189   : > { %v1262_v30 = vmul.f32 %v1232_v25, %v1206_v26  ;;  %v1288_v31 = vrot.slane %v1260_v27, 7  ;;  %v1176_v32 = vpop.f32.mrb[4].mxu0 }
 0x18a   : > { %v1289_v33 = vrot.slane %v1261_v28, 7  ;;  %1327 = vst [vmem:[#allocation2] sm:$0xfe] %v1287_v29  ;;  %v1177_v34 = vadd.f32 %v1176_v32, %v7321_v9  ;;  %v1178_v35 = vpop.f32.mrb[5].mxu0 }
 0x18b   : > { %v1291_v36 = vrot.slane %v1262_v30, 7  ;;  %1329 = vst.msk [vmem:[#allocation2 + $0x8] sm:$0xfe] %vm1328_vm5, %v1288_v31  ;;  %v1179_v39 = vadd.f32 %v1178_v35, %v7324_v10  ;;  %v1180_v40 = vpop.f32.mrb[6].mxu0  ;;  %vm2460_vm5 = vcmask 652288  }
 0x18c   : > { %v7342_v44 = vsel %vm1125_vm0, %v1287_v29, %v1289_v33  ;;  %v1207_v45 = vmax.f32 %v1177_v34, 0.0  ;;  %v1181_v46 = vadd.f32 %v1180_v40, %v7321_v9  ;;  %v1182_v47 = vpop.f32.mrb[7].mxu0  ;;  %v1252_v29 = vpop.permute.xlu0 %1251 }
 0x18d   : > { %v1292_v49 = vsel %vm1125_vm0, %v1288_v31, %v1291_v36  ;;  %v1208_v50 = vmax.f32 %v1179_v39, 0.0  ;;  %v1183_v51 = vadd.f32 %v1182_v47, %v7324_v10  ;;  %v1382_v0 = vrot.slane %v7342_v44, 1 }
 0x18e   : > { %1332 = vst.msk [vmem:[#allocation2 + $0x18] sm:$0xff] %vm1331_vm6, %v1292_v49  ;;  %v1263_v52 = vmul.f32 %v1237_v48, %v1207_v45  ;;  %v1209_v53 = vmax.f32 %v1181_v46, 0.0 }
 0x18f   : > { %v1264_v55 = vmul.f32 %v1237_v48, %v1208_v50  ;;  %v1210_v56 = vmax.f32 %v1183_v51, 0.0 }
 0x190   : > { %v1293_v57 = vrot.slane %v1263_v52, 7  ;;  %v1265_v58 = vmul.f32 %v1242_v54, %v1209_v53 }
 0x191   : > { %v1295_v60 = vrot.slane %v1264_v55, 7  ;;  %v1266_v61 = vmul.f32 %v1242_v54, %v1210_v56  ;;  %v1186_v62 = vpop.f32.mrb[8].mxu0  ;;  %v1358_v63 = vld [vmem:[#allocation2] sm:$0xfe]  ;;  %v1257_v54 = vpop.permute.xlu1 %1256 }
 0x192   : > { %v7353_v1 = vsel %vm1125_vm0, %v1289_v33, %v1293_v57  ;;  %v1297_v2 = vrot.slane %v1265_v58, 7  ;;  %v1187_v3 = vadd.f32 %v1186_v62, %v7321_v9  ;;  %v1188_v5 = vpop.f32.mrb[9].mxu0  ;;  %v1381_v7 = vrot.slane %v1358_v63, 1 }
 0x193   : > { %v1296_v8 = vsel %vm1125_vm0, %v1291_v36, %v1295_v60  ;;  %v1299_v11 = vrot.slane %v1266_v61, 7  ;;  %v1189_v12 = vadd.f32 %v1188_v5, %v7324_v10  ;;  %v1190_v13 = vpop.f32.mrb[10].mxu0  ;;  %v1387_v14 = vrot.slane %v7353_v1, 1 }
 0x194   : > { %1334 = vst.msk [vmem:[#allocation2 + $0x28] sm:$0xff] %vm1331_vm6, %v1296_v8  ;;  %v7361_v15 = vsel %vm1125_vm0, %v1293_v57, %v1297_v2  ;;  %v1211_v16 = vmax.f32 %v1187_v3, 0.0  ;;  %v1191_v17 = vadd.f32 %v1190_v13, %v7321_v9  ;;  %v1192_v18 = vpop.f32.mrb[11].mxu0  ;;  %v1383_v19 = vsel %vm1380_vm7, %v1381_v7, %v1382_v0 }
 0x195   : > { %v1300_v21 = vsel %vm1125_vm0, %v1295_v60, %v1299_v11  ;;  %v1212_v22 = vmax.f32 %v1189_v12, 0.0  ;;  %v1193_v23 = vadd.f32 %v1192_v18, %v7324_v10  ;;  %v1388_v24 = vsel %vm1380_vm7, %v1382_v0, %v1387_v14  ;;  %v1359_v18 = vld [vmem:[#allocation2 + $0x8] sm:$0xfe] }
 0x196   : > { %1336 = vst.msk [vmem:[#allocation2 + $0x38] sm:$0xff] %vm1331_vm6, %v1300_v21  ;;  %v1267_v25 = vmul.f32 %v1247_v20, %v1211_v16  ;;  %v1213_v26 = vmax.f32 %v1191_v17, 0.0  ;;  %v6139_v27 = vpack.i.bf16 %v1388_v24, %v1383_v19  ;;  %v1391_v28 = vrot.slane %v7361_v15, 1 }
 0x197   : > { %v1268_v30 = vmul.f32 %v1247_v20, %v1212_v22  ;;  %v1214_v31 = vmax.f32 %v1193_v23, 0.0  ;;  %v1462_v62 = vrot.slane %v7342_v44, 2  ;;  %v1467_v63 = vrot.slane %v7353_v1, 2  ;;  %v1362_v22 = vld [vmem:[#allocation2] sm:$0xfc] }
 0x198   : > { %v1301_v32 = vrot.slane %v1267_v25, 7  ;;  %v1269_v33 = vmul.f32 %v1252_v29, %v1213_v26  ;;  %6140 = vrot.lane.b32.xlu0 %v6139_v27, %s6880_s9  ;;  %v1392_v34 = vsel %vm1380_vm7, %v1387_v14, %v1391_v28  ;;  %v1471_v0 = vrot.slane %v7361_v15, 2  ;;  %v7401_v14 = vld [vmem:[#allocation2 + $0x18] sm:$0xff]  ;;  %v1363_v23 = vld [vmem:[#allocation2 + $0x8] sm:$0xfc] }
 0x199   : > { %v1303_v35 = vrot.slane %v1268_v30, 7  ;;  %v1270_v36 = vmul.f32 %v1252_v29, %v1214_v31  ;;  %v1196_v39 = vpop.f32.mrb[12].mxu0  ;;  %v1468_v7 = vsel %vm1460_vm8, %v1462_v62, %v1467_v63  ;;  %v1555_v16 = vpack.c.bf16 %v7361_v15, %v7353_v1  ;;  %v6451_v1 = vld [vmem:[%s8916_s1 + $0x154] ss:$8 sps:$4 sm:$0xff]  }
 0x19a   : > { %v7373_v40 = vsel %vm1125_vm0, %v1297_v2, %v1301_v32  ;;  %v1305_v42 = vrot.slane %v1269_v33, 7  ;;  %v1197_v43 = vadd.f32 %v1196_v39, %v7321_v9  ;;  %v1198_v45 = vpop.f32.mrb[13].mxu0  ;;  %v7398_v12 = vsel %vm1460_vm8, %v1467_v63, %v1471_v0 }
 0x19b   : > { %v1304_v46 = vsel %vm1125_vm0, %v1299_v11, %v1303_v35  ;;  %v1307_v47 = vrot.slane %v1270_v36, 7  ;;  %v1199_v48 = vadd.f32 %v1198_v45, %v7324_v10  ;;  %v1200_v49 = vpop.f32.mrb[14].mxu0  ;;  %v1395_v50 = vrot.slane %v7373_v40, 1  ;;  %v7414_v27 = vld [vmem:[#allocation2 + $0x28] sm:$0xff] }
 0x19c   : > { %1338 = vst.msk [vmem:[#allocation2 + $0x48] sm:$0xff] %vm1331_vm6, %v1304_v46  ;;  %v7381_v51 = vsel %vm1125_vm0, %v1301_v32, %v1305_v42  ;;  %v1215_v52 = vmax.f32 %v1197_v43, 0.0  ;;  %v1201_v53 = vpop.f32.mrb[15].mxu0  ;;  %v1475_v3 = vrot.slane %v7373_v40, 2  ;;  %v1385_v20 = vrot.slane %v7401_v14, 1 }
 0x19d   : > { %v1308_v55 = vsel %vm1125_vm0, %v1303_v35, %v1307_v47  ;;  %v1216_v9 = vmax.f32 %v1199_v48, 0.0  ;;  %v1396_v56 = vsel %vm1380_vm7, %v1391_v28, %v1395_v50  ;;  %v1399_v57 = vrot.slane %v7381_v51, 1  ;;  %v7411_v21 = vld [vmem:[#allocation2 + $0x38] sm:$0xff] }
 0x19e   : > { %1340 = vst.msk [vmem:[#allocation2 + $0x58] sm:$0xff] %vm1331_vm6, %v1308_v55  ;;  %v1271_v10 = vmul.f32 %v1257_v54, %v1215_v52  ;;  %v6144_v58 = vpack.i.bf16 %v1396_v56, %v1392_v34  ;;  %v1476_v11 = vsel %vm1460_vm8, %v1471_v0, %v1475_v3  ;;  %v1479_v13 = vrot.slane %v7381_v51, 2 }
 0x19f   : > { %v1272_v59 = vmul.f32 %v1257_v54, %v1216_v9  ;;  %v1400_v60 = vsel %vm1380_vm7, %v1395_v50, %v1399_v57  ;;  %v1559_v19 = vpack.c.bf16 %v7381_v51, %v7373_v40  ;;  %v1384_v25 = vrot.slane %v1359_v18, 1 }
 0x1a0   : > { %v1309_v61 = vrot.slane %v1271_v10, 7  ;;  %6145 = vrot.lane.b32.xlu1 %v6144_v58, %s6880_s9  ;;  %v1480_v17 = vsel %vm1460_vm8, %v1475_v3, %v1479_v13  ;;  %v1465_v26 = vrot.slane %v7401_v14, 2  ;;  %v1393_v29 = vrot.slane %v7411_v21, 1 }
 0x1a1   : > { %v1311_v2 = vrot.slane %v1272_v59, 7  ;;  %v1386_v31 = vsel %vm1380_vm7, %v1384_v25, %v1385_v20  ;;  %v1461_v32 = vrot.slane %v1362_v22, 2  ;;  %v1464_v33 = vrot.slane %v1363_v23, 2 }
 0x1a2   : > { %v1310_v5 = vsel %vm1125_vm0, %v1305_v42, %v1309_v61  ;;  %v1389_v36 = vrot.slane %v7414_v27, 1  ;;  %v1473_v56 = vrot.slane %v7411_v21, 2 }
 0x1a3   : > { %1341 = vst [vmem:[#allocation2 + $0x60] sm:$0x7f] %v1310_v5  ;;  %v1312_v8 = vsel %vm1125_vm0, %v1307_v47, %v1311_v2  ;;  %v7422_v39 = vld [vmem:[#allocation2 + $0x48] sm:$0xff]  ;;  %v1466_v43 = vsel %vm1460_vm8, %v1464_v33, %v1465_v26  ;;  %v1469_v47 = vrot.slane %v7414_v27, 2  ;;  %v1463_v48 = vsel %vm1460_vm8, %v1461_v32, %v1462_v62 }
 0x1a4   : > { %1343 = vst.msk [vmem:[#allocation2 + $0x68] sm:$0x7f] %vm1342_vm9, %v1312_v8  ;;  %v1394_v46 = vsel %vm1380_vm7, %v1389_v36, %v1393_v29  ;;  %v1397_v49 = vrot.slane %v7422_v39, 1  ;;  %v6164_v50 = vpack.i.bf16 %v1466_v43, %v1463_v48  ;;  %v1390_v52 = vsel %vm1380_vm7, %v1385_v20, %v1389_v36  ;;  %v6434_v33 = vld [vmem:[%s8916_s1 + $0x100] ss:$8 sps:$4 sm:$0xff]  }
 0x1a5   : > { %v7417_v30 = vld [vmem:[#allocation2 + $0x58] sm:$0xff]  ;;  %v6159_v53 = vpack.i.bf16 %v1394_v46, %v1390_v52  ;;  %v1477_v55 = vrot.slane %v7422_v39, 2  ;;  %v1470_v9 = vsel %vm1460_vm8, %v1465_v26, %v1469_v47  ;;  %v1474_v61 = vsel %vm1460_vm8, %v1469_v47, %v1473_v56  ;;  %v6440_v48 = vld [vmem:[%s8916_s1 + $0x120] ss:$8 sps:$4 sm:$0xff]  }
 0x1a6   : > { %v1401_v45 = vrot.slane %v7417_v30, 1  ;;  %v6169_v58 = vpack.i.bf16 %v1470_v9, %v1468_v7  ;;  %v6179_v3 = vpack.i.bf16 %v1474_v61, %v7398_v12  ;;  %v6454_v9 = vld [vmem:[%s8916_s1 + $0x164] ss:$8 sps:$4 sm:$0xff]   ;;  %vm2710_vm9 = vcmask 916480  }
 0x1a7   : > { %v1478_v59 = vsel %vm1460_vm8, %v1473_v56, %v1477_v55 }
 0x1a8   : > { %v1402_v54 = vsel %vm1380_vm7, %v1397_v49, %v1401_v45  ;;  %v6184_v2 = vpack.i.bf16 %v1478_v59, %v1476_v11 }
 0x1aa   : > { %v1360_v24 = vld [vmem:[#allocation2 + $0x60] sm:$0x7f] }
 0x1ab   : > { %v1403_v28 = vrot.slane %v1360_v24, 1  ;;  %v1361_v62 = vld [vmem:[#allocation2 + $0x68] sm:$0x7f]  ;;  %v1364_v63 = vld [vmem:[#allocation2 + $0x60] sm:$0xff] }
 0x1ac   : > { %v1365_v0 = vld [vmem:[#allocation2 + $0x68] sm:$0xff]  ;;  %v1405_v7 = vrot.slane %v1361_v62, 1  ;;  %v1483_v8 = vrot.slane %v1364_v63, 2  ;;  %v1356_v40 = vld [vmem:[#allocation2 + $0x60] sm:$0x3f] }
 0x1ad   : > { %v6154_v34 = vpack.i.bf16 %v1386_v31, %v1403_v28  ;;  %v1404_v35 = vsel %vm1380_vm7, %v1399_v57, %v1403_v28  ;;  %v1398_v57 = vsel %vm1380_vm7, %v1393_v29, %v1397_v49  ;;  %v1485_v18 = vrot.slane %v1365_v0, 2  ;;  %v1345_v28 = vld [vmem:[#allocation2 + $0x8] sm:$0xff]  ;;  %v6445_v49 = vld [vmem:[%s8916_s1 + $0x134] ss:$8 sps:$4 sm:$0xff]   ;;  %v6455_v0 = vld [vmem:[%s8916_s1 + $0x170] ss:$8 sps:$4 sm:$0xff]  }
 0x1ae   : > { %v6149_v42 = vpack.i.bf16 %v1404_v35, %v1400_v60  ;;  %v6174_v10 = vpack.i.bf16 %v1402_v54, %v1398_v57  ;;  %v1481_v60 = vrot.slane %v7417_v30, 2  ;;  %v1406_v22 = vsel %vm1380_vm7, %v1401_v45, %v1405_v7  ;;  %v6439_v35 = vld [vmem:[%s8916_s1 + $0x114] ss:$8 sps:$4 sm:$0xff]   ;;  %v1357_v56 = vld [vmem:[#allocation2 + $0x68] sm:$0x3f] }
 0x1af   : > { %6155 = vrot.lane.b32.xlu1 %v6154_v34, %s6880_s9  ;;  %v1484_v11 = vsel %vm1460_vm8, %v1479_v13, %v1483_v8  ;;  %v6199_v24 = vpack.i.bf16 %v1485_v18, %v1483_v8  ;;  %v1344_v13 = vld [vmem:[#allocation2] sm:$0xff] }
 0x1b0   : > { %6150 = vrot.lane.b32.xlu0 %v6149_v42, %s6880_s9  ;;  %v1482_v5 = vsel %vm1460_vm8, %v1477_v55, %v1481_v60  ;;  %v1486_v12 = vsel %vm1460_vm8, %v1481_v60, %v1485_v18  ;;  %v1551_v34 = vpack.c.bf16 %v7342_v44, %v1344_v13  ;;  %v6442_v44 = vld [vmem:[%s8916_s1 + $0x124] ss:$8 sps:$4 sm:$0xff]   ;;  %v6452_v62 = vld [vmem:[%s8916_s1 + $0x160] ss:$8 sps:$4 sm:$0xff]  }
 0x1b1   : > { %v6189_v20 = vpack.i.bf16 %v1482_v5, %v1480_v17  ;;  %v6194_v23 = vpack.i.bf16 %v1486_v12, %v1484_v11  ;;  %v6460_v8 = vld [vmem:[%s8916_s1 + $0x184] ss:$8 sps:$4 sm:$0xff]   ;;  %v1563_v11 = vpack.c.bf16 %v1356_v40, %v1356_v40  ;;  %v6463_v12 = vld [vmem:[%s8916_s1 + $0x194] ss:$8 sps:$4 sm:$0xff]  }
 0x1b3   : > { %6165 = vrot.lane.b32.xlu1 %v6164_v50, %s6881_s30  ;;  %v6446_v50 = vld [vmem:[%s8916_s1 + $0x140] ss:$8 sps:$4 sm:$0xff]  }
 0x1b4   : > { %6160 = vrot.lane.b32.xlu0 %v6159_v53, %s6880_s9  ;;  %v6449_v53 = vld [vmem:[%s8916_s1 + $0x150] ss:$8 sps:$4 sm:$0xff]  }
 0x1b7   : > { %6175 = vrot.lane.b32.xlu1 %v6174_v10, %s6880_s9 }
 0x1b8   : > { %6170 = vrot.lane.b32.xlu0 %v6169_v58, %s6881_s30 }
 0x1bb   : > { %6185 = vrot.lane.b32.xlu1 %v6184_v2, %s6881_s30 }
 0x1bc   : > { %6180 = vrot.lane.b32.xlu0 %v6179_v3, %s6881_s30 }
 0x1bf   : > { %6190 = vrot.lane.b32.xlu1 %v6189_v20, %s6881_s30  ;;  %v6458_v20 = vld [vmem:[%s8916_s1 + $0x180] ss:$8 sps:$4 sm:$0xff]  }
 0x1c0   : > { %1429 = vrot.lane.b32.xlu0 %v1406_v22, %s6880_s9 }
 0x1c3   : > { %1433 = vrot.lane.b32.xlu1 %v1405_v7, %s6880_s9  ;;  %s8883_s9 = smov 64  }
 0x1c4   : > { %6195 = vrot.lane.b32.xlu0 %v6194_v23, %s6881_s30 }
 0x1c8   : > { %6200 = vrot.lane.b32.xlu0 %v6199_v24, %s6881_s30 }
 0x20a   : > { %v7459_v17 = vpop.permute.xlu0 %6140 }
 0x20b   : > { %v6143_v25 = vunpack.i.h.bf16 %v7459_v17  ;;  %v6142_v26 = vunpack.i.l.bf16 %v7459_v17 }
 0x20d   : > { %v1537_v29 = vsel %vm1331_vm6, %v1345_v28, %v6142_v26  ;;  %v1538_v31 = vsel %vm1331_vm6, %v7401_v14, %v6143_v25  ;;  %v6437_v14 = vld [vmem:[%s8916_s1 + $0x110] ss:$8 sps:$4 sm:$0xff]  }
 0x20e   : > { %v1552_v32 = vpack.c.bf16 %v1538_v31, %v1537_v29  ;;  %v6461_v28 = vld [vmem:[%s8916_s1 + $0x190] ss:$8 sps:$4 sm:$0xff]   ;;  %v6466_v29 = vld [vmem:[%s8916_s1 + $0x1a4] ss:$8 sps:$4 sm:$0xff]  }
 0x210   : > { %1948 = vmatprep.mubr.bf16.mxu1 %v1552_v32 }
 0x211   : > { %1949 = vmatmul.mubr.bf16.vlgmr.msra.gmra.mrb[0].mxu1 %v1551_v34 }
 0x212   : > { %1988 = vmatpush1.bf16.msra.mxu1 %v6434_v33  ;;  %v7477_v36 = vpop.permute.xlu1 %6145 }
 0x213   : > { %v6148_v42 = vunpack.i.h.bf16 %v7477_v36  ;;  %v6147_v43 = vunpack.i.l.bf16 %v7477_v36  ;;  %1989 = vmatprep.subr.bf16.mxu1 %v6439_v35 }
 0x215   : > { %v1539_v45 = vsel %vm1331_vm6, %v7414_v27, %v6147_v43  ;;  %v1540_v46 = vsel %vm1331_vm6, %v7411_v21, %v6148_v42  ;;  %v6443_v21 = vld [vmem:[%s8916_s1 + $0x130] ss:$8 sps:$4 sm:$0xff]   ;;  %v6448_v27 = vld [vmem:[%s8916_s1 + $0x144] ss:$8 sps:$4 sm:$0xff]  }
 0x216   : > { %1990 = vmatpush1.bf16.msra.mxu1 %v6437_v14  ;;  %v1556_v47 = vpack.c.bf16 %v1540_v46, %v1539_v45 }
 0x217   : > { %1991 = vmatprep.subr.bf16.mxu1 %v6442_v44  ;;  %v6464_v44 = vld [vmem:[%s8916_s1 + $0x1a0] ss:$8 sps:$4 sm:$0xff]  }
 0x218   : > { %1958 = vmatprep.mubr.bf16.mxu1 %v1556_v47 }
 0x219   : > { %1959 = vmatmul.mubr.bf16.gmra.mrb[4].mxu1 %v1555_v16 }
 0x21a   : > { %1992 = vmatpush1.bf16.msra.mxu1 %v6440_v48 }
 0x21b   : > { %1993 = vmatprep.subr.bf16.mxu1 %v6445_v49 }
 0x21e   : > { %1994 = vmatpush1.bf16.msra.mxu1 %v6443_v21 }
 0x21f   : > { %1995 = vmatprep.subr.bf16.mxu1 %v6448_v27 }
 0x221   : > { %v7516_v15 = vpop.permute.xlu1 %6155 }
 0x222   : > { %v6157_v16 = vunpack.i.l.bf16 %v7516_v15  ;;  %v7519_v52 = vpop.permute.xlu0 %6150  ;;  %1996 = vmatpush1.bf16.msra.mxu1 %v6446_v50  ;;  %v6158_v31 = vunpack.i.h.bf16 %v7516_v15  ;;  %v6469_v15 = vld [vmem:[%s8855_s16 + $0x10] sm:$0xff]  }
 0x223   : > { %v6153_v54 = vunpack.i.h.bf16 %v7519_v52  ;;  %v6152_v55 = vunpack.i.l.bf16 %v7519_v52  ;;  %1997 = vmatprep.subr.bf16.mxu1 %v6451_v1  ;;  %v6467_v52 = vld [vmem:[%s8855_s16] sm:$0xff]  }
 0x224   : > { %v1543_v58 = vsel %vm1331_vm6, %v1357_v56, %v6157_v16  ;;  %v1435_v47 = vsel %vm1331_vm6, %v6142_v26, %v6158_v31  ;;  %2312 = vmatpush1.bf16.msra.mxu0 %v6467_v52 }
 0x225   : > { %v1541_v57 = vsel %vm1331_vm6, %v7422_v39, %v6152_v55  ;;  %v1542_v10 = vsel %vm1331_vm6, %v7417_v30, %v6153_v54  ;;  %v6166_v59 = vpop.permute.xlu1 %6165  ;;  %v6457_v39 = vld [vmem:[%s8916_s1 + $0x174] ss:$8 sps:$4 sm:$0xff]   ;;  %v1564_v30 = vpack.c.bf16 %v1543_v58, %v1543_v58  ;;  %2313 = vmatprep.subr.bf16.mxu0 %v6878_v41  ;;  %s8927_s1 = sld [smem:[#allocation27_spill]] }
 0x226   : > { %v7540_v60 = vpop.permute.xlu0 %6160  ;;  %v1560_v61 = vpack.c.bf16 %v1542_v10, %v1541_v57  ;;  %1998 = vmatpush1.bf16.msra.mxu1 %v6449_v53  ;;  %v6168_v2 = vunpack.i.h.bf16 %v6166_v59  ;;  %v6167_v3 = vunpack.i.l.bf16 %v6166_v59 }
 0x227   : > { %1999 = vmatprep.subr.bf16.mxu1 %v6454_v9  ;;  %v6162_v13 = vunpack.i.l.bf16 %v7540_v60  ;;  %v6163_v50 = vunpack.i.h.bf16 %v7540_v60 }
 0x228   : > { %1968 = vmatprep.mubr.bf16.mxu1 %v1560_v61  ;;  %v1516_v22 = vsel %vm1515_vm10, %v6167_v3, %v6168_v2  ;;  %v1544_v21 = vsel %vm1515_vm10, %v1435_v47, %v6167_v3 }
 0x229   : > { %1969 = vmatmul.mubr.bf16.gmra.mrb[8].mxu1 %v1559_v19  ;;  %v7557_v18 = vpop.permute.xlu1 %6175  ;;  %v1436_v45 = vsel %vm1331_vm6, %v6143_v25, %v6162_v13  ;;  %v1437_v17 = vsel %vm1331_vm6, %v6147_v43, %v6163_v50 }
 0x22a   : > { %v6171_v63 = vpop.permute.xlu0 %6170  ;;  %1978 = vmatprep.mubr.bf16.mxu1 %v1564_v30  ;;  %2000 = vmatpush1.bf16.msra.mxu1 %v6452_v62  ;;  %v6177_v1 = vunpack.i.l.bf16 %v7557_v18 }
 0x22b   : > { %v6173_v5 = vunpack.i.h.bf16 %v6171_v63  ;;  %v6172_v7 = vunpack.i.l.bf16 %v6171_v63  ;;  %2001 = vmatprep.subr.bf16.mxu1 %v6457_v39 }
 0x22c   : > { %v1438_v26 = vsel %vm1331_vm6, %v6148_v42, %v6177_v1 }
 0x22d   : > { %v1517_v51 = vsel %vm1515_vm10, %v6172_v7, %v6173_v5  ;;  %v6186_v24 = vpop.permute.xlu1 %6185  ;;  %v1545_v46 = vsel %vm1515_vm10, %v1436_v45, %v6172_v7  ;;  %v6473_v45 = vld [vmem:[%s8855_s16 + $0x30] sm:$0xff]  }
 0x22e   : > { %v6181_v19 = vpop.permute.xlu0 %6180  ;;  %2002 = vmatpush1.bf16.msra.mxu1 %v6455_v0  ;;  %v1554_v23 = vpack.c.bf16 %v1517_v51, %v1516_v22  ;;  %v6188_v33 = vunpack.i.h.bf16 %v6186_v24  ;;  %v6187_v34 = vunpack.i.l.bf16 %v6186_v24  ;;  %v1553_v25 = vpack.c.bf16 %v1545_v46, %v1544_v21  ;;  %v6472_v22 = vld [vmem:[%s8855_s16 + $0x28] sm:$0xff]  }
 0x22f   : > { %2003 = vmatprep.subr.bf16.mxu1 %v6460_v8  ;;  %v6183_v35 = vunpack.i.h.bf16 %v6181_v19  ;;  %v6182_v14 = vunpack.i.l.bf16 %v6181_v19  ;;  %v6178_v0 = vunpack.i.h.bf16 %v7557_v18 }
 0x230   : > { %v1519_v48 = vsel %vm1515_vm10, %v6187_v34, %v6188_v33  ;;  %v1547_v60 = vsel %vm1515_vm10, %v1438_v26, %v6187_v34 }
 0x231   : > { %1979 = vmatmul.mubr.bf16.gmra.mrb[12].mxu1 %v1563_v11  ;;  %v1518_v49 = vsel %vm1515_vm10, %v6182_v14, %v6183_v35  ;;  %v6191_v9 = vpop.permute.xlu1 %6190  ;;  %v1546_v59 = vsel %vm1515_vm10, %v1437_v17, %v6182_v14  ;;  %v1439_v3 = vsel %vm1331_vm6, %v6152_v55, %v6178_v0  ;;  %v6468_v55 = vld [vmem:[%s8855_s16 + $0x8] sm:$0xff]   ;;  %v1621_v11 = vld [vmem:[%s8918_s12] sm:$0x3]  ;;  %s8922_s12 = sld [smem:[#allocation25_spill]] }
 0x232   : > { %5590 = vmatprep.mubr.msk.bf16.mxu1 %vm1903_vm11, %v1554_v23  ;;  %2004 = vmatpush1.bf16.msra.mxu1 %v6458_v20  ;;  %v1430_v32 = vpop.permute.xlu0 %1429  ;;  %v1558_v53 = vpack.c.bf16 %v1519_v48, %v1518_v49  ;;  %v6193_v10 = vunpack.i.h.bf16 %v6191_v9  ;;  %v6192_v58 = vunpack.i.l.bf16 %v6191_v9  ;;  %v1557_v30 = vpack.c.bf16 %v1547_v60, %v1546_v59  ;;  %v6471_v20 = vld [vmem:[%s8855_s16 + $0x20] sm:$0xff]  }
 0x233   : > { %2005 = vmatprep.subr.bf16.mxu1 %v6463_v12  ;;  %v1440_v36 = vsel %vm1331_vm6, %v6153_v54, %v1430_v32  ;;  %2314 = vmatpush1.bf16.msra.mxu0 %v6468_v55  ;;  %v7646_v12 = vrot.slane %v1621_v11, %v7307_v4  ;;  %v7649_v23 = vrot.slane %v1621_v11, %v7312_v6 }
 0x234   : > { %v1520_v39 = vsel %vm1515_vm10, %v6192_v58, %v6193_v10  ;;  %v1548_v7 = vsel %vm1515_vm10, %v1439_v3, %v6192_v58  ;;  %2315 = vmatprep.subr.bf16.mxu0 %v6878_v41 }
 0x235   : > { %v1434_v18 = vpop.permute.xlu1 %1433 }
 0x236   : > { %2006 = vmatpush1.bf16.msra.mxu1 %v6461_v28  ;;  %v6196_v27 = vpop.permute.xlu0 %6195  ;;  %v1441_v54 = vsel %vm1331_vm6, %v6157_v16, %v1434_v18  ;;  %v6470_v16 = vld [vmem:[%s8855_s16 + $0x18] sm:$0xff]  }
 0x237   : > { %2007 = vmatprep.subr.bf16.mxu1 %v6466_v29  ;;  %v6198_v56 = vunpack.i.h.bf16 %v6196_v27  ;;  %v6197_v57 = vunpack.i.l.bf16 %v6196_v27  ;;  %2316 = vmatpush1.bf16.msra.mxu0 %v6469_v15 }
 0x238   : > { %2317 = vmatprep.subr.bf16.mxu0 %v6878_v41 }
 0x239   : > { %v1521_v61 = vsel %vm1515_vm10, %v6197_v57, %v6198_v56  ;;  %v1549_v42 = vsel %vm1515_vm10, %v1440_v36, %v6197_v57 }
 0x23a   : > { %2008 = vmatpush1.bf16.msra.mxu1 %v6464_v44  ;;  %v6201_v62 = vpop.permute.xlu0 %6200  ;;  %v1562_v63 = vpack.c.bf16 %v1521_v61, %v1520_v39  ;;  %v1561_v8 = vpack.c.bf16 %v1549_v42, %v1548_v7 }
 0x23b   : > { %v6203_v43 = vunpack.i.h.bf16 %v6201_v62  ;;  %v6202_v2 = vunpack.i.l.bf16 %v6201_v62  ;;  %2318 = vmatpush1.bf16.msra.mxu0 %v6470_v16 }
 0x23c   : > { %2319 = vmatprep.subr.bf16.mxu0 %v6878_v41 }
 0x23d   : > { %2020 = vmatmul.mubr.bf16.vlgmr.msra.gmra.mrb[0].mxu1 %v1553_v25  ;;  %v1522_v5 = vsel %vm1515_vm10, %v6202_v2, %v6203_v43  ;;  %v1550_v51 = vsel %vm1515_vm10, %v1441_v54, %v6202_v2 }
 0x23e   : > { %5591 = vmatprep.mubr.msk.bf16.mxu1 %vm1903_vm11, %v1558_v53  ;;  %v1566_v40 = vpack.c.bf16 %v1522_v5, %v1522_v5  ;;  %v1565_v19 = vpack.c.bf16 %v1550_v51, %v1550_v51 }
 0x23f   : > { %2320 = vmatpush1.bf16.msra.mxu0 %v6471_v20 }
 0x240   : > { %2321 = vmatprep.subr.bf16.mxu0 %v6878_v41 }
 0x243   : > { %2322 = vmatpush1.bf16.msra.mxu0 %v6472_v22 }
 0x244   : > { %2323 = vmatprep.subr.bf16.mxu0 %v6878_v41 }
 0x245   : > { %2030 = vmatmul.mubr.bf16.gmra.mrb[4].mxu1 %v1557_v30  ;;  %v6474_v30 = vld [vmem:[%s8855_s16 + $0x38] sm:$0xff]  }
 0x246   : > { %5592 = vmatprep.mubr.msk.bf16.mxu1 %vm1903_vm11, %v1562_v63  ;;  %v6475_v63 = vld [vmem:[%s8855_s16 + $0x40] ss:$0 sps:$4 sm:$0xff]  }
 0x247   : > { %2324 = vmatpush1.bf16.msra.mxu0 %v6473_v45 }
 0x248   : > { %2325 = vmatprep.subr.bf16.mxu0 %v6878_v41 }
 0x24b   : > { %2326 = vmatpush1.bf16.msra.mxu0 %v6474_v30 }
 0x24c   : > { %2327 = vmatprep.subr.bf16.mxu0 %v6878_v41 }
 0x24d   : > { %2040 = vmatmul.mubr.bf16.gmra.mrb[8].mxu1 %v1561_v8  ;;  %v2309_v8 = vsel %vm2307_vm12, %v6475_v63, 0  ;;  %vm2841_vm12 = vcmask 261121  }
 0x24e   : > { %5593 = vmatprep.mubr.msk.bf16.mxu1 %vm1903_vm11, %v1566_v40  ;;  %vm856_vm11 = vcmp.lt.s32.totalorder %v844_v37, 160 }
 0x24f   : > { %2328 = vmatpush1.bf16.msra.mxu0 %v2309_v8  ;;  %861 = vst.msk [vmem:[#allocation4 + $0x37] ss:$8 sm:$0x3] %vm856_vm11, %v6879_v38  ;;  %858 = vst.msk [vmem:[#allocation4] ss:$8 sm:$0x3] %vm856_vm11, %v6879_v38 }
 0x255   : > { %2050 = vmatmul.mubr.bf16.gmra.mrb[12].mxu1 %v1565_v19 }
 0x310   : > { %v2021_v24 = vpop.f32.mrb[0].mxu1 }
 0x311   : > { %v5972_v28 = vadd.f32 %v2021_v24, %v7646_v12  ;;  %v2023_v13 = vpop.f32.mrb[1].mxu1 }
 0x312   : > { %v5973_v29 = vadd.f32 %v2023_v13, %v7649_v23  ;;  %v2025_v31 = vpop.f32.mrb[2].mxu1 }
 0x313   : > { %v2058_v32 = vmax.f32 %v5972_v28, 0.0  ;;  %v5974_v33 = vadd.f32 %v2025_v31, %v7646_v12  ;;  %v2027_v34 = vpop.f32.mrb[3].mxu1 }
 0x314   : > { %v2059_v35 = vmax.f32 %v5973_v29, 0.0  ;;  %v5975_v14 = vadd.f32 %v2027_v34, %v7649_v23 }
 0x315   : > { %v2060_v44 = vmax.f32 %v5974_v33, 0.0  ;;  %v2086_v47 = vrot.slane %v2058_v32, 1 }
 0x316   : > { %v2061_v46 = vmax.f32 %v5975_v14, 0.0  ;;  %v2089_v49 = vrot.slane %v2059_v35, 1 }
 0x317   : > { %v2087_v48 = vrot.slane %v2060_v44, 1 }
 0x318   : > { %v2090_v21 = vrot.slane %v2061_v46, 1  ;;  %v2031_v27 = vpop.f32.mrb[4].mxu1 }
 0x319   : > { %v5976_v50 = vadd.f32 %v2031_v27, %v7646_v12  ;;  %v2033_v1 = vpop.f32.mrb[5].mxu1  ;;  %v2088_v25 = vsel %vm1380_vm7, %v2086_v47, %v2087_v48 }
 0x31a   : > { %v5977_v53 = vadd.f32 %v2033_v1, %v7649_v23  ;;  %v2035_v9 = vpop.f32.mrb[6].mxu1  ;;  %v2091_v56 = vsel %vm1380_vm7, %v2089_v49, %v2090_v21  ;;  %v7663_v57 = vmax.f32 %v2058_v32, %v2088_v25 }
 0x31b   : > { %v2062_v17 = vmax.f32 %v5976_v50, 0.0  ;;  %v5978_v26 = vadd.f32 %v2035_v9, %v7646_v12  ;;  %v2037_v10 = vpop.f32.mrb[7].mxu1  ;;  %v7666_v58 = vmax.f32 %v2059_v35, %v2091_v56 }
 0x31c   : > { %v2063_v59 = vmax.f32 %v5977_v53, 0.0  ;;  %v5979_v60 = vadd.f32 %v2037_v10, %v7649_v23 }
 0x31d   : > { %v2092_v61 = vrot.slane %v2062_v17, 1  ;;  %v2064_v62 = vmax.f32 %v5978_v26, 0.0  ;;  %v6204_v39 = vpack.i.bf16 %v7666_v58, %v7663_v57 }
 0x31e   : > { %v2094_v0 = vrot.slane %v2063_v59, 1  ;;  %v2065_v43 = vmax.f32 %v5979_v60, 0.0 }
 0x31f   : > { %v2096_v2 = vrot.slane %v2064_v62, 1  ;;  %6205 = vrot.lane.b32.xlu1 %v6204_v39, %s6882_s10  ;;  %v2093_v36 = vsel %vm1380_vm7, %v2087_v48, %v2092_v61 }
 0x320   : > { %v2098_v42 = vrot.slane %v2065_v43, 1  ;;  %v2041_v3 = vpop.f32.mrb[8].mxu1  ;;  %v2095_v5 = vsel %vm1380_vm7, %v2090_v21, %v2094_v0  ;;  %v7680_v7 = vmax.f32 %v2060_v44, %v2093_v36 }
 0x321   : > { %v5980_v18 = vadd.f32 %v2041_v3, %v7646_v12  ;;  %v2043_v40 = vpop.f32.mrb[9].mxu1  ;;  %v7684_v54 = vmax.f32 %v2061_v46, %v2095_v5  ;;  %v2097_v51 = vsel %vm1380_vm7, %v2092_v61, %v2096_v2 }
 0x322   : > { %v5981_v19 = vadd.f32 %v2043_v40, %v7649_v23  ;;  %v2045_v52 = vpop.f32.mrb[10].mxu1  ;;  %v2099_v55 = vsel %vm1380_vm7, %v2094_v0, %v2098_v42  ;;  %v7689_v15 = vmax.f32 %v2062_v17, %v2097_v51 }
 0x323   : > { %v2066_v16 = vmax.f32 %v5980_v18, 0.0  ;;  %v5982_v20 = vadd.f32 %v2045_v52, %v7646_v12  ;;  %v2047_v22 = vpop.f32.mrb[11].mxu1  ;;  %v6209_v11 = vpack.i.bf16 %v7684_v54, %v7680_v7  ;;  %v7694_v24 = vmax.f32 %v2063_v59, %v2099_v55 }
 0x324   : > { %v2067_v28 = vmax.f32 %v5981_v19, 0.0  ;;  %v5983_v13 = vadd.f32 %v2047_v22, %v7649_v23 }
 0x325   : > { %v2100_v29 = vrot.slane %v2066_v16, 1  ;;  %v2068_v31 = vmax.f32 %v5982_v20, 0.0  ;;  %6210 = vrot.lane.b32.xlu0 %v6209_v11, %s6882_s10  ;;  %v6214_v32 = vpack.i.bf16 %v7694_v24, %v7689_v15 }
 0x326   : > { %v2102_v33 = vrot.slane %v2067_v28, 1  ;;  %v2069_v34 = vmax.f32 %v5983_v13, 0.0 }
 0x327   : > { %v2104_v35 = vrot.slane %v2068_v31, 1  ;;  %6215 = vrot.lane.b32.xlu1 %v6214_v32, %s6882_s10  ;;  %v2101_v14 = vsel %vm1380_vm7, %v2096_v2, %v2100_v29 }
 0x328   : > { %v2106_v44 = vrot.slane %v2069_v34, 1  ;;  %v2051_v45 = vpop.f32.mrb[12].mxu1  ;;  %v2103_v46 = vsel %vm1380_vm7, %v2098_v42, %v2102_v33  ;;  %v7703_v47 = vmax.f32 %v2064_v62, %v2101_v14 }
 0x329   : > { %v5984_v48 = vadd.f32 %v2051_v45, %v7646_v12  ;;  %v2053_v49 = vpop.f32.mrb[13].mxu1  ;;  %v2133_v21 = vmax.f32 %v2065_v43, %v2103_v46  ;;  %v2105_v27 = vsel %vm1380_vm7, %v2100_v29, %v2104_v35 }
 0x32a   : > { %v5985_v50 = vadd.f32 %v2053_v49, %v7649_v23  ;;  %v2055_v1 = vpop.f32.mrb[14].mxu1  ;;  %v2107_v25 = vsel %vm1380_vm7, %v2102_v33, %v2106_v44  ;;  %v7709_v53 = vmax.f32 %v2066_v16, %v2105_v27 }
 0x32b   : > { %v2070_v9 = vmax.f32 %v5984_v48, 0.0  ;;  %v2056_v56 = vpop.f32.mrb[15].mxu1  ;;  %v6219_v17 = vpack.i.bf16 %v2133_v21, %v7703_v47  ;;  %v2135_v26 = vmax.f32 %v2067_v28, %v2107_v25 }
 0x32c   : > { %v2071_v10 = vmax.f32 %v5985_v50, 0.0 }
 0x32d   : > { %v2108_v59 = vrot.slane %v2070_v9, 1  ;;  %6220 = vrot.lane.b32.xlu0 %v6219_v17, %s6882_s10  ;;  %v6224_v12 = vpack.i.bf16 %v2135_v26, %v7709_v53 }
 0x32e   : > { %v2110_v60 = vrot.slane %v2071_v10, 1 }
 0x32f   : > { %v7714_v61 = vmax.f32 %v2070_v9, %v2108_v59  ;;  %6225 = vrot.lane.b32.xlu1 %v6224_v12, %s6882_s10  ;;  %v2109_v23 = vsel %vm1380_vm7, %v2104_v35, %v2108_v59 }
 0x330   : > { %v2139_v62 = vmax.f32 %v2071_v10, %v2110_v60  ;;  %v2111_v39 = vsel %vm1380_vm7, %v2106_v44, %v2110_v60  ;;  %v2136_v30 = vmax.f32 %v2068_v31, %v2109_v23  ;;  %v6476_v23 = vld [vmem:[%s8856_s17] sm:$0xff]  }
 0x331   : > { %v2137_v63 = vmax.f32 %v2069_v34, %v2111_v39 }
 0x332   : > { %v6234_v0 = vpack.i.bf16 %v2139_v62, %v7714_v61 }
 0x333   : > { %v6229_v43 = vpack.i.bf16 %v2137_v63, %v2136_v30 }
 0x334   : > { %6235 = vrot.lane.b32.xlu1 %v6234_v0, %s6882_s10 }
 0x335   : > { %6230 = vrot.lane.b32.xlu0 %v6229_v43, %s6882_s10  ;;  %s8921_s10 = sld [smem:[#allocation23_spill]] }
 0x391   : > { %v6206_v2 = vpop.permute.xlu1 %6205 }
 0x392   : > { %v6208_v36 = vunpack.i.h.bf16 %v6206_v2  ;;  %v6207_v42 = vunpack.i.l.bf16 %v6206_v2 }
 0x394   : > { %v2183_v5 = vsel %vm2182_vm13, %v6207_v42, %v6208_v36  ;;  %v2205_v51 = vmax.f32 %v7666_v58, %v6208_v36 }
 0x395   : > { %v2204_v55 = vmax.f32 %v7663_v57, %v2183_v5 }
 0x397   : > { %v6211_v3 = vpop.permute.xlu0 %6210 }
 0x398   : > { %v6213_v8 = vunpack.i.h.bf16 %v6211_v3  ;;  %v6212_v18 = vunpack.i.l.bf16 %v6211_v3 }
 0x399   : > { %v6216_v40 = vpop.permute.xlu1 %6215 }
 0x39a   : > { %v2207_v19 = vmax.f32 %v7684_v54, %v6213_v8  ;;  %v2184_v52 = vsel %vm2182_vm13, %v6212_v18, %v6213_v8  ;;  %v6218_v22 = vunpack.i.h.bf16 %v6216_v40  ;;  %v6217_v11 = vunpack.i.l.bf16 %v6216_v40 }
 0x39b   : > { %v2206_v16 = vmax.f32 %v7680_v7, %v2184_v52  ;;  %v6883_v40 = vmov 65535  }
 0x39c   : > { %v2219_v20 = vpack.c.bf16 %v2207_v19, %v2205_v51  ;;  %v2185_v29 = vsel %vm2182_vm13, %v6217_v11, %v6218_v22  ;;  %v2209_v32 = vmax.f32 %v7694_v24, %v6218_v22  ;;  %v2402_v51 = vsel %vm2400_vm1, 4294967295, %v6883_v40 }
 0x39d   : > { %v2218_v28 = vpack.c.bf16 %v2206_v16, %v2204_v55  ;;  %v2208_v7 = vmax.f32 %v7689_v15, %v2185_v29  ;;  %v2403_v52 = vsel %vm2401_vm2, %v2402_v51, 0  ;;  %v6480_v29 = vld [vmem:[%s8919_s0 + $0x4] ss:$8 sps:$4 sm:$0xff]   ;;  %v2780_v51 = vld [vmem:[%s8853_s14 + $0x10] sm:$0xff]  ;;  %vm3698_vm1 = vcmask 236544  }
 0x39e   : > { %5603 = vmatprep.mubr.msk.bf16.mxu0 %vm2294_vm14, %v2219_v20  ;;  %2717 = vmatprep.subr.bf16.mxu1 %v6480_v29  ;;  %vm3760_vm2 = vcmask 779264  }
 0x39f   : > { %v6221_v13 = vpop.permute.xlu0 %6220  ;;  %2344 = vmatmul.mubr.bf16.vlgmr.msra.gmra.mrb[16].mxu0 %v2218_v28  ;;  %v6477_v28 = vld [vmem:[%s8856_s17 + $0x8] sm:$0x7f]  }
 0x3a0   : > { %v6223_v58 = vunpack.i.h.bf16 %v6221_v13  ;;  %v6222_v31 = vunpack.i.l.bf16 %v6221_v13  ;;  %v6478_v13 = vld [vmem:[%s8919_s0] ss:$8 sps:$4 sm:$0xff]  }
 0x3a1   : > { %v6226_v54 = vpop.permute.xlu1 %6225  ;;  %2718 = vmatpush1.bf16.msra.mxu1 %v6478_v13 }
 0x3a2   : > { %v2211_v33 = vmax.f32 %v2133_v21, %v6223_v58  ;;  %v2186_v57 = vsel %vm2182_vm13, %v6222_v31, %v6223_v58  ;;  %v6228_v14 = vunpack.i.h.bf16 %v6226_v54  ;;  %v6227_v44 = vunpack.i.l.bf16 %v6226_v54  ;;  %v6483_v58 = vld [vmem:[%s8919_s0 + $0x14] ss:$8 sps:$4 sm:$0xff]   ;;  %v6481_v31 = vld [vmem:[%s8919_s0 + $0x10] ss:$8 sps:$4 sm:$0xff]   ;;  %v6486_v54 = vld [vmem:[%s8919_s0 + $0x24] ss:$8 sps:$4 sm:$0xff]  }
 0x3a3   : > { %v2210_v34 = vmax.f32 %v7703_v47, %v2186_v57  ;;  %2719 = vmatprep.subr.bf16.mxu1 %v6483_v58  ;;  %v6487_v57 = vld [vmem:[%s8919_s0 + $0x30] ss:$8 sps:$4 sm:$0xff]  }
 0x3a4   : > { %v2221_v35 = vpack.c.bf16 %v2211_v33, %v2209_v32  ;;  %v2187_v27 = vsel %vm2182_vm13, %v6227_v44, %v6228_v14  ;;  %v2213_v50 = vmax.f32 %v2135_v26, %v6228_v14  ;;  %v6484_v32 = vld [vmem:[%s8919_s0 + $0x20] ss:$8 sps:$4 sm:$0xff]   ;;  %v6489_v33 = vld [vmem:[%s8919_s0 + $0x34] ss:$8 sps:$4 sm:$0xff]   ;;  %v6493_v14 = vld [vmem:[%s8919_s0 + $0x50] ss:$8 sps:$4 sm:$0xff]  }
 0x3a5   : > { %v2220_v45 = vpack.c.bf16 %v2210_v34, %v2208_v7  ;;  %v2212_v9 = vmax.f32 %v7709_v53, %v2187_v27  ;;  %2720 = vmatpush1.bf16.msra.mxu1 %v6481_v31  ;;  %v6492_v7 = vld [vmem:[%s8919_s0 + $0x44] ss:$8 sps:$4 sm:$0xff]   ;;  %v6490_v34 = vld [vmem:[%s8919_s0 + $0x40] ss:$8 sps:$4 sm:$0xff]  }
 0x3a6   : > { %v6236_v46 = vpop.permute.xlu1 %6235  ;;  %5604 = vmatprep.mubr.msk.bf16.mxu0 %vm2294_vm14, %v2221_v35  ;;  %2721 = vmatprep.subr.bf16.mxu1 %v6486_v54  ;;  %v6495_v35 = vld [vmem:[%s8919_s0 + $0x54] ss:$8 sps:$4 sm:$0xff]   ;;  %v6498_v44 = vld [vmem:[%s8919_s0 + $0x64] ss:$8 sps:$4 sm:$0xff]   ;;  %v6502_v27 = vld [vmem:[%s8919_s0 + $0x80] ss:$8 sps:$4 sm:$0xff]  }
 0x3a7   : > { %v6238_v48 = vunpack.i.h.bf16 %v6236_v46  ;;  %v6231_v49 = vpop.permute.xlu0 %6230  ;;  %2352 = vmatmul.mubr.bf16.gmra.mrb[20].mxu0 %v2220_v45  ;;  %v6237_v25 = vunpack.i.l.bf16 %v6236_v46  ;;  %v6496_v45 = vld [vmem:[%s8919_s0 + $0x60] ss:$8 sps:$4 sm:$0xff]   ;;  %v6501_v46 = vld [vmem:[%s8919_s0 + $0x74] ss:$8 sps:$4 sm:$0xff]  }
 0x3a8   : > { %v6233_v24 = vunpack.i.h.bf16 %v6231_v49  ;;  %v6232_v21 = vunpack.i.l.bf16 %v6231_v49  ;;  %v6504_v49 = vld [vmem:[%s8919_s0 + $0x84] ss:$8 sps:$4 sm:$0xff]  }
 0x3a9   : > { %v2217_v1 = vmax.f32 %v2139_v62, %v6238_v48  ;;  %v2189_v12 = vsel %vm2182_vm13, %v6237_v25, %v6238_v48  ;;  %2722 = vmatpush1.bf16.msra.mxu1 %v6484_v32  ;;  %v6499_v48 = vld [vmem:[%s8919_s0 + $0x70] ss:$8 sps:$4 sm:$0xff]   ;;  %v6513_v25 = vld [vmem:[%s8919_s0 + $0xb4] ss:$8 sps:$4 sm:$0xff]  }
 0x3aa   : > { %v2215_v15 = vmax.f32 %v2137_v63, %v6233_v24  ;;  %v2188_v47 = vsel %vm2182_vm13, %v6232_v21, %v6233_v24  ;;  %v2216_v26 = vmax.f32 %v7714_v61, %v2189_v12  ;;  %2723 = vmatprep.subr.bf16.mxu1 %v6489_v33  ;;  %v6507_v24 = vld [vmem:[%s8919_s0 + $0x94] ss:$8 sps:$4 sm:$0xff]   ;;  %v6505_v21 = vld [vmem:[%s8919_s0 + $0x90] ss:$8 sps:$4 sm:$0xff]   ;;  %vm2848_vm13 = vcmask 260096  }
 0x3ab   : > { %v2214_v56 = vmax.f32 %v2136_v30, %v2188_v47  ;;  %v2225_v59 = vpack.c.bf16 %v2217_v1, %v2217_v1  ;;  %v6508_v1 = vld [vmem:[%s8919_s0 + $0xa0] ss:$8 sps:$4 sm:$0xff]   ;;  %v6516_v47 = vld [vmem:[%s8919_s0 + $0xc4] ss:$8 sps:$4 sm:$0xff]  }
 0x3ac   : > { %v2223_v17 = vpack.c.bf16 %v2215_v15, %v2213_v50  ;;  %v2224_v60 = vpack.c.bf16 %v2216_v26, %v2216_v26  ;;  %v6510_v50 = vld [vmem:[%s8919_s0 + $0xa4] ss:$8 sps:$4 sm:$0xff]   ;;  %v6511_v15 = vld [vmem:[%s8919_s0 + $0xb0] ss:$8 sps:$4 sm:$0xff]  }
 0x3ad   : > { %v2222_v10 = vpack.c.bf16 %v2214_v56, %v2212_v9  ;;  %2724 = vmatpush1.bf16.msra.mxu1 %v6487_v57  ;;  %v6514_v9 = vld [vmem:[%s8919_s0 + $0xc0] ss:$8 sps:$4 sm:$0xff]   ;;  %v6519_v56 = vld [vmem:[%s8919_s0 + $0xd4] ss:$8 sps:$4 sm:$0xff]  }
 0x3ae   : > { %5605 = vmatprep.mubr.msk.bf16.mxu0 %vm2294_vm14, %v2223_v17  ;;  %2725 = vmatprep.subr.bf16.mxu1 %v6492_v7  ;;  %v6517_v17 = vld [vmem:[%s8919_s0 + $0xd0] ss:$8 sps:$4 sm:$0xff]  }
 0x3af   : > { %2360 = vmatmul.mubr.bf16.gmra.mrb[24].mxu0 %v2222_v10 }
 0x3b0   : > { %5606 = vmatprep.mubr.msk.bf16.mxu0 %vm2294_vm14, %v2225_v59  ;;  %vm2950_vm14 = vcmask 523264  }
 0x3b1   : > { %2726 = vmatpush1.bf16.msra.mxu1 %v6490_v34 }
 0x3b2   : > { %2727 = vmatprep.subr.bf16.mxu1 %v6495_v35 }
 0x3b5   : > { %2728 = vmatpush1.bf16.msra.mxu1 %v6493_v14 }
 0x3b6   : > { %2729 = vmatprep.subr.bf16.mxu1 %v6498_v44 }
 0x3b7   : > { %2368 = vmatmul.mubr.bf16.gmra.mrb[28].mxu0 %v2224_v60  ;;  %v6520_v60 = vld [vmem:[%s8919_s0 + $0xe0] ss:$8 sps:$4 sm:$0xff]  }
 0x3b8   : > { %5908 = vmatprep.mubr.msk.bf16.mxu0 %vm2393_vm15, %v6476_v23  ;;  %v6522_v23 = vld [vmem:[%s8919_s0 + $0xe4] ss:$8 sps:$4 sm:$0xff]   ;;  %s8926_s0 = sld [smem:[#allocation28_spill]] }
 0x3b9   : > { %2730 = vmatpush1.bf16.msra.mxu1 %v6496_v45 }
 0x3ba   : > { %2731 = vmatprep.subr.bf16.mxu1 %v6501_v46 }
 0x3bd   : > { %2732 = vmatpush1.bf16.msra.mxu1 %v6499_v48 }
 0x3be   : > { %2733 = vmatprep.subr.bf16.mxu1 %v6504_v49  ;;  %v6681_v37 = vld [vmem:[%s8926_s0 + $0x10] ss:$8 sps:$4 sm:$0xff]  }
 0x3c1   : > { %2734 = vmatpush1.bf16.msra.mxu1 %v6502_v27 }
 0x3c2   : > { %2735 = vmatprep.subr.bf16.mxu1 %v6507_v24 }
 0x3c5   : > { %2736 = vmatpush1.bf16.msra.mxu1 %v6505_v21 }
 0x3c6   : > { %2737 = vmatprep.subr.bf16.mxu1 %v6510_v50 }
 0x3c9   : > { %2738 = vmatpush1.bf16.msra.mxu1 %v6508_v1 }
 0x3ca   : > { %2739 = vmatprep.subr.bf16.mxu1 %v6513_v25 }
 0x3cd   : > { %2740 = vmatpush1.bf16.msra.mxu1 %v6511_v15 }
 0x3ce   : > { %2741 = vmatprep.subr.bf16.mxu1 %v6516_v47 }
 0x3d1   : > { %2742 = vmatpush1.bf16.msra.mxu1 %v6514_v9 }
 0x3d2   : > { %2743 = vmatprep.subr.bf16.mxu1 %v6519_v56 }
 0x3d5   : > { %2744 = vmatpush1.bf16.msra.mxu1 %v6517_v17 }
 0x3d6   : > { %2745 = vmatprep.subr.bf16.mxu1 %v6522_v23 }
 0x3d9   : > { %2746 = vmatpush1.bf16.msra.mxu1 %v6520_v60 }
 0x3da   : > { %3636 = vmatprep.subr.bf16.mxu1 %v6878_v41 }
 0x472   : > { %v2345_v53 = vpop.f32.mrb[16].mxu0 }
 0x473   : > { %v2347_v62 = vpop.f32.mrb[17].mxu0 }
 0x474   : > { %v2348_v39 = vpop.f32.mrb[18].mxu0 }
 0x475   : > { %v2379_v30 = vpack.c.bf16 %v2348_v39, %v2345_v53  ;;  %v2350_v63 = vpop.f32.mrb[19].mxu0 }
 0x477   : > { %5900 = vmatprep.subr.bf16.mxu0 %v2379_v30 }
 0x478   : > { %5901 = vmatpush3.bf16.msra.mxu0 %v2379_v30 }
 0x47a   : > { %v2353_v0 = vpop.f32.mrb[20].mxu0 }
 0x47b   : > { %v2355_v43 = vpop.f32.mrb[21].mxu0 }
 0x47c   : > { %v2356_v2 = vpop.f32.mrb[22].mxu0 }
 0x47d   : > { %v2380_v61 = vpack.c.bf16 %v2356_v2, %v2353_v0  ;;  %v2358_v36 = vpop.f32.mrb[23].mxu0 }
 0x47f   : > { %5902 = vmatprep.subr.bf16.mxu0 %v2380_v61 }
 0x480   : > { %5903 = vmatpush3.bf16.msra.mxu0 %v2380_v61 }
 0x482   : > { %v2361_v42 = vpop.f32.mrb[24].mxu0 }
 0x483   : > { %v2363_v3 = vpop.f32.mrb[25].mxu0 }
 0x484   : > { %v2364_v5 = vpop.f32.mrb[26].mxu0 }
 0x485   : > { %v2381_v8 = vpack.c.bf16 %v2364_v5, %v2361_v42  ;;  %v2366_v18 = vpop.f32.mrb[27].mxu0  ;;  %v2779_v5 = vld [vmem:[%s8853_s14 + $0x8] sm:$0xff] }
 0x486   : > { %v2781_v18 = vld [vmem:[%s8853_s14 + $0x18] sm:$0x3f] }
 0x487   : > { %5904 = vmatprep.subr.bf16.mxu0 %v2381_v8 }
 0x488   : > { %5905 = vmatpush3.bf16.msra.mxu0 %v2381_v8  ;;  %v2778_v8 = vld [vmem:[%s8853_s14] sm:$0xff] }
 0x48a   : > { %v2369_v19 = vpop.f32.mrb[28].mxu0 }
 0x48b   : > { %v2382_v55 = vpack.c.bf16 %v2369_v19, %v2369_v19  ;;  %v2371_v16 = vpop.f32.mrb[29].mxu0 }
 0x48c   : > { %v2372_v20 = vpop.f32.mrb[30].mxu0 }
 0x48d   : > { %v2405_v22 = vand.u32 %v2403_v52, %v2382_v55  ;;  %v2373_v11 = vpop.f32.mrb[31].mxu0 }
 0x48f   : > { %5906 = vmatprep.subr.bf16.mxu0 %v2405_v22 }
 0x490   : > { %5907 = vmatpush3.bf16.msra.mxu0 %v2405_v22 }
 0x493   : > { %5909 = vmatmul.mubr.msk.bf16.vlgmr.msra.gmra.mrb[32].mxu0 %vm2393_vm15, %v6477_v28  ;;  %vm3351_vm15 = vcmask 785408  }
 0x566   : > { %v5910_v10 = vpop.f32.mrb[32].mxu0 }
 0x567   : > { %2459 = vst.msk [vmem:[#allocation3 + $0x11] sm:$0xff] %vm2456_vm4, %v5910_v10  ;;  %v2441_v59 = vpop.f32.mrb[33].mxu0 }
 0x568   : > { %2457 = vst.msk [vmem:[#allocation3 + $0x1] sm:$0xff] %vm2456_vm4, %v2441_v59  ;;  %v5911_v12 = vpop.f32.mrb[34].mxu0 }
 0x569   : > { %2461 = vst.msk [vmem:[#allocation3 + $0x19] sm:$0x3f] %vm2460_vm5, %v5911_v12  ;;  %v2444_v26 = vpop.f32.mrb[35].mxu0  ;;  %vm4201_vm5 = vcmask 518144  }
 0x56a   : > { %2458 = vst.msk [vmem:[#allocation3 + $0x9] sm:$0xff] %vm2456_vm4, %v2444_v26 }
 0x56e   : > { %v2468_v36 = vld [vmem:[#allocation3 + $0x11] sm:$0xff] }
 0x56f   : > { %v2466_v53 = vld [vmem:[#allocation3 + $0x1] sm:$0xff] }
 0x570   : > { %v2472_v43 = vld [vmem:[#allocation3 + $0x12] sm:$0xff]  ;;  %v2473_v2 = vld [vmem:[#allocation3 + $0x1a] sm:$0x3f]  ;;  %v2462_v11 = vld [vmem:[#allocation3] sm:$0xff] }
 0x571   : > { %v2470_v62 = vld [vmem:[#allocation3 + $0x2] sm:$0xff]  ;;  %v2471_v39 = vld [vmem:[#allocation3 + $0xa] sm:$0xff]  ;;  %v2469_v61 = vld [vmem:[#allocation3 + $0x19] sm:$0x3f]  ;;  %v6254_v42 = vpack.i.bf16 %v2473_v2, %v2472_v43 }
 0x572   : > { %v2467_v30 = vld [vmem:[#allocation3 + $0x9] sm:$0xff]  ;;  %v6244_v63 = vpack.i.bf16 %v2471_v39, %v2470_v62  ;;  %v6249_v3 = vpack.i.bf16 %v2469_v61, %v2468_v36  ;;  %v2465_v49 = vld [vmem:[#allocation3 + $0x18] sm:$0x3f] }
 0x573   : > { %v6239_v0 = vpack.i.bf16 %v2467_v30, %v2466_v53  ;;  %v2463_v28 = vld [vmem:[#allocation3 + $0x8] sm:$0xff]  ;;  %v2464_v48 = vld [vmem:[#allocation3 + $0x10] sm:$0xff] }
 0x574   : > { %6245 = vrot.lane.b32.xlu1 %v6244_v63, %s6881_s30 }
 0x575   : > { %6240 = vrot.lane.b32.xlu0 %v6239_v0, %s6884_s7 }
 0x578   : > { %6255 = vrot.lane.b32.xlu1 %v6254_v42, %s6881_s30 }
 0x579   : > { %6250 = vrot.lane.b32.xlu0 %v6249_v3, %s6884_s7  ;;  %s8920_s7 = sld [smem:[#allocation24_spill]] }
 0x57c   : > { %2789 = vperm.xlu1 %6138, %v2779_v5  }
 0x57d   : > { %2784 = vperm.xlu0 %6137, %v2778_v8  }
 0x57f   : > { %v6523_v50 = vld [vmem:[%s8920_s7] ss:$8 sps:$4 sm:$0xff]   ;;  %v6525_v1 = vld [vmem:[%s8920_s7 + $0x4] ss:$8 sps:$4 sm:$0xff]   ;;  %v6528_v25 = vld [vmem:[%s8920_s7 + $0x14] ss:$8 sps:$4 sm:$0xff]  }
 0x580   : > { %2799 = vperm.xlu1 %6138, %v2781_v18   ;;  %3358 = vmatprep.subr.bf16.mxu0 %v6525_v1  ;;  %v6526_v15 = vld [vmem:[%s8920_s7 + $0x10] ss:$8 sps:$4 sm:$0xff]   ;;  %v6531_v47 = vld [vmem:[%s8920_s7 + $0x24] ss:$8 sps:$4 sm:$0xff]   ;;  %v6529_v9 = vld [vmem:[%s8920_s7 + $0x20] ss:$8 sps:$4 sm:$0xff]  }
 0x581   : > { %2794 = vperm.xlu0 %6137, %v2780_v51   ;;  %3359 = vmatpush1.bf16.msra.mxu0 %v6523_v50  ;;  %v6534_v56 = vld [vmem:[%s8920_s7 + $0x34] ss:$8 sps:$4 sm:$0xff]   ;;  %v6532_v17 = vld [vmem:[%s8920_s7 + $0x30] ss:$8 sps:$4 sm:$0xff]   ;;  %v6537_v10 = vld [vmem:[%s8920_s7 + $0x44] ss:$8 sps:$4 sm:$0xff]  }
 0x582   : > { %3360 = vmatprep.subr.bf16.mxu0 %v6528_v25  ;;  %v6535_v59 = vld [vmem:[%s8920_s7 + $0x40] ss:$8 sps:$4 sm:$0xff]   ;;  %v6540_v12 = vld [vmem:[%s8920_s7 + $0x54] ss:$8 sps:$4 sm:$0xff]   ;;  %v6538_v26 = vld [vmem:[%s8920_s7 + $0x50] ss:$8 sps:$4 sm:$0xff]  }
 0x583   : > { %v6543_v60 = vld [vmem:[%s8920_s7 + $0x64] ss:$8 sps:$4 sm:$0xff]   ;;  %v6541_v23 = vld [vmem:[%s8920_s7 + $0x60] ss:$8 sps:$4 sm:$0xff]   ;;  %v6546_v53 = vld [vmem:[%s8920_s7 + $0x74] ss:$8 sps:$4 sm:$0xff]  }
 0x584   : > { %v6544_v62 = vld [vmem:[%s8920_s7 + $0x70] ss:$8 sps:$4 sm:$0xff]   ;;  %v6549_v39 = vld [vmem:[%s8920_s7 + $0x84] ss:$8 sps:$4 sm:$0xff]   ;;  %v6547_v30 = vld [vmem:[%s8920_s7 + $0x80] ss:$8 sps:$4 sm:$0xff]  }
 0x585   : > { %3361 = vmatpush1.bf16.msra.mxu0 %v6526_v15  ;;  %v6552_v63 = vld [vmem:[%s8920_s7 + $0x94] ss:$8 sps:$4 sm:$0xff]   ;;  %v6550_v0 = vld [vmem:[%s8920_s7 + $0x90] ss:$8 sps:$4 sm:$0xff]   ;;  %v6555_v43 = vld [vmem:[%s8920_s7 + $0xa4] ss:$8 sps:$4 sm:$0xff]  }
 0x586   : > { %3362 = vmatprep.subr.bf16.mxu0 %v6531_v47  ;;  %v6553_v2 = vld [vmem:[%s8920_s7 + $0xa0] ss:$8 sps:$4 sm:$0xff]   ;;  %v6558_v61 = vld [vmem:[%s8920_s7 + $0xb4] ss:$8 sps:$4 sm:$0xff]   ;;  %v6556_v36 = vld [vmem:[%s8920_s7 + $0xb0] ss:$8 sps:$4 sm:$0xff]  }
 0x587   : > { %v6561_v42 = vld [vmem:[%s8920_s7 + $0xc4] ss:$8 sps:$4 sm:$0xff]   ;;  %v6559_v3 = vld [vmem:[%s8920_s7 + $0xc0] ss:$8 sps:$4 sm:$0xff]   ;;  %v6564_v5 = vld [vmem:[%s8920_s7 + $0xd4] ss:$8 sps:$4 sm:$0xff]  }
 0x588   : > { %v6562_v8 = vld [vmem:[%s8920_s7 + $0xd0] ss:$8 sps:$4 sm:$0xff]   ;;  %v6567_v18 = vld [vmem:[%s8920_s7 + $0xe4] ss:$8 sps:$4 sm:$0xff]   ;;  %v6565_v51 = vld [vmem:[%s8920_s7 + $0xe0] ss:$8 sps:$4 sm:$0xff]  }
 0x589   : > { %3363 = vmatpush1.bf16.msra.mxu0 %v6529_v9  ;;  %v6568_v25 = vld [vmem:[%s8920_s7 + $0xf0] ss:$8 sps:$4 sm:$0xff]   ;;  %v6570_v15 = vld [vmem:[%s8920_s7 + $0xf4] ss:$8 sps:$4 sm:$0xff]  }
 0x58a   : > { %3364 = vmatprep.subr.bf16.mxu0 %v6534_v56 }
 0x58d   : > { %3365 = vmatpush1.bf16.msra.mxu0 %v6532_v17 }
 0x58e   : > { %3366 = vmatprep.subr.bf16.mxu0 %v6537_v10 }
 0x591   : > { %3367 = vmatpush1.bf16.msra.mxu0 %v6535_v59 }
 0x592   : > { %3368 = vmatprep.subr.bf16.mxu0 %v6540_v12 }
 0x595   : > { %3369 = vmatpush1.bf16.msra.mxu0 %v6538_v26 }
 0x596   : > { %3370 = vmatprep.subr.bf16.mxu0 %v6543_v60 }
 0x599   : > { %3371 = vmatpush1.bf16.msra.mxu0 %v6541_v23 }
 0x59a   : > { %3372 = vmatprep.subr.bf16.mxu0 %v6546_v53 }
 0x59d   : > { %3373 = vmatpush1.bf16.msra.mxu0 %v6544_v62 }
 0x59e   : > { %3374 = vmatprep.subr.bf16.mxu0 %v6549_v39 }
 0x5a1   : > { %3375 = vmatpush1.bf16.msra.mxu0 %v6547_v30 }
 0x5a2   : > { %3376 = vmatprep.subr.bf16.mxu0 %v6552_v63 }
 0x5a5   : > { %3377 = vmatpush1.bf16.msra.mxu0 %v6550_v0 }
 0x5a6   : > { %3378 = vmatprep.subr.bf16.mxu0 %v6555_v43 }
 0x5a9   : > { %3379 = vmatpush1.bf16.msra.mxu0 %v6553_v2 }
 0x5aa   : > { %3380 = vmatprep.subr.bf16.mxu0 %v6558_v61 }
 0x5ad   : > { %3381 = vmatpush1.bf16.msra.mxu0 %v6556_v36 }
 0x5ae   : > { %3382 = vmatprep.subr.bf16.mxu0 %v6561_v42 }
 0x5b1   : > { %3383 = vmatpush1.bf16.msra.mxu0 %v6559_v3 }
 0x5b2   : > { %3384 = vmatprep.subr.bf16.mxu0 %v6564_v5 }
 0x5b5   : > { %3385 = vmatpush1.bf16.msra.mxu0 %v6562_v8 }
 0x5b6   : > { %3386 = vmatprep.subr.bf16.mxu0 %v6567_v18 }
 0x5b9   : > { %3387 = vmatpush1.bf16.msra.mxu0 %v6565_v51 }
 0x5ba   : > { %3388 = vmatprep.subr.bf16.mxu0 %v6570_v15 }
 0x5bd   : > { %3389 = vmatpush1.bf16.msra.mxu0 %v6568_v25 }
 0x5e6   : > { %v6246_v19 = vpop.permute.xlu1 %6245 }
 0x5e7   : > { %v6241_v52 = vpop.permute.xlu0 %6240  ;;  %v6248_v55 = vunpack.i.h.bf16 %v6246_v19  ;;  %v6247_v16 = vunpack.i.l.bf16 %v6246_v19  ;;  %v2548_v19 = vld [vmem:[%s8921_s10] sm:$0x3]  ;;  %s6886_s10 = smov 112  }
 0x5e8   : > { %v6243_v20 = vunpack.i.h.bf16 %v6241_v52  ;;  %v6242_v22 = vunpack.i.l.bf16 %v6241_v52  ;;  %v2553_v52 = vrot.slane %v2548_v19, %v7307_v4 }
 0x5ea   : > { %v2511_v13 = vsel %vm1515_vm10, %v6243_v20, %v6248_v55  ;;  %v2506_v29 = vsel %vm2456_vm4, %v2462_v11, %v6242_v22  ;;  %v2507_v58 = vsel %vm2456_vm4, %v2463_v28, %v6243_v20  ;;  %v2510_v31 = vsel %vm1515_vm10, %v6242_v22, %v6247_v16  ;;  %v6256_v33 = vpop.permute.xlu1 %6255 }
 0x5eb   : > { %v2514_v54 = vpack.c.bf16 %v2507_v58, %v2506_v29  ;;  %v2515_v32 = vpack.c.bf16 %v2511_v13, %v2510_v31  ;;  %v6251_v57 = vpop.permute.xlu0 %6250  ;;  %v6258_v7 = vunpack.i.h.bf16 %v6256_v33  ;;  %v6257_v34 = vunpack.i.l.bf16 %v6256_v33 }
 0x5ec   : > { %v6253_v35 = vunpack.i.h.bf16 %v6251_v57  ;;  %v6252_v14 = vunpack.i.l.bf16 %v6251_v57  ;;  %v2557_v55 = vrot.slane %v2548_v19, %v7312_v6 }
 0x5ed   : > { %5641 = vmatprep.mubr.msk.bf16.mxu1 %vm2710_vm9, %v2515_v32 }
 0x5ee   : > { %v2513_v44 = vsel %vm1515_vm10, %v6253_v35, %v6258_v7  ;;  %v2512_v45 = vsel %vm1515_vm10, %v6252_v14, %v6257_v34  ;;  %2750 = vmatmul.mubr.bf16.vlgmr.msra.gmra.mrb[16].mxu1 %v2514_v54  ;;  %v2508_v27 = vsel %vm2456_vm4, %v2464_v48, %v6252_v14  ;;  %v2509_v24 = vsel %vm2456_vm4, %v2465_v49, %v6253_v35 }
 0x5ef   : > { %v2517_v46 = vpack.c.bf16 %v2513_v44, %v2512_v45  ;;  %v2516_v21 = vpack.c.bf16 %v2509_v24, %v2508_v27  ;;  %vm4196_vm4 = vcmask 523265  }
 0x5f1   : > { %5642 = vmatprep.mubr.msk.bf16.mxu1 %vm2710_vm9, %v2517_v46 }
 0x5f6   : > { %2760 = vmatmul.mubr.bf16.gmra.mrb[20].mxu1 %v2516_v21 }
 0x5fb   : > { %v2790_v7 = vpop.permute.xlu1 %2789 }
 0x5fc   : > { %v2785_v31 = vpop.permute.xlu0 %2784 }
 0x5ff   : > { %v2800_v53 = vpop.permute.xlu1 %2799 }
 0x600   : > { %v2795_v10 = vpop.permute.xlu0 %2794 }
 0x6c1   : > { %v2751_v16 = vpop.f32.mrb[16].mxu1 }
 0x6c2   : > { %v2752_v20 = vadd.f32 %v2751_v16, %v2553_v52  ;;  %v2753_v22 = vpop.f32.mrb[17].mxu1 }
 0x6c3   : > { %v2754_v11 = vadd.f32 %v2753_v22, %v2557_v55  ;;  %v2755_v28 = vpop.f32.mrb[18].mxu1 }
 0x6c4   : > { %v2770_v13 = vmax.f32 %v2752_v20, 0.0  ;;  %v2756_v29 = vadd.f32 %v2755_v28, %v2553_v52  ;;  %v2757_v58 = vpop.f32.mrb[19].mxu1 }
 0x6c5   : > { %v2771_v54 = vmax.f32 %v2754_v11, 0.0  ;;  %v2758_v32 = vadd.f32 %v2757_v58, %v2557_v55  ;;  %v6573_v11 = vld [vmem:[%s8920_s7 + $0x104] ss:$8 sps:$4 sm:$0xff]  }
 0x6c6   : > { %v2802_v33 = vmul.f32 %v2785_v31, %v2770_v13  ;;  %v2772_v57 = vmax.f32 %v2756_v29, 0.0  ;;  %3411 = vmatprep.subr.bf16.mxu0 %v6573_v11 }
 0x6c7   : > { %v2803_v34 = vmul.f32 %v2785_v31, %v2771_v54  ;;  %v2773_v35 = vmax.f32 %v2758_v32, 0.0 }
 0x6c8   : > { %v2818_v14 = vrot.slane %v2802_v33, 7  ;;  %v2804_v44 = vmul.f32 %v2790_v7, %v2772_v57 }
 0x6c9   : > { %v2819_v45 = vrot.slane %v2803_v34, 7  ;;  %v2805_v46 = vmul.f32 %v2790_v7, %v2773_v35  ;;  %v2761_v48 = vpop.f32.mrb[20].mxu1 }
 0x6ca   : > { %2840 = vst [vmem:[#allocation4] sm:$0xfe] %v2818_v14  ;;  %v2820_v49 = vrot.slane %v2804_v44, 7  ;;  %v2762_v27 = vadd.f32 %v2761_v48, %v2553_v52  ;;  %v2763_v24 = vpop.f32.mrb[21].mxu1 }
 0x6cb   : > { %2842 = vst.msk [vmem:[#allocation4 + $0x8] sm:$0xfe] %vm2841_vm12, %v2819_v45  ;;  %v2822_v21 = vrot.slane %v2805_v46, 7  ;;  %v2764_v50 = vadd.f32 %v2763_v24, %v2557_v55  ;;  %v2765_v1 = vpop.f32.mrb[22].mxu1 }
 0x6cc   : > { %v7976_v47 = vsel %vm1125_vm0, %v2818_v14, %v2820_v49  ;;  %v2774_v9 = vmax.f32 %v2762_v27, 0.0  ;;  %v2766_v56 = vadd.f32 %v2765_v1, %v2553_v52  ;;  %v2767_v17 = vpop.f32.mrb[23].mxu1 }
 0x6cd   : > { %v2823_v59 = vsel %vm1125_vm0, %v2819_v45, %v2822_v21  ;;  %v2775_v12 = vmax.f32 %v2764_v50, 0.0  ;;  %v2768_v26 = vadd.f32 %v2767_v17, %v2557_v55  ;;  %v2875_v3 = vrot.slane %v7976_v47, 1 }
 0x6ce   : > { %2844 = vst.msk [vmem:[#allocation4 + $0x18] sm:$0xff] %vm1515_vm10, %v2823_v59  ;;  %v2806_v60 = vmul.f32 %v2795_v10, %v2774_v9  ;;  %v2776_v23 = vmax.f32 %v2766_v56, 0.0  ;;  %v2921_v16 = vrot.slane %v7976_v47, 2 }
 0x6cf   : > { %v2807_v62 = vmul.f32 %v2795_v10, %v2775_v12  ;;  %v2777_v39 = vmax.f32 %v2768_v26, 0.0 }
 0x6d0   : > { %v2824_v30 = vrot.slane %v2806_v60, 7  ;;  %v2808_v63 = vmul.f32 %v2800_v53, %v2776_v23 }
 0x6d1   : > { %v2826_v0 = vrot.slane %v2807_v62, 7  ;;  %v2809_v43 = vmul.f32 %v2800_v53, %v2777_v39  ;;  %v2858_v2 = vld [vmem:[#allocation4] sm:$0xfe] }
 0x6d2   : > { %v7981_v61 = vsel %vm1125_vm0, %v2820_v49, %v2824_v30  ;;  %v2828_v36 = vrot.slane %v2808_v63, 7  ;;  %v2874_v42 = vrot.slane %v2858_v2, 1  ;;  %v2859_v29 = vld [vmem:[#allocation4 + $0x8] sm:$0xfe]  ;;  %v2862_v54 = vld [vmem:[#allocation4] sm:$0xfc] }
 0x6d3   : > { %v2827_v5 = vsel %vm1125_vm0, %v2822_v21, %v2826_v0  ;;  %v2830_v8 = vrot.slane %v2809_v43, 7  ;;  %v2880_v18 = vrot.slane %v7981_v61, 1  ;;  %v2926_v20 = vrot.slane %v7981_v61, 2  ;;  %v2863_v32 = vld [vmem:[#allocation4 + $0x8] sm:$0xfc]  ;;  %v2850_v2 = vld [vmem:[#allocation4] sm:$0xff] }
 0x6d4   : > { %2846 = vst.msk [vmem:[#allocation4 + $0x28] sm:$0xff] %vm1515_vm10, %v2827_v5  ;;  %v2829_v51 = vsel %vm1125_vm0, %v2824_v30, %v2828_v36  ;;  %v2876_v19 = vsel %vm1380_vm7, %v2874_v42, %v2875_v3  ;;  %v2877_v57 = vrot.slane %v2859_v29, 1  ;;  %v2920_v21 = vrot.slane %v2862_v54, 2  ;;  %v2851_v43 = vld [vmem:[#allocation4 + $0x8] sm:$0xff] }
 0x6d5   : > { %2847 = vst [vmem:[#allocation4 + $0x30] sm:$0x7f] %v2829_v51  ;;  %v2831_v52 = vsel %vm1125_vm0, %v2826_v0, %v2830_v8  ;;  %v2881_v55 = vsel %vm1380_vm7, %v2875_v3, %v2880_v18  ;;  %v2853_v28 = vld [vmem:[#allocation4 + $0x18] sm:$0xff]  ;;  %v2927_v13 = vsel %vm1460_vm8, %v2921_v16, %v2926_v20  ;;  %v2923_v50 = vrot.slane %v2863_v32, 2  ;;  %v6574_v51 = vld [vmem:[%s8920_s7 + $0x110] ss:$8 sps:$4 sm:$0xff]  }
 0x6d6   : > { %2849 = vst.msk [vmem:[#allocation4 + $0x38] sm:$0x7f] %vm2848_vm13, %v2831_v52  ;;  %v6259_v22 = vpack.i.bf16 %v2881_v55, %v2876_v19  ;;  %v2878_v58 = vrot.slane %v2853_v28, 1  ;;  %v2924_v14 = vrot.slane %v2853_v28, 2  ;;  %v2922_v10 = vsel %vm1460_vm8, %v2920_v21, %v2921_v16  ;;  %v6571_v3 = vld [vmem:[%s8920_s7 + $0x100] ss:$8 sps:$4 sm:$0xff]  }
 0x6d7   : > { %v2971_v8 = vpack.c.bf16 %v7976_v47, %v2850_v2  ;;  %v6579_v52 = vld [vmem:[%s8920_s7 + $0x124] ss:$8 sps:$4 sm:$0xff]   ;;  %v6594_v21 = vld [vmem:[%s8920_s7 + $0x174] ss:$8 sps:$4 sm:$0xff]  }
 0x6d8   : > { %6260 = vrot.lane.b32.xlu0 %v6259_v22, %s6881_s30  ;;  %v2879_v46 = vsel %vm1380_vm7, %v2877_v57, %v2878_v58  ;;  %v2925_v56 = vsel %vm1460_vm8, %v2923_v50, %v2924_v14  ;;  %v6577_v22 = vld [vmem:[%s8920_s7 + $0x120] ss:$8 sps:$4 sm:$0xff]   ;;  %v6592_v50 = vld [vmem:[%s8920_s7 + $0x170] ss:$8 sps:$4 sm:$0xff]  }
 0x6d9   : > { %v6274_v12 = vpack.i.bf16 %v2925_v56, %v2922_v10  ;;  %v6603_v56 = vld [vmem:[%s8920_s7 + $0x1a4] ss:$8 sps:$4 sm:$0xff]   ;;  %v6606_v10 = vld [vmem:[%s8920_s7 + $0x1b4] ss:$8 sps:$4 sm:$0xff]  }
 0x6db   : > { %v7998_v31 = vld [vmem:[#allocation4 + $0x28] sm:$0xff] }
 0x6dc   : > { %v2860_v33 = vld [vmem:[#allocation4 + $0x30] sm:$0x7f]  ;;  %v2882_v7 = vrot.slane %v7998_v31, 1  ;;  %v2928_v34 = vrot.slane %v7998_v31, 2 }
 0x6dd   : > { %v2884_v35 = vrot.slane %v2860_v33, 1  ;;  %v2864_v44 = vld [vmem:[#allocation4 + $0x30] sm:$0xff]  ;;  %v2865_v45 = vld [vmem:[#allocation4 + $0x38] sm:$0xff] }
 0x6de   : > { %v2883_v48 = vsel %vm1380_vm7, %v2878_v58, %v2882_v7  ;;  %v2861_v49 = vld [vmem:[#allocation4 + $0x38] sm:$0x7f]  ;;  %v2929_v25 = vsel %vm1460_vm8, %v2924_v14, %v2928_v34  ;;  %v2930_v15 = vrot.slane %v2864_v44, 2  ;;  %v2932_v9 = vrot.slane %v2865_v45, 2  ;;  %v2856_v11 = vld [vmem:[#allocation4 + $0x30] sm:$0x3f] }
 0x6df   : > { %v2885_v27 = vsel %vm1380_vm7, %v2880_v18, %v2884_v35  ;;  %v6269_v24 = vpack.i.bf16 %v2883_v48, %v2879_v46  ;;  %v2886_v17 = vrot.slane %v2861_v49, 1  ;;  %v6279_v59 = vpack.i.bf16 %v2929_v25, %v2927_v13  ;;  %v6576_v18 = vld [vmem:[%s8920_s7 + $0x114] ss:$8 sps:$4 sm:$0xff]   ;;  %v6580_v14 = vld [vmem:[%s8920_s7 + $0x130] ss:$8 sps:$4 sm:$0xff]  }
 0x6e0   : > { %v6264_v1 = vpack.i.bf16 %v2884_v35, %v2885_v27  ;;  %v2931_v26 = vsel %vm1460_vm8, %v2926_v20, %v2930_v15  ;;  %v2933_v60 = vsel %vm1460_vm8, %v2928_v34, %v2932_v9  ;;  %v6294_v39 = vpack.i.bf16 %v2932_v9, %v2930_v15  ;;  %v2857_v20 = vld [vmem:[#allocation4 + $0x38] sm:$0x3f]  ;;  %v6582_v58 = vld [vmem:[%s8920_s7 + $0x134] ss:$8 sps:$4 sm:$0xff]   ;;  %v6586_v49 = vld [vmem:[%s8920_s7 + $0x150] ss:$8 sps:$4 sm:$0xff]  }
 0x6e1   : > { %6270 = vrot.lane.b32.xlu0 %v6269_v24, %s6881_s30  ;;  %v2887_v23 = vsel %vm1380_vm7, %v2882_v7, %v2886_v17  ;;  %v6289_v53 = vpack.i.bf16 %v2933_v60, %v2931_v26  ;;  %v2975_v34 = vpack.c.bf16 %v2856_v11, %v7981_v61  ;;  %v6585_v61 = vld [vmem:[%s8920_s7 + $0x144] ss:$8 sps:$4 sm:$0xff]   ;;  %v6583_v46 = vld [vmem:[%s8920_s7 + $0x140] ss:$8 sps:$4 sm:$0xff]   ;;  %v6588_v48 = vld [vmem:[%s8920_s7 + $0x154] ss:$8 sps:$4 sm:$0xff]  }
 0x6e2   : > { %6265 = vrot.lane.b32.xlu1 %v6264_v1, %s6881_s30  ;;  %v6284_v62 = vpack.i.bf16 %v2886_v17, %v2887_v23  ;;  %v6591_v27 = vld [vmem:[%s8920_s7 + $0x164] ss:$8 sps:$4 sm:$0xff]   ;;  %v6589_v24 = vld [vmem:[%s8920_s7 + $0x160] ss:$8 sps:$4 sm:$0xff]   ;;  %v6600_v15 = vld [vmem:[%s8920_s7 + $0x194] ss:$8 sps:$4 sm:$0xff]  }
 0x6e3   : > { %v6597_v1 = vld [vmem:[%s8920_s7 + $0x184] ss:$8 sps:$4 sm:$0xff]   ;;  %v6595_v25 = vld [vmem:[%s8920_s7 + $0x180] ss:$8 sps:$4 sm:$0xff]   ;;  %v6598_v9 = vld [vmem:[%s8920_s7 + $0x190] ss:$8 sps:$4 sm:$0xff]  }
 0x6e4   : > { %v6601_v17 = vld [vmem:[%s8920_s7 + $0x1a0] ss:$8 sps:$4 sm:$0xff]   ;;  %v6609_v26 = vld [vmem:[%s8920_s7 + $0x1c4] ss:$8 sps:$4 sm:$0xff]  }
 0x6e5   : > { %6280 = vrot.lane.b32.xlu0 %v6279_v59, %s8883_s9  ;;  %v6607_v23 = vld [vmem:[%s8920_s7 + $0x1c0] ss:$8 sps:$4 sm:$0xff]  }
 0x6e6   : > { %6275 = vrot.lane.b32.xlu1 %v6274_v12, %s8883_s9  ;;  %v6604_v12 = vld [vmem:[%s8920_s7 + $0x1b0] ss:$8 sps:$4 sm:$0xff]  }
 0x6e9   : > { %6290 = vrot.lane.b32.xlu0 %v6289_v53, %s8883_s9 }
 0x6ea   : > { %6285 = vrot.lane.b32.xlu1 %v6284_v62, %s6881_s30 }
 0x6ee   : > { %6295 = vrot.lane.b32.xlu1 %v6294_v39, %s8883_s9  ;;  %v6612_v39 = vld [vmem:[%s8920_s7 + $0x1d4] ss:$8 sps:$4 sm:$0xff]   ;;  %s5865_s9 = sshll.u32 %s7056_s3, 4  ;;  %s5437_s3 = scalar_lea.sflag [#allocation8], %s836_s11 }
 0x74a   : > { %v8018_v30 = vpop.permute.xlu0 %6260 }
 0x74b   : > { %v6263_v63 = vunpack.i.h.bf16 %v8018_v30  ;;  %v6262_v0 = vunpack.i.l.bf16 %v8018_v30 }
 0x74d   : > { %v2963_v36 = vsel %vm1515_vm10, %v2851_v43, %v6262_v0  ;;  %v2964_v42 = vsel %vm1515_vm10, %v2853_v28, %v6263_v63 }
 0x74e   : > { %v2972_v5 = vpack.c.bf16 %v2964_v42, %v2963_v36  ;;  %v6610_v42 = vld [vmem:[%s8920_s7 + $0x1d0] ss:$8 sps:$4 sm:$0xff]  }
 0x750   : > { %3390 = vmatprep.mubr.bf16.mxu0 %v2972_v5 }
 0x751   : > { %3391 = vmatmul.mubr.bf16.vlgmr.msra.gmra.mrb[36].mxu0 %v2971_v8 }
 0x752   : > { %3412 = vmatpush1.bf16.msra.mxu0 %v6571_v3 }
 0x753   : > { %v8038_v19 = vpop.permute.xlu0 %6270  ;;  %3413 = vmatprep.subr.bf16.mxu0 %v6576_v18 }
 0x754   : > { %v8043_v55 = vpop.permute.xlu1 %6265  ;;  %v6273_v53 = vunpack.i.h.bf16 %v8038_v19  ;;  %v6272_v62 = vunpack.i.l.bf16 %v8038_v19 }
 0x755   : > { %v6268_v47 = vunpack.i.h.bf16 %v8043_v55  ;;  %v6267_v16 = vunpack.i.l.bf16 %v8043_v55  ;;  %v6615_v55 = vld [vmem:[%s8857_s18 + $0x10] sm:$0xff]  }
 0x756   : > { %3414 = vmatpush1.bf16.msra.mxu0 %v6574_v51  ;;  %v2904_v3 = vsel %vm1515_vm10, %v6262_v0, %v6272_v62  ;;  %v2905_v5 = vsel %vm1515_vm10, %v6263_v63, %v6273_v53 }
 0x757   : > { %v8050_v28 = vpop.permute.xlu0 %6280  ;;  %v2965_v13 = vsel %vm1515_vm10, %v7998_v31, %v6267_v16  ;;  %v2966_v29 = vsel %vm1515_vm10, %v2857_v20, %v6268_v47  ;;  %3415 = vmatprep.subr.bf16.mxu0 %v6579_v52 }
 0x758   : > { %v8062_v54 = vpop.permute.xlu1 %6275  ;;  %v6283_v32 = vunpack.i.h.bf16 %v8050_v28  ;;  %v6282_v33 = vunpack.i.l.bf16 %v8050_v28  ;;  %v2976_v57 = vpack.c.bf16 %v2966_v29, %v2965_v13 }
 0x759   : > { %v6278_v7 = vunpack.i.h.bf16 %v8062_v54  ;;  %v6277_v31 = vunpack.i.l.bf16 %v8062_v54  ;;  %v6613_v54 = vld [vmem:[%s8857_s18] sm:$0xff]  }
 0x75a   : > { %v2952_v35 = vsel %vm2950_vm14, %v6282_v33, %v6283_v32  ;;  %3400 = vmatprep.mubr.bf16.mxu0 %v2976_v57  ;;  %3416 = vmatpush1.bf16.msra.mxu0 %v6577_v22  ;;  %v2968_v19 = vsel %vm2950_vm14, %v2905_v5, %v6282_v33  ;;  %v6614_v32 = vld [vmem:[%s8857_s18 + $0x8] sm:$0xff]   ;;  %v3039_v57 = vld [vmem:[%s8922_s12] sm:$0x3] }
 0x75b   : > { %v2951_v44 = vsel %vm2950_vm14, %v6277_v31, %v6278_v7  ;;  %3401 = vmatmul.mubr.bf16.gmra.mrb[40].mxu0 %v2975_v34  ;;  %3417 = vmatprep.subr.bf16.mxu0 %v6582_v58  ;;  %v6291_v43 = vpop.permute.xlu0 %6290  ;;  %v2967_v51 = vsel %vm2950_vm14, %v2904_v3, %v6277_v31  ;;  %v6618_v33 = vld [vmem:[%s8857_s18 + $0x28] sm:$0xff]   ;;  %v3044_v7 = vrot.slane %v3039_v57, %v7307_v4 }
 0x75c   : > { %v2974_v45 = vpack.c.bf16 %v2952_v35, %v2951_v44  ;;  %v6286_v59 = vpop.permute.xlu1 %6285  ;;  %v6293_v8 = vunpack.i.h.bf16 %v6291_v43  ;;  %v6292_v18 = vunpack.i.l.bf16 %v6291_v43  ;;  %v2973_v20 = vpack.c.bf16 %v2968_v19, %v2967_v51  ;;  %3637 = vmatpush1.bf16.msra.mxu1 %v6613_v54 }
 0x75d   : > { %v6288_v0 = vunpack.i.h.bf16 %v6286_v59  ;;  %v6287_v22 = vunpack.i.l.bf16 %v6286_v59  ;;  %3638 = vmatprep.subr.bf16.mxu1 %v6878_v41  ;;  %v3048_v31 = vrot.slane %v3039_v57, %v7312_v6 }
 0x75e   : > { %5703 = vmatprep.mubr.msk.bf16.mxu0 %vm3351_vm15, %v2974_v45  ;;  %3418 = vmatpush1.bf16.msra.mxu0 %v6580_v14  ;;  %v2953_v30 = vsel %vm2950_vm14, %v6292_v18, %v6293_v8  ;;  %v6620_v8 = vld [vmem:[%s8857_s18 + $0x38] sm:$0xff]  }
 0x75f   : > { %3419 = vmatprep.subr.bf16.mxu0 %v6585_v61  ;;  %v2907_v11 = vsel %vm1515_vm10, %v6268_v47, %v6288_v0  ;;  %v2906_v28 = vsel %vm1515_vm10, %v6267_v16, %v6287_v22  ;;  %v6616_v47 = vld [vmem:[%s8857_s18 + $0x18] sm:$0xff]   ;;  %v6617_v16 = vld [vmem:[%s8857_s18 + $0x20] sm:$0xff]  }
 0x760   : > { %v6296_v60 = vpop.permute.xlu1 %6295  ;;  %v2969_v29 = vsel %vm2950_vm14, %v2906_v28, %v6292_v18  ;;  %3639 = vmatpush1.bf16.msra.mxu1 %v6614_v32 }
 0x761   : > { %v6298_v2 = vunpack.i.h.bf16 %v6296_v60  ;;  %v6297_v36 = vunpack.i.l.bf16 %v6296_v60  ;;  %3640 = vmatprep.subr.bf16.mxu1 %v6878_v41 }
 0x762   : > { %3420 = vmatpush1.bf16.msra.mxu0 %v6583_v46 }
 0x763   : > { %3421 = vmatprep.subr.bf16.mxu0 %v6588_v48  ;;  %v2954_v52 = vsel %vm2950_vm14, %v6297_v36, %v6298_v2  ;;  %v2970_v13 = vsel %vm2950_vm14, %v2907_v11, %v6297_v36 }
 0x764   : > { %v2978_v63 = vpack.c.bf16 %v2954_v52, %v2953_v30  ;;  %v2977_v58 = vpack.c.bf16 %v2970_v13, %v2969_v29  ;;  %3641 = vmatpush1.bf16.msra.mxu1 %v6615_v55  ;;  %v6621_v30 = vld [vmem:[%s8857_s18 + $0x40] sm:$0xff]  }
 0x765   : > { %3642 = vmatprep.subr.bf16.mxu1 %v6878_v41 }
 0x766   : > { %3422 = vmatpush1.bf16.msra.mxu0 %v6586_v49 }
 0x767   : > { %3423 = vmatprep.subr.bf16.mxu0 %v6591_v27 }
 0x768   : > { %3643 = vmatpush1.bf16.msra.mxu1 %v6616_v47 }
 0x769   : > { %3644 = vmatprep.subr.bf16.mxu1 %v6878_v41 }
 0x76a   : > { %3424 = vmatpush1.bf16.msra.mxu0 %v6589_v24 }
 0x76b   : > { %3425 = vmatprep.subr.bf16.mxu0 %v6594_v21  ;;  %v6619_v21 = vld [vmem:[%s8857_s18 + $0x30] sm:$0xff]  }
 0x76c   : > { %3645 = vmatpush1.bf16.msra.mxu1 %v6617_v16 }
 0x76d   : > { %3646 = vmatprep.subr.bf16.mxu1 %v6878_v41 }
 0x76e   : > { %3426 = vmatpush1.bf16.msra.mxu0 %v6592_v50 }
 0x76f   : > { %3427 = vmatprep.subr.bf16.mxu0 %v6597_v1 }
 0x770   : > { %3647 = vmatpush1.bf16.msra.mxu1 %v6618_v33 }
 0x771   : > { %3648 = vmatprep.subr.bf16.mxu1 %v6878_v41 }
 0x772   : > { %3428 = vmatpush1.bf16.msra.mxu0 %v6595_v25 }
 0x773   : > { %3429 = vmatprep.subr.bf16.mxu0 %v6600_v15 }
 0x774   : > { %3649 = vmatpush1.bf16.msra.mxu1 %v6619_v21 }
 0x775   : > { %3650 = vmatprep.subr.bf16.mxu1 %v6878_v41 }
 0x776   : > { %3430 = vmatpush1.bf16.msra.mxu0 %v6598_v9 }
 0x777   : > { %3431 = vmatprep.subr.bf16.mxu0 %v6603_v56 }
 0x778   : > { %3651 = vmatpush1.bf16.msra.mxu1 %v6620_v8 }
 0x779   : > { %3652 = vmatprep.subr.bf16.mxu1 %v6878_v41 }
 0x77a   : > { %3432 = vmatpush1.bf16.msra.mxu0 %v6601_v17 }
 0x77b   : > { %3433 = vmatprep.subr.bf16.mxu0 %v6606_v10 }
 0x77c   : > { %3653 = vmatpush1.bf16.msra.mxu1 %v6621_v30 }
 0x77e   : > { %3434 = vmatpush1.bf16.msra.mxu0 %v6604_v12 }
 0x77f   : > { %3435 = vmatprep.subr.bf16.mxu0 %v6609_v26 }
 0x782   : > { %3436 = vmatpush1.bf16.msra.mxu0 %v6607_v23 }
 0x783   : > { %3437 = vmatprep.subr.bf16.mxu0 %v6612_v39 }
 0x786   : > { %3438 = vmatpush1.bf16.msra.mxu0 %v6610_v42 }
 0x789   : > { %3444 = vmatmul.mubr.bf16.vlgmr.msra.gmra.mrb[36].mxu0 %v2973_v20 }
 0x78a   : > { %5704 = vmatprep.mubr.msk.bf16.mxu0 %vm3351_vm15, %v2978_v63 }
 0x791   : > { %3454 = vmatmul.mubr.bf16.gmra.mrb[40].mxu0 %v2977_v58 }
 0x85c   : > { %v3445_v34 = vpop.f32.mrb[36].mxu0 }
 0x85d   : > { %v5986_v35 = vadd.f32 %v3445_v34, %v3044_v7  ;;  %v3447_v14 = vpop.f32.mrb[37].mxu0 }
 0x85e   : > { %v5987_v44 = vadd.f32 %v3447_v14, %v3048_v31  ;;  %v3449_v61 = vpop.f32.mrb[38].mxu0 }
 0x85f   : > { %v3464_v45 = vmax.f32 %v5986_v35, 0.0  ;;  %v5988_v46 = vadd.f32 %v3449_v61, %v3044_v7  ;;  %v3451_v48 = vpop.f32.mrb[39].mxu0 }
 0x860   : > { %v3465_v49 = vmax.f32 %v5987_v44, 0.0  ;;  %v5989_v27 = vadd.f32 %v3451_v48, %v3048_v31 }
 0x861   : > { %v3466_v24 = vmax.f32 %v5988_v46, 0.0  ;;  %v3480_v1 = vrot.slane %v3464_v45, 1 }
 0x862   : > { %v3467_v50 = vmax.f32 %v5989_v27, 0.0  ;;  %v3483_v15 = vrot.slane %v3465_v49, 1 }
 0x863   : > { %v3481_v25 = vrot.slane %v3466_v24, 1 }
 0x864   : > { %v3484_v9 = vrot.slane %v3467_v50, 1  ;;  %v3455_v56 = vpop.f32.mrb[40].mxu0 }
 0x865   : > { %v5990_v17 = vadd.f32 %v3455_v56, %v3044_v7  ;;  %v3457_v10 = vpop.f32.mrb[41].mxu0  ;;  %v3482_v59 = vsel %vm1380_vm7, %v3480_v1, %v3481_v25 }
 0x866   : > { %v5991_v12 = vadd.f32 %v3457_v10, %v3048_v31  ;;  %v3459_v26 = vpop.f32.mrb[42].mxu0  ;;  %v3485_v60 = vsel %vm1380_vm7, %v3483_v15, %v3484_v9  ;;  %v3502_v23 = vmax.f32 %v3464_v45, %v3482_v59 }
 0x867   : > { %v3468_v53 = vmax.f32 %v5990_v17, 0.0  ;;  %v5992_v62 = vadd.f32 %v3459_v26, %v3044_v7  ;;  %v3461_v39 = vpop.f32.mrb[43].mxu0  ;;  %v3503_v43 = vmax.f32 %v3465_v49, %v3485_v60  ;;  %v6622_v60 = vld [vmem:[%s8858_s19] sm:$0xff]  }
 0x868   : > { %v3469_v2 = vmax.f32 %v5991_v12, 0.0  ;;  %v5993_v36 = vadd.f32 %v3461_v39, %v3048_v31 }
 0x869   : > { %v3486_v42 = vrot.slane %v3468_v53, 1  ;;  %v3470_v3 = vmax.f32 %v5992_v62, 0.0  ;;  %v6299_v5 = vpack.i.bf16 %v3503_v43, %v3502_v23 }
 0x86a   : > { %v3488_v18 = vrot.slane %v3469_v2, 1  ;;  %v3471_v51 = vmax.f32 %v5993_v36, 0.0 }
 0x86b   : > { %v3490_v19 = vrot.slane %v3470_v3, 1  ;;  %6300 = vrot.lane.b32.xlu0 %v6299_v5, %s6886_s10  ;;  %v3487_v52 = vsel %vm1380_vm7, %v3481_v25, %v3486_v42 }
 0x86c   : > { %v3492_v20 = vrot.slane %v3471_v51, 1  ;;  %v3489_v0 = vsel %vm1380_vm7, %v3484_v9, %v3488_v18  ;;  %v3504_v22 = vmax.f32 %v3466_v24, %v3487_v52 }
 0x86d   : > { %v3505_v63 = vmax.f32 %v3467_v50, %v3489_v0  ;;  %v3491_v11 = vsel %vm1380_vm7, %v3486_v42, %v3490_v19  ;;  %v3508_v29 = vmax.f32 %v3470_v3, %v3490_v19  ;;  %v6623_v19 = vld [vmem:[%s8858_s19 + $0x8] ss:$0 sps:$4 sm:$0x11]  }
 0x86e   : > { %v3493_v28 = vsel %vm1380_vm7, %v3488_v18, %v3492_v20  ;;  %v3506_v13 = vmax.f32 %v3468_v53, %v3491_v11  ;;  %v3509_v58 = vmax.f32 %v3471_v51, %v3492_v20 }
 0x86f   : > { %v6304_v54 = vpack.i.bf16 %v3505_v63, %v3504_v22  ;;  %v3507_v32 = vmax.f32 %v3469_v2, %v3493_v28  ;;  %v3705_v2 = vsel %vm1460_vm8, 4294967295, %v6883_v40  ;;  %v6624_v40 = vld [vmem:[%s8923_s8] ss:$8 sps:$4 sm:$0xff]  }
 0x870   : > { %v6314_v47 = vpack.i.bf16 %v3509_v58, %v3508_v29  ;;  %v3706_v5 = vsel %vm1380_vm7, %v3705_v2, 0 }
 0x871   : > { %6305 = vrot.lane.b32.xlu1 %v6304_v54, %s6886_s10  ;;  %v6309_v55 = vpack.i.bf16 %v3507_v32, %v3506_v13 }
 0x873   : > { %6310 = vrot.lane.b32.xlu0 %v6309_v55, %s6886_s10 }
 0x875   : > { %6315 = vrot.lane.b32.xlu1 %v6314_v47, %s6886_s10  ;;  %s8924_s10 = smov %s8923_s8  ;;  %s8886_s8 = smov 96  }
 0x876   : > { %v6626_v52 = vld [vmem:[%s8924_s10 + $0x4] ss:$8 sps:$4 sm:$0xff]   ;;  %v6629_v20 = vld [vmem:[%s8924_s10 + $0x14] ss:$8 sps:$4 sm:$0xff]   ;;  %v6627_v0 = vld [vmem:[%s8924_s10 + $0x10] ss:$8 sps:$4 sm:$0xff]  }
 0x877   : > { %v6630_v30 = vld [vmem:[%s8924_s10 + $0x20] ss:$8 sps:$4 sm:$0xff]   ;;  %v6633_v11 = vld [vmem:[%s8924_s10 + $0x30] ss:$8 sps:$4 sm:$0xff]   ;;  %v6638_v28 = vld [vmem:[%s8924_s10 + $0x44] ss:$8 sps:$4 sm:$0xff]  }
 0x878   : > { %v6644_v54 = vld [vmem:[%s8924_s10 + $0x64] ss:$8 sps:$4 sm:$0xff]   ;;  %v6647_v55 = vld [vmem:[%s8924_s10 + $0x74] ss:$8 sps:$4 sm:$0xff]   ;;  %v6645_v47 = vld [vmem:[%s8924_s10 + $0x70] ss:$8 sps:$4 sm:$0xff]  }
 0x8dd   : > { %v6301_v16 = vpop.permute.xlu0 %6300 }
 0x8de   : > { %v6303_v33 = vunpack.i.h.bf16 %v6301_v16  ;;  %v6302_v57 = vunpack.i.l.bf16 %v6301_v16  ;;  %v6650_v16 = vld [vmem:[%s8924_s10 + $0x84] ss:$8 sps:$4 sm:$0xff]  }
 0x8e0   : > { %v3534_v31 = vsel %vm2710_vm9, %v6302_v57, %v6303_v33  ;;  %v3547_v44 = vmax.f32 %v3503_v43, %v6303_v33  ;;  %v6648_v33 = vld [vmem:[%s8924_s10 + $0x80] ss:$8 sps:$4 sm:$0xff]   ;;  %v6653_v57 = vld [vmem:[%s8924_s10 + $0x94] ss:$8 sps:$4 sm:$0xff]  }
 0x8e1   : > { %v3546_v48 = vmax.f32 %v3502_v23, %v3534_v31  ;;  %v6656_v31 = vld [vmem:[%s8924_s10 + $0xa4] ss:$8 sps:$4 sm:$0xff]  }
 0x8e3   : > { %v6306_v7 = vpop.permute.xlu1 %6305 }
 0x8e4   : > { %v6308_v34 = vunpack.i.h.bf16 %v6306_v7  ;;  %v6307_v35 = vunpack.i.l.bf16 %v6306_v7  ;;  %v6651_v7 = vld [vmem:[%s8924_s10 + $0x90] ss:$8 sps:$4 sm:$0xff]  }
 0x8e5   : > { %v6311_v14 = vpop.permute.xlu0 %6310 }
 0x8e6   : > { %v3549_v61 = vmax.f32 %v3505_v63, %v6308_v34  ;;  %v3535_v45 = vsel %vm2710_vm9, %v6307_v35, %v6308_v34  ;;  %v6313_v46 = vunpack.i.h.bf16 %v6311_v14  ;;  %v6312_v21 = vunpack.i.l.bf16 %v6311_v14  ;;  %v6635_v63 = vld [vmem:[%s8924_s10 + $0x34] ss:$8 sps:$4 sm:$0xff]   ;;  %v6654_v34 = vld [vmem:[%s8924_s10 + $0xa0] ss:$8 sps:$4 sm:$0xff]   ;;  %v6657_v14 = vld [vmem:[%s8924_s10 + $0xb0] ss:$8 sps:$4 sm:$0xff]  }
 0x8e7   : > { %v3548_v49 = vmax.f32 %v3504_v22, %v3535_v45  ;;  %v6316_v27 = vpop.permute.xlu1 %6315  ;;  %v6632_v22 = vld [vmem:[%s8924_s10 + $0x24] ss:$8 sps:$4 sm:$0xff]   ;;  %v6659_v35 = vld [vmem:[%s8924_s10 + $0xb4] ss:$8 sps:$4 sm:$0xff]  }
 0x8e8   : > { %v3555_v24 = vpack.c.bf16 %v3549_v61, %v3547_v44  ;;  %v6318_v50 = vunpack.i.h.bf16 %v6316_v27  ;;  %v6317_v25 = vunpack.i.l.bf16 %v6316_v27  ;;  %v3551_v15 = vmax.f32 %v3507_v32, %v6313_v46  ;;  %v6642_v32 = vld [vmem:[%s8924_s10 + $0x60] ss:$8 sps:$4 sm:$0xff]   ;;  %v6662_v44 = vld [vmem:[%s8924_s10 + $0xc4] ss:$8 sps:$4 sm:$0xff]   ;;  %v6665_v45 = vld [vmem:[%s8924_s10 + $0xd4] ss:$8 sps:$4 sm:$0xff]  }
 0x8e9   : > { %v3554_v1 = vpack.c.bf16 %v3548_v49, %v3546_v48  ;;  %v3536_v17 = vsel %vm2710_vm9, %v6312_v21, %v6313_v46  ;;  %v6660_v61 = vld [vmem:[%s8924_s10 + $0xc0] ss:$8 sps:$4 sm:$0xff]   ;;  %v6663_v46 = vld [vmem:[%s8924_s10 + $0xd0] ss:$8 sps:$4 sm:$0xff]   ;;  %v6668_v48 = vld [vmem:[%s8924_s10 + $0xe4] ss:$8 sps:$4 sm:$0xff]  }
 0x8ea   : > { %v3553_v9 = vmax.f32 %v3509_v58, %v6318_v50  ;;  %5714 = vmatprep.mubr.msk.bf16.mxu1 %vm1331_vm6, %v3555_v24  ;;  %v3537_v56 = vsel %vm2710_vm9, %v6317_v25, %v6318_v50  ;;  %v3550_v12 = vmax.f32 %v3506_v13, %v3536_v17  ;;  %v6636_v13 = vld [vmem:[%s8924_s10 + $0x40] ss:$8 sps:$4 sm:$0xff]   ;;  %v6639_v58 = vld [vmem:[%s8924_s10 + $0x50] ss:$8 sps:$4 sm:$0xff]   ;;  %v6671_v25 = vld [vmem:[%s8924_s10 + $0xf4] ss:$8 sps:$4 sm:$0xff]  }
 0x8eb   : > { %3669 = vmatmul.mubr.bf16.vlgmr.msra.gmra.mrb[24].mxu1 %v3554_v1  ;;  %v3552_v59 = vmax.f32 %v3508_v29, %v3537_v56  ;;  %v6641_v29 = vld [vmem:[%s8924_s10 + $0x54] ss:$8 sps:$4 sm:$0xff]   ;;  %v6666_v49 = vld [vmem:[%s8924_s10 + $0xe0] ss:$8 sps:$4 sm:$0xff]   ;;  %v6669_v1 = vld [vmem:[%s8924_s10 + $0xf0] ss:$8 sps:$4 sm:$0xff]  }
 0x8ec   : > { %v3557_v10 = vpack.c.bf16 %v3553_v9, %v3551_v15  ;;  %v6674_v9 = vld [vmem:[%s8924_s10 + $0x104] ss:$8 sps:$4 sm:$0xff]  }
 0x8ed   : > { %v3556_v26 = vpack.c.bf16 %v3552_v59, %v3550_v12 }
 0x8ee   : > { %5715 = vmatprep.mubr.msk.bf16.mxu1 %vm1331_vm6, %v3557_v10  ;;  %vm863_vm6 = vcmask 778240  }
 0x8ef   : > { %864 = vst.msk [vmem:[#allocation5] sm:$0x1] %vm863_vm6, %v6879_v38  ;;  %865 = vst.msk [vmem:[#allocation5 + $0x13] sm:$0x1] %vm863_vm6, %v6879_v38 }
 0x8f3   : > { %3677 = vmatmul.mubr.bf16.gmra.mrb[28].mxu1 %v3556_v26 }
 0x8f4   : > { %5916 = vmatprep.mubr.msk.bf16.mxu1 %vm3698_vm1, %v6622_v60 }
 0x9be   : > { %v3670_v23 = vpop.f32.mrb[24].mxu1 }
 0x9bf   : > { %v3672_v53 = vpop.f32.mrb[25].mxu1 }
 0x9c0   : > { %v3673_v62 = vpop.f32.mrb[26].mxu1  ;;  %v4149_v53 = vld [vmem:[%s8854_s15] sm:$0xff] }
 0x9c1   : > { %v3688_v39 = vpack.c.bf16 %v3673_v62, %v3670_v23  ;;  %v3675_v43 = vpop.f32.mrb[27].mxu1  ;;  %v4150_v23 = vld [vmem:[%s8854_s15 + $0x8] sm:$0xff]  ;;  %v4151_v62 = vld [vmem:[%s8854_s15 + $0x10] sm:$0x3] }
 0x9c3   : > { %5912 = vmatprep.subr.bf16.mxu1 %v3688_v39 }
 0x9c4   : > { %5913 = vmatpush3.bf16.msra.mxu1 %v3688_v39 }
 0x9c6   : > { %v3678_v36 = vpop.f32.mrb[28].mxu1 }
 0x9c7   : > { %v3680_v42 = vpop.f32.mrb[29].mxu1 }
 0x9c8   : > { %v3681_v3 = vpop.f32.mrb[30].mxu1 }
 0x9c9   : > { %v3689_v8 = vpack.c.bf16 %v3681_v3, %v3678_v36  ;;  %v3683_v18 = vpop.f32.mrb[31].mxu1 }
 0x9cb   : > { %v3708_v51 = vand.u32 %v3706_v5, %v3689_v8 }
 0x9cd   : > { %5914 = vmatprep.subr.bf16.mxu1 %v3708_v51 }
 0x9ce   : > { %5915 = vmatpush3.bf16.msra.mxu1 %v3708_v51 }
 0x9cf   : > { %4041 = vmatprep.subr.bf16.mxu1 %v6626_v52 }
 0x9d1   : > { %5917 = vmatmul.mubr.msk.bf16.vlgmr.msra.gmra.mrb[32].mxu1 %vm3698_vm1, %v6623_v19 }
 0x9d2   : > { %4042 = vmatpush1.bf16.msra.mxu1 %v6624_v40 }
 0x9d3   : > { %4043 = vmatprep.subr.bf16.mxu1 %v6629_v20 }
 0x9d6   : > { %4044 = vmatpush1.bf16.msra.mxu1 %v6627_v0 }
 0x9d7   : > { %4045 = vmatprep.subr.bf16.mxu1 %v6632_v22 }
 0x9da   : > { %4046 = vmatpush1.bf16.msra.mxu1 %v6630_v30 }
 0x9db   : > { %4047 = vmatprep.subr.bf16.mxu1 %v6635_v63  ;;  %v6672_v63 = vld [vmem:[%s8924_s10 + $0x100] ss:$8 sps:$4 sm:$0xff]  }
 0x9de   : > { %4048 = vmatpush1.bf16.msra.mxu1 %v6633_v11 }
 0x9df   : > { %4049 = vmatprep.subr.bf16.mxu1 %v6638_v28  ;;  %v6677_v28 = vld [vmem:[%s8924_s10 + $0x114] ss:$8 sps:$4 sm:$0xff]  }
 0x9e2   : > { %4050 = vmatpush1.bf16.msra.mxu1 %v6636_v13  ;;  %v6675_v13 = vld [vmem:[%s8924_s10 + $0x110] ss:$8 sps:$4 sm:$0xff]  }
 0x9e3   : > { %4051 = vmatprep.subr.bf16.mxu1 %v6641_v29 }
 0x9e6   : > { %4052 = vmatpush1.bf16.msra.mxu1 %v6639_v58 }
 0x9e7   : > { %4053 = vmatprep.subr.bf16.mxu1 %v6644_v54 }
 0x9ea   : > { %4054 = vmatpush1.bf16.msra.mxu1 %v6642_v32 }
 0x9eb   : > { %4055 = vmatprep.subr.bf16.mxu1 %v6647_v55 }
 0x9ee   : > { %4056 = vmatpush1.bf16.msra.mxu1 %v6645_v47  ;;  %v6678_v47 = vld [vmem:[%s8926_s0] ss:$8 sps:$4 sm:$0xff]  }
 0x9ef   : > { %4057 = vmatprep.subr.bf16.mxu1 %v6650_v16  ;;  %v6680_v16 = vld [vmem:[%s8926_s0 + $0x4] ss:$8 sps:$4 sm:$0xff]  }
 0x9f0   : > { %4737 = vmatprep.subr.bf16.mxu0 %v6680_v16 }
 0x9f1   : > { %4738 = vmatpush1.bf16.msra.mxu0 %v6678_v47 }
 0x9f2   : > { %4058 = vmatpush1.bf16.msra.mxu1 %v6648_v33  ;;  %v6683_v33 = vld [vmem:[%s8926_s0 + $0x14] ss:$8 sps:$4 sm:$0xff]  }
 0x9f3   : > { %4059 = vmatprep.subr.bf16.mxu1 %v6653_v57  ;;  %4739 = vmatprep.subr.bf16.mxu0 %v6683_v33  ;;  %v6686_v57 = vld [vmem:[%s8926_s0 + $0x24] ss:$8 sps:$4 sm:$0xff]  }
 0x9f5   : > { %4740 = vmatpush1.bf16.msra.mxu0 %v6681_v37 }
 0x9f6   : > { %4060 = vmatpush1.bf16.msra.mxu1 %v6651_v7  ;;  %v6684_v7 = vld [vmem:[%s8926_s0 + $0x20] ss:$8 sps:$4 sm:$0xff]   ;;  %4741 = vmatprep.subr.bf16.mxu0 %v6686_v57 }
 0x9f7   : > { %4061 = vmatprep.subr.bf16.mxu1 %v6656_v31  ;;  %v6689_v31 = vld [vmem:[%s8926_s0 + $0x34] ss:$8 sps:$4 sm:$0xff]  }
 0x9f9   : > { %4742 = vmatpush1.bf16.msra.mxu0 %v6684_v7 }
 0x9fa   : > { %4062 = vmatpush1.bf16.msra.mxu1 %v6654_v34  ;;  %v6687_v34 = vld [vmem:[%s8926_s0 + $0x30] ss:$8 sps:$4 sm:$0xff]   ;;  %4743 = vmatprep.subr.bf16.mxu0 %v6689_v31 }
 0x9fb   : > { %4063 = vmatprep.subr.bf16.mxu1 %v6659_v35  ;;  %v6692_v35 = vld [vmem:[%s8926_s0 + $0x44] ss:$8 sps:$4 sm:$0xff]  }
 0x9fd   : > { %4744 = vmatpush1.bf16.msra.mxu0 %v6687_v34 }
 0x9fe   : > { %4064 = vmatpush1.bf16.msra.mxu1 %v6657_v14  ;;  %v6690_v14 = vld [vmem:[%s8926_s0 + $0x40] ss:$8 sps:$4 sm:$0xff]   ;;  %4745 = vmatprep.subr.bf16.mxu0 %v6692_v35 }
 0x9ff   : > { %4065 = vmatprep.subr.bf16.mxu1 %v6662_v44  ;;  %v6695_v44 = vld [vmem:[%s8926_s0 + $0x54] ss:$8 sps:$4 sm:$0xff]   ;;  %v6720_v35 = vld [vmem:[%s8926_s0 + $0xe0] ss:$8 sps:$4 sm:$0xff]  }
 0xa01   : > { %4746 = vmatpush1.bf16.msra.mxu0 %v6690_v14 }
 0xa02   : > { %4066 = vmatpush1.bf16.msra.mxu1 %v6660_v61  ;;  %v6693_v61 = vld [vmem:[%s8926_s0 + $0x50] ss:$8 sps:$4 sm:$0xff]   ;;  %4747 = vmatprep.subr.bf16.mxu0 %v6695_v44  ;;  %v6722_v44 = vld [vmem:[%s8926_s0 + $0xe4] ss:$8 sps:$4 sm:$0xff]  }
 0xa03   : > { %4067 = vmatprep.subr.bf16.mxu1 %v6665_v45  ;;  %v6698_v45 = vld [vmem:[%s8926_s0 + $0x64] ss:$8 sps:$4 sm:$0xff]  }
 0xa05   : > { %4748 = vmatpush1.bf16.msra.mxu0 %v6693_v61 }
 0xa06   : > { %4068 = vmatpush1.bf16.msra.mxu1 %v6663_v46  ;;  %v6696_v46 = vld [vmem:[%s8926_s0 + $0x60] ss:$8 sps:$4 sm:$0xff]   ;;  %4749 = vmatprep.subr.bf16.mxu0 %v6698_v45  ;;  %v6723_v45 = vld [vmem:[%s8926_s0 + $0xf0] ss:$8 sps:$4 sm:$0xff]  }
 0xa07   : > { %4069 = vmatprep.subr.bf16.mxu1 %v6668_v48  ;;  %v6701_v48 = vld [vmem:[%s8926_s0 + $0x74] ss:$8 sps:$4 sm:$0xff]  }
 0xa09   : > { %4750 = vmatpush1.bf16.msra.mxu0 %v6696_v46  ;;  %v6725_v46 = vld [vmem:[%s8926_s0 + $0xf4] ss:$8 sps:$4 sm:$0xff]  }
 0xa0a   : > { %4070 = vmatpush1.bf16.msra.mxu1 %v6666_v49  ;;  %v6699_v49 = vld [vmem:[%s8926_s0 + $0x70] ss:$8 sps:$4 sm:$0xff]   ;;  %4751 = vmatprep.subr.bf16.mxu0 %v6701_v48 }
 0xa0b   : > { %4071 = vmatprep.subr.bf16.mxu1 %v6671_v25  ;;  %v6708_v25 = vld [vmem:[%s8926_s0 + $0xa0] ss:$8 sps:$4 sm:$0xff]  }
 0xa0d   : > { %4752 = vmatpush1.bf16.msra.mxu0 %v6699_v49 }
 0xa0e   : > { %4072 = vmatpush1.bf16.msra.mxu1 %v6669_v1  ;;  %v6710_v1 = vld [vmem:[%s8926_s0 + $0xa4] ss:$8 sps:$4 sm:$0xff]  }
 0xa0f   : > { %4092 = vmatprep.subr.bf16.mxu1 %v6674_v9  ;;  %v6711_v9 = vld [vmem:[%s8926_s0 + $0xb0] ss:$8 sps:$4 sm:$0xff]  }
 0xaa4   : > { %v5918_v27 = vpop.f32.mrb[32].mxu1 }
 0xaa5   : > { %3761 = vst.msk [vmem:[#allocation5 + $0x11] sm:$0x3] %vm3760_vm2, %v5918_v27  ;;  %v3744_v24 = vpop.f32.mrb[33].mxu1  ;;  %v6704_v27 = vld [vmem:[%s8926_s0 + $0x84] ss:$8 sps:$4 sm:$0xff]  }
 0xaa6   : > { %3758 = vst.msk [vmem:[#allocation5 + $0x1] sm:$0xff] %vm3351_vm15, %v3744_v24  ;;  %v5919_v21 = vpop.f32.mrb[34].mxu1  ;;  %v6702_v24 = vld [vmem:[%s8926_s0 + $0x80] ss:$8 sps:$4 sm:$0xff]   ;;  %4753 = vmatprep.subr.bf16.mxu0 %v6704_v27 }
 0xaa7   : > { %v3747_v50 = vpop.f32.mrb[35].mxu1  ;;  %v6707_v21 = vld [vmem:[%s8926_s0 + $0x94] ss:$8 sps:$4 sm:$0xff]   ;;  %4754 = vmatpush1.bf16.msra.mxu0 %v6702_v24 }
 0xaa8   : > { %3759 = vst.msk [vmem:[#allocation5 + $0x9] sm:$0xff] %vm3351_vm15, %v3747_v50  ;;  %v6705_v50 = vld [vmem:[%s8926_s0 + $0x90] ss:$8 sps:$4 sm:$0xff]   ;;  %4755 = vmatprep.subr.bf16.mxu0 %v6707_v21  ;;  %v6728_v21 = vld [vmem:[%s8926_s0 + $0x104] ss:$8 sps:$4 sm:$0xff]  }
 0xaab   : > { %4756 = vmatpush1.bf16.msra.mxu0 %v6705_v50 }
 0xaac   : > { %v3770_v26 = vld [vmem:[#allocation5 + $0x12] sm:$0x3]  ;;  %4757 = vmatprep.subr.bf16.mxu0 %v6710_v1 }
 0xaad   : > { %v3765_v15 = vld [vmem:[#allocation5 + $0x1] sm:$0xff]  ;;  %v3767_v60 = vld [vmem:[#allocation5 + $0x11] sm:$0x3] }
 0xaae   : > { %v3762_v5 = vld [vmem:[#allocation5] sm:$0xff] }
 0xaaf   : > { %v3768_v56 = vld [vmem:[#allocation5 + $0x2] sm:$0xff]  ;;  %v3769_v17 = vld [vmem:[#allocation5 + $0xa] sm:$0xff]  ;;  %4758 = vmatpush1.bf16.msra.mxu0 %v6708_v25 }
 0xab0   : > { %v3766_v10 = vld [vmem:[#allocation5 + $0x9] sm:$0xff]  ;;  %v6324_v59 = vpack.i.bf16 %v3769_v17, %v3768_v56  ;;  %v6716_v56 = vld [vmem:[%s8926_s0 + $0xc4] ss:$8 sps:$4 sm:$0xff]  }
 0xab1   : > { %v6319_v12 = vpack.i.bf16 %v3766_v10, %v3765_v15  ;;  %v3763_v8 = vld [vmem:[#allocation5 + $0x8] sm:$0xff]  ;;  %v3764_v29 = vld [vmem:[#allocation5 + $0x10] sm:$0x3] }
 0xab2   : > { %6325 = vrot.lane.b32.xlu1 %v6324_v59, %s8925_s27  ;;  %v6713_v15 = vld [vmem:[%s8926_s0 + $0xb4] ss:$8 sps:$4 sm:$0xff]   ;;  %v6714_v17 = vld [vmem:[%s8926_s0 + $0xc0] ss:$8 sps:$4 sm:$0xff]   ;;  %v6717_v59 = vld [vmem:[%s8926_s0 + $0xd0] ss:$8 sps:$4 sm:$0xff]  }
 0xab3   : > { %6320 = vrot.lane.b32.xlu0 %v6319_v12, %s8886_s8  ;;  %4759 = vmatprep.subr.bf16.mxu0 %v6713_v15  ;;  %v6719_v10 = vld [vmem:[%s8926_s0 + $0xd4] ss:$8 sps:$4 sm:$0xff]   ;;  %v3843_v12 = vld [vmem:[%s8927_s1] sm:$0x3]  ;;  %s8929_s1 = smov 96  }
 0xab4   : > { %4760 = vmatpush1.bf16.msra.mxu0 %v6711_v9 }
 0xab5   : > { %4761 = vmatprep.subr.bf16.mxu0 %v6716_v56 }
 0xab6   : > { %3790 = vrot.lane.b32.xlu1 %v3770_v26, %s8925_s27  ;;  %v3848_v26 = vrot.slane %v3843_v12, %v7307_v4 }
 0xab7   : > { %3778 = vrot.lane.b32.xlu0 %v3767_v60, %s8886_s8  ;;  %v3852_v60 = vrot.slane %v3843_v12, %v7312_v6  ;;  %s6889_s8 = smov [#allocation7]  }
 0xab8   : > { %4762 = vmatpush1.bf16.msra.mxu0 %v6714_v17 }
 0xab9   : > { %4763 = vmatprep.subr.bf16.mxu0 %v6719_v10 }
 0xaba   : > { %4159 = vperm.xlu1 %6138, %v4150_v23  }
 0xabb   : > { %4154 = vperm.xlu0 %6137, %v4149_v53  }
 0xabc   : > { %4764 = vmatpush1.bf16.msra.mxu0 %v6717_v59 }
 0xabd   : > { %4765 = vmatprep.subr.bf16.mxu0 %v6722_v44  ;;  %v6743_v44 = vld [vmem:[%s8926_s0 + $0x154] ss:$8 sps:$4 sm:$0xff]  }
 0xabf   : > { %4164 = vperm.xlu0 %6137, %v4151_v62  }
 0xac0   : > { %4766 = vmatpush1.bf16.msra.mxu0 %v6720_v35  ;;  %v6740_v35 = vld [vmem:[%s8926_s0 + $0x144] ss:$8 sps:$4 sm:$0xff]  }
 0xac1   : > { %4767 = vmatprep.subr.bf16.mxu0 %v6725_v46  ;;  %v6744_v46 = vld [vmem:[%s8926_s0 + $0x160] ss:$8 sps:$4 sm:$0xff]  }
 0xac4   : > { %4768 = vmatpush1.bf16.msra.mxu0 %v6723_v45  ;;  %v6746_v45 = vld [vmem:[%s8926_s0 + $0x164] ss:$8 sps:$4 sm:$0xff]  }
 0xac5   : > { %4788 = vmatprep.subr.bf16.mxu0 %v6728_v21  ;;  %v6750_v21 = vld [vmem:[%s8926_s0 + $0x180] ss:$8 sps:$4 sm:$0xff]  }
 0xb24   : > { %v6326_v39 = vpop.permute.xlu1 %6325 }
 0xb25   : > { %v6321_v43 = vpop.permute.xlu0 %6320  ;;  %v6328_v2 = vunpack.i.h.bf16 %v6326_v39  ;;  %v6327_v36 = vunpack.i.l.bf16 %v6326_v39 }
 0xb26   : > { %v6323_v42 = vunpack.i.h.bf16 %v6321_v43  ;;  %v6322_v3 = vunpack.i.l.bf16 %v6321_v43 }
 0xb27   : > { %v3803_v32 = vpack.c.bf16 %v6328_v2, %v6327_v36 }
 0xb28   : > { %v3795_v18 = vsel %vm3351_vm15, %v3762_v5, %v6322_v3  ;;  %v3796_v51 = vsel %vm3351_vm15, %v3763_v8, %v6323_v42  ;;  %v3798_v19 = vsel %vm2950_vm14, %v6322_v3, %v6327_v36  ;;  %v3791_v52 = vpop.permute.xlu1 %3790  ;;  %v3799_v0 = vsel %vm2950_vm14, %v6323_v42, %v6328_v2 }
 0xb29   : > { %v3801_v40 = vpack.c.bf16 %v3796_v51, %v3795_v18  ;;  %v3779_v20 = vpop.permute.xlu0 %3778  ;;  %v3802_v30 = vpack.c.bf16 %v3799_v0, %v3798_v19  ;;  %v3806_v55 = vpack.c.bf16 %v3791_v52, %v3791_v52 }
 0xb2a   : > { %v3800_v22 = vsel %vm2950_vm14, %v3779_v20, %v3791_v52  ;;  %v3797_v58 = vsel %vm3351_vm15, %v3764_v29, %v3779_v20 }
 0xb2b   : > { %v3805_v11 = vpack.c.bf16 %v3800_v22, %v3800_v22  ;;  %4073 = vmatprep.mubr.bf16.mxu1 %v3802_v30  ;;  %v3804_v54 = vpack.c.bf16 %v3797_v58, %v3797_v58 }
 0xb2c   : > { %4074 = vmatmul.mubr.bf16.vlgmr.msra.gmra.mrb[36].mxu1 %v3801_v40 }
 0xb2d   : > { %4083 = vmatprep.mubr.bf16.mxu1 %v3805_v11  ;;  %4093 = vmatpush1.bf16.msra.mxu1 %v6672_v63 }
 0xb2e   : > { %4094 = vmatprep.subr.bf16.mxu1 %v6677_v28 }
 0xb31   : > { %4095 = vmatpush1.bf16.msra.mxu1 %v6675_v13 }
 0xb32   : > { %5047 = vmatprep.subr.bf16.mxu1 %v6878_v41 }
 0xb34   : > { %4084 = vmatmul.mubr.bf16.gmra.mrb[40].mxu1 %v3804_v54 }
 0xb35   : > { %4124 = vmatprep.mubr.bf16.mxu1 %v6878_v41 }
 0xb39   : > { %v4160_v19 = vpop.permute.xlu1 %4159 }
 0xb3a   : > { %v4155_v3 = vpop.permute.xlu0 %4154 }
 0xb3c   : > { %5756 = vmatmul.mubr.msk.bf16.vlgmr.msra.gmra.mrb[36].mxu1 %vm1515_vm10, %v3803_v32 }
 0xb3d   : > { %4134 = vmatprep.mubr.bf16.mxu1 %v6878_v41 }
 0xb3e   : > { %v4165_v16 = vpop.permute.xlu0 %4164 }
 0xb44   : > { %5757 = vmatmul.mubr.msk.bf16.gmra.mrb[40].mxu1 %vm1515_vm10, %v3806_v55 }
 0xc0f   : > { %v4126_v23 = vpop.f32.mrb[36].mxu1 }
 0xc10   : > { %v5994_v53 = vadd.f32 %v4126_v23, %v3848_v26  ;;  %v4128_v62 = vpop.f32.mrb[37].mxu1 }
 0xc11   : > { %v5995_v39 = vadd.f32 %v4128_v62, %v3852_v60  ;;  %v4130_v43 = vpop.f32.mrb[38].mxu1 }
 0xc12   : > { %v4143_v2 = vmax.f32 %v5994_v53, 0.0  ;;  %v5996_v36 = vadd.f32 %v4130_v43, %v3848_v26  ;;  %v4132_v42 = vpop.f32.mrb[39].mxu1 }
 0xc13   : > { %v4144_v5 = vmax.f32 %v5995_v39, 0.0  ;;  %v5997_v8 = vadd.f32 %v4132_v42, %v3852_v60 }
 0xc14   : > { %v4167_v18 = vmul.f32 %v4155_v3, %v4143_v2  ;;  %v4145_v51 = vmax.f32 %v5996_v36, 0.0 }
 0xc15   : > { %v4168_v40 = vmul.f32 %v4155_v3, %v4144_v5  ;;  %v4146_v52 = vmax.f32 %v5997_v8, 0.0 }
 0xc16   : > { %v4179_v20 = vrot.slane %v4167_v18, 7  ;;  %v4169_v0 = vmul.f32 %v4160_v19, %v4145_v51 }
 0xc17   : > { %v4180_v22 = vrot.slane %v4168_v40, 7  ;;  %v4170_v30 = vmul.f32 %v4160_v19, %v4146_v52  ;;  %v4136_v63 = vpop.f32.mrb[40].mxu1  ;;  %v6726_v19 = vld [vmem:[%s8926_s0 + $0x100] ss:$8 sps:$4 sm:$0xff]  }
 0xc18   : > { %4195 = vst [vmem:[#allocation6] sm:$0xfe] %v4179_v20  ;;  %v4181_v11 = vrot.slane %v4169_v0, 7  ;;  %v5998_v28 = vadd.f32 %v4136_v63, %v3848_v26  ;;  %v4138_v13 = vpop.f32.mrb[41].mxu1 }
 0xc19   : > { %4197 = vst.msk [vmem:[#allocation6 + $0x8] sm:$0xfe] %vm4196_vm4, %v4180_v22  ;;  %v4183_v29 = vrot.slane %v4170_v30, 7  ;;  %v5999_v58 = vadd.f32 %v4138_v13, %v3852_v60  ;;  %v4140_v54 = vpop.f32.mrb[42].mxu1 }
 0xc1a   : > { %v8456_v32 = vsel %vm1125_vm0, %v4179_v20, %v4181_v11  ;;  %v4147_v55 = vmax.f32 %v5998_v28, 0.0  ;;  %v4141_v47 = vpop.f32.mrb[43].mxu1  ;;  %v6734_v54 = vld [vmem:[%s8926_s0 + $0x124] ss:$8 sps:$4 sm:$0xff]  }
 0xc1b   : > { %v4184_v33 = vsel %vm1125_vm0, %v4180_v22, %v4183_v29  ;;  %v4148_v37 = vmax.f32 %v5999_v58, 0.0  ;;  %v4224_v1 = vrot.slane %v8456_v32, 1  ;;  %v6731_v22 = vld [vmem:[%s8926_s0 + $0x114] ss:$8 sps:$4 sm:$0xff]   ;;  %v6729_v58 = vld [vmem:[%s8926_s0 + $0x110] ss:$8 sps:$4 sm:$0xff]  }
 0xc1c   : > { %4199 = vst.msk [vmem:[#allocation6 + $0x18] sm:$0xff] %vm2950_vm14, %v4184_v33  ;;  %v4171_v57 = vmul.f32 %v4165_v16, %v4147_v55  ;;  %v4259_v47 = vrot.slane %v8456_v32, 2 }
 0xc1d   : > { %v4172_v7 = vmul.f32 %v4165_v16, %v4148_v37  ;;  %v6732_v37 = vld [vmem:[%s8926_s0 + $0x120] ss:$8 sps:$4 sm:$0xff]  }
 0xc1e   : > { %v4185_v31 = vrot.slane %v4171_v57, 7 }
 0xc1f   : > { %v4187_v34 = vrot.slane %v4172_v7, 7  ;;  %v4209_v48 = vld [vmem:[#allocation6] sm:$0xfe] }
 0xc20   : > { %v4186_v14 = vsel %vm1125_vm0, %v4181_v11, %v4185_v31  ;;  %v4223_v49 = vrot.slane %v4209_v48, 1  ;;  %v4210_v9 = vld [vmem:[#allocation6 + $0x8] sm:$0xfe]  ;;  %v4203_v42 = vld [vmem:[#allocation6] sm:$0xff] }
 0xc21   : > { %4200 = vst [vmem:[#allocation6 + $0x20] sm:$0x7] %v4186_v14  ;;  %v4188_v61 = vsel %vm1125_vm0, %v4183_v29, %v4187_v34  ;;  %v4226_v12 = vrot.slane %v4210_v9, 1  ;;  %v4204_v36 = vld [vmem:[#allocation6 + $0x8] sm:$0xff]  ;;  %v4277_v0 = vpack.c.bf16 %v8456_v32, %v4203_v42  ;;  %v4213_v63 = vld [vmem:[#allocation6] sm:$0xfc] }
 0xc22   : > { %4202 = vst.msk [vmem:[#allocation6 + $0x28] sm:$0x7] %vm4201_vm5, %v4188_v61  ;;  %v4225_v56 = vsel %vm1380_vm7, %v4223_v49, %v4224_v1  ;;  %v4258_v55 = vrot.slane %v4213_v63, 2  ;;  %v6737_v31 = vld [vmem:[%s8926_s0 + $0x134] ss:$8 sps:$4 sm:$0xff]  }
 0xc23   : > { %v8475_v24 = vld [vmem:[#allocation6 + $0x18] sm:$0xff]  ;;  %v6735_v32 = vld [vmem:[%s8926_s0 + $0x130] ss:$8 sps:$4 sm:$0xff]   ;;  %v6749_v48 = vld [vmem:[%s8926_s0 + $0x174] ss:$8 sps:$4 sm:$0xff]  }
 0xc24   : > { %v4227_v10 = vrot.slane %v8475_v24, 1  ;;  %v4260_v7 = vsel %vm1460_vm8, %v4258_v55, %v4259_v47  ;;  %v6738_v14 = vld [vmem:[%s8926_s0 + $0x140] ss:$8 sps:$4 sm:$0xff]   ;;  %v6741_v61 = vld [vmem:[%s8926_s0 + $0x150] ss:$8 sps:$4 sm:$0xff]  }
 0xc25   : > { %v6747_v49 = vld [vmem:[%s8926_s0 + $0x170] ss:$8 sps:$4 sm:$0xff]   ;;  %v6761_v9 = vld [vmem:[%s8926_s0 + $0x1b4] ss:$8 sps:$4 sm:$0xff]   ;;  %v6791_v55 = vld [vmem:[%s8859_s20 + $0x28] sm:$0xff]  }
 0xc26   : > { %v4228_v60 = vsel %vm1380_vm7, %v4226_v12, %v4227_v10  ;;  %v6765_v12 = vld [vmem:[%s8926_s0 + $0x1d0] ss:$8 sps:$4 sm:$0xff]  }
 0xc28   : > { %v4211_v27 = vld [vmem:[#allocation6 + $0x20] sm:$0x7] }
 0xc29   : > { %v4229_v50 = vrot.slane %v4211_v27, 1  ;;  %v4212_v25 = vld [vmem:[#allocation6 + $0x28] sm:$0x7]  ;;  %v4215_v40 = vld [vmem:[#allocation6 + $0x20] sm:$0xf] }
 0xc2a   : > { %v4231_v15 = vrot.slane %v4212_v25, 1  ;;  %v4208_v2 = vld [vmem:[#allocation6 + $0x28] sm:$0x3]  ;;  %v8510_v13 = vrot.slane %v4215_v40, 2  ;;  %v4207_v16 = vld [vmem:[#allocation6 + $0x20] sm:$0x3] }
 0xc2b   : > { %4241 = vrot.lane.b32.xlu0 %v4229_v50, %s8925_s27  ;;  %v4230_v17 = vsel %vm1380_vm7, %v4224_v1, %v4229_v50  ;;  %v4282_v57 = vpack.c.bf16 %v4207_v16, %v4207_v16  ;;  %v6752_v27 = vld [vmem:[%s8926_s0 + $0x184] ss:$8 sps:$4 sm:$0xff]   ;;  %v6755_v50 = vld [vmem:[%s8926_s0 + $0x194] ss:$8 sps:$4 sm:$0xff]   ;;  %v6753_v1 = vld [vmem:[%s8926_s0 + $0x190] ss:$8 sps:$4 sm:$0xff]  }
 0xc2c   : > { %v6329_v59 = vpack.i.bf16 %v4230_v17, %v4225_v56  ;;  %v4232_v26 = vsel %vm1380_vm7, %v4227_v10, %v4231_v15  ;;  %v4265_v33 = vsel %vm1460_vm8, %v4259_v47, %v8510_v13  ;;  %v6758_v25 = vld [vmem:[%s8926_s0 + $0x1a4] ss:$8 sps:$4 sm:$0xff]   ;;  %v6759_v56 = vld [vmem:[%s8926_s0 + $0x1b0] ss:$8 sps:$4 sm:$0xff]   ;;  %v6762_v10 = vld [vmem:[%s8926_s0 + $0x1c0] ss:$8 sps:$4 sm:$0xff]  }
 0xc2d   : > { %v6334_v23 = vpack.i.bf16 %v4232_v26, %v4228_v60  ;;  %v4280_v34 = vpack.c.bf16 %v4265_v33, %v4260_v7  ;;  %v6764_v17 = vld [vmem:[%s8926_s0 + $0x1c4] ss:$8 sps:$4 sm:$0xff]   ;;  %v6768_v60 = vld [vmem:[%s8926_s0 + $0x1e0] ss:$8 sps:$4 sm:$0xff]   ;;  %v6785_v40 = vld [vmem:[%s8926_s0 + $0x234] ss:$8 sps:$4 sm:$0xff]  }
 0xc2e   : > { %6330 = vrot.lane.b32.xlu1 %v6329_v59, %s8925_s27  ;;  %v6767_v59 = vld [vmem:[%s8926_s0 + $0x1d4] ss:$8 sps:$4 sm:$0xff]   ;;  %v6770_v26 = vld [vmem:[%s8926_s0 + $0x1e4] ss:$8 sps:$4 sm:$0xff]   ;;  %v4359_v16 = vld [vmem:[%s8928_s6] sm:$0x3] }
 0xc2f   : > { %4243 = vrot.lane.b32.xlu0 %v4231_v15, %s8925_s27  ;;  %v6756_v15 = vld [vmem:[%s8926_s0 + $0x1a0] ss:$8 sps:$4 sm:$0xff]   ;;  %v6792_v47 = vld [vmem:[%s8859_s20 + $0x30] sm:$0xff]   ;;  %v4364_v33 = vrot.slane %v4359_v16, %v7307_v4  ;;  %s837_s6 = scalar_lea.vmem [#allocation7], %s836_s11 }
 0xc30   : > { %s5449_s30 = sshll.u32 %s837_s6, 4  ;;  %s8799_s30 = int_to_ptr.vmem [resolvable:$true] %s5449_s30 }
 0xc32   : > { %6335 = vrot.lane.b32.xlu1 %v6334_v23, %s8925_s27  ;;  %v6773_v23 = vld [vmem:[%s8926_s0 + $0x1f4] ss:$8 sps:$4 sm:$0xff]  }
 0xc9d   : > { %v8490_v53 = vpop.permute.xlu0 %4241 }
 0xc9e   : > { %v4276_v3 = vsel %vm2950_vm14, %v4208_v2, %v8490_v53  ;;  %v6779_v2 = vld [vmem:[%s8926_s0 + $0x214] ss:$8 sps:$4 sm:$0xff]  }
 0xc9f   : > { %v4283_v30 = vpack.c.bf16 %v4276_v3, %v4276_v3  ;;  %v6777_v3 = vld [vmem:[%s8926_s0 + $0x210] ss:$8 sps:$4 sm:$0xff]  }
 0xca0   : > { %v6331_v62 = vpop.permute.xlu1 %6330 }
 0xca1   : > { %v6333_v39 = vunpack.i.h.bf16 %v6331_v62  ;;  %v6332_v43 = vunpack.i.l.bf16 %v6331_v62  ;;  %v6771_v62 = vld [vmem:[%s8926_s0 + $0x1f0] ss:$8 sps:$4 sm:$0xff]   ;;  %v4244_v42 = vpop.permute.xlu0 %4243 }
 0xca3   : > { %v4274_v5 = vsel %vm2950_vm14, %v4204_v36, %v6332_v43  ;;  %v4275_v8 = vsel %vm2950_vm14, %v8475_v24, %v6333_v39  ;;  %v4285_v36 = vpack.c.bf16 %v8510_v13, %v8510_v13  ;;  %v6787_v13 = vld [vmem:[%s8859_s20 + $0x8] sm:$0xff]  }
 0xca4   : > { %v6336_v18 = vpop.permute.xlu1 %6335  ;;  %v4278_v51 = vpack.c.bf16 %v4275_v8, %v4274_v5  ;;  %v6782_v5 = vld [vmem:[%s8926_s0 + $0x224] ss:$8 sps:$4 sm:$0xff]   ;;  %v4247_v8 = vsel %vm2950_vm14, %v8490_v53, %v4244_v42  ;;  %v6783_v53 = vld [vmem:[%s8926_s0 + $0x230] ss:$8 sps:$4 sm:$0xff]  }
 0xca5   : > { %v6338_v52 = vunpack.i.h.bf16 %v6336_v18  ;;  %v6337_v20 = vunpack.i.l.bf16 %v6336_v18  ;;  %v4216_v18 = vld [vmem:[#allocation6 + $0x28] sm:$0xf]  ;;  %v6795_v42 = vld [vmem:[%s8859_s20 + $0x48] sm:$0xff]  }
 0xca6   : > { %4769 = vmatprep.mubr.bf16.mxu0 %v4278_v51  ;;  %v6780_v51 = vld [vmem:[%s8926_s0 + $0x220] ss:$8 sps:$4 sm:$0xff]  }
 0xca7   : > { %v8505_v11 = vsel %vm2950_vm14, %v6332_v43, %v6337_v20  ;;  %v8508_v28 = vsel %vm2950_vm14, %v6333_v39, %v6338_v52  ;;  %4770 = vmatmul.mubr.bf16.vlgmr.msra.gmra.mrb[44].mxu0 %v4277_v0  ;;  %v6776_v39 = vld [vmem:[%s8926_s0 + $0x204] ss:$8 sps:$4 sm:$0xff]   ;;  %v6774_v43 = vld [vmem:[%s8926_s0 + $0x200] ss:$8 sps:$4 sm:$0xff]   ;;  %v4266_v52 = vrot.slane %v4216_v18, 2  ;;  %v4262_v0 = vrot.slane %v8475_v24, 2 }
 0xca8   : > { %v4279_v29 = vpack.c.bf16 %v8508_v28, %v8505_v11  ;;  %4789 = vmatpush1.bf16.msra.mxu0 %v6726_v19  ;;  %4779 = vmatprep.mubr.bf16.mxu0 %v4283_v30  ;;  %v4284_v19 = vpack.c.bf16 %v4247_v8, %v4247_v8  ;;  %v4214_v20 = vld [vmem:[#allocation6 + $0x8] sm:$0xfc]  ;;  %v6786_v28 = vld [vmem:[%s8859_s20] sm:$0xff]  }
 0xca9   : > { %4790 = vmatprep.subr.bf16.mxu0 %v6731_v22  ;;  %v4261_v22 = vrot.slane %v4214_v20, 2  ;;  %v4267_v30 = vsel %vm1460_vm8, %v4262_v0, %v4266_v52  ;;  %v4286_v24 = vpack.c.bf16 %v4266_v52, %v4266_v52  ;;  %5048 = vmatpush1.bf16.msra.mxu1 %v6786_v28 }
 0xcaa   : > { %5049 = vmatprep.subr.bf16.mxu1 %v6878_v41 }
 0xcab   : > { %v4263_v63 = vsel %vm1460_vm8, %v4261_v22, %v4262_v0  ;;  %vm5098_vm8 = vcmask 138240  }
 0xcac   : > { %4791 = vmatpush1.bf16.msra.mxu0 %v6729_v58  ;;  %v4281_v11 = vpack.c.bf16 %v4267_v30, %v4263_v63  ;;  %v6789_v58 = vld [vmem:[%s8859_s20 + $0x18] sm:$0xff]  }
 0xcad   : > { %4792 = vmatprep.subr.bf16.mxu0 %v6734_v54  ;;  %5050 = vmatpush1.bf16.msra.mxu1 %v6787_v13  ;;  %v6790_v54 = vld [vmem:[%s8859_s20 + $0x20] sm:$0xff]  }
 0xcae   : > { %5051 = vmatprep.subr.bf16.mxu1 %v6878_v41 }
 0xcaf   : > { %4780 = vmatmul.mubr.bf16.gmra.mrb[48].mxu0 %v4282_v57 }
 0xcb0   : > { %4793 = vmatpush1.bf16.msra.mxu0 %v6732_v37  ;;  %4820 = vmatprep.mubr.bf16.mxu0 %v4280_v34  ;;  %v4368_v37 = vrot.slane %v4359_v16, %v7312_v6 }
 0xcb1   : > { %4794 = vmatprep.subr.bf16.mxu0 %v6737_v31 }
 0xcb4   : > { %4795 = vmatpush1.bf16.msra.mxu0 %v6735_v32 }
 0xcb5   : > { %4796 = vmatprep.subr.bf16.mxu0 %v6740_v35 }
 0xcb8   : > { %4797 = vmatpush1.bf16.msra.mxu0 %v6738_v14 }
 0xcb9   : > { %4798 = vmatprep.subr.bf16.mxu0 %v6743_v44 }
 0xcbc   : > { %4799 = vmatpush1.bf16.msra.mxu0 %v6741_v61 }
 0xcbd   : > { %4800 = vmatprep.subr.bf16.mxu0 %v6746_v45 }
 0xcc0   : > { %4801 = vmatpush1.bf16.msra.mxu0 %v6744_v46 }
 0xcc1   : > { %4802 = vmatprep.subr.bf16.mxu0 %v6749_v48  ;;  %v6793_v48 = vld [vmem:[%s8859_s20 + $0x38] sm:$0xff]  }
 0xcc4   : > { %4803 = vmatpush1.bf16.msra.mxu0 %v6747_v49 }
 0xcc5   : > { %4804 = vmatprep.subr.bf16.mxu0 %v6752_v27 }
 0xcc8   : > { %4805 = vmatpush1.bf16.msra.mxu0 %v6750_v21 }
 0xcc9   : > { %4806 = vmatprep.subr.bf16.mxu0 %v6755_v50 }
 0xccc   : > { %4807 = vmatpush1.bf16.msra.mxu0 %v6753_v1 }
 0xccd   : > { %4808 = vmatprep.subr.bf16.mxu0 %v6758_v25 }
 0xcd0   : > { %4809 = vmatpush1.bf16.msra.mxu0 %v6756_v15 }
 0xcd1   : > { %4810 = vmatprep.subr.bf16.mxu0 %v6761_v9 }
 0xcd4   : > { %4811 = vmatpush1.bf16.msra.mxu0 %v6759_v56 }
 0xcd5   : > { %4812 = vmatprep.subr.bf16.mxu0 %v6764_v17 }
 0xcd8   : > { %4813 = vmatpush1.bf16.msra.mxu0 %v6762_v10 }
 0xcd9   : > { %4814 = vmatprep.subr.bf16.mxu0 %v6767_v59 }
 0xcdc   : > { %4815 = vmatpush1.bf16.msra.mxu0 %v6765_v12 }
 0xcdd   : > { %4816 = vmatprep.subr.bf16.mxu0 %v6770_v26 }
 0xce0   : > { %4817 = vmatpush1.bf16.msra.mxu0 %v6768_v60 }
 0xce1   : > { %4818 = vmatprep.subr.bf16.mxu0 %v6773_v23 }
 0xce4   : > { %4819 = vmatpush1.bf16.msra.mxu0 %v6771_v62 }
 0xce5   : > { %4839 = vmatprep.subr.bf16.mxu0 %v6776_v39  ;;  %v6794_v39 = vld [vmem:[%s8859_s20 + $0x40] sm:$0xff]  }
 0xce7   : > { %4821 = vmatmul.mubr.bf16.vlgmr.msra.gmra.mrb[44].mxu0 %v4279_v29  ;;  %v6788_v29 = vld [vmem:[%s8859_s20 + $0x10] sm:$0xff]  }
 0xce8   : > { %4830 = vmatprep.mubr.bf16.mxu0 %v4285_v36  ;;  %4840 = vmatpush1.bf16.msra.mxu0 %v6774_v43 }
 0xce9   : > { %4841 = vmatprep.subr.bf16.mxu0 %v6779_v2  ;;  %5052 = vmatpush1.bf16.msra.mxu1 %v6788_v29 }
 0xcea   : > { %5053 = vmatprep.subr.bf16.mxu1 %v6878_v41 }
 0xcec   : > { %4842 = vmatpush1.bf16.msra.mxu0 %v6777_v3 }
 0xced   : > { %4843 = vmatprep.subr.bf16.mxu0 %v6782_v5  ;;  %5054 = vmatpush1.bf16.msra.mxu1 %v6789_v58 }
 0xcee   : > { %5055 = vmatprep.subr.bf16.mxu1 %v6878_v41 }
 0xcef   : > { %4831 = vmatmul.mubr.bf16.gmra.mrb[48].mxu0 %v4284_v19 }
 0xcf0   : > { %4844 = vmatpush1.bf16.msra.mxu0 %v6780_v51  ;;  %4871 = vmatprep.mubr.bf16.mxu0 %v6878_v41 }
 0xcf1   : > { %4845 = vmatprep.subr.bf16.mxu0 %v6785_v40  ;;  %5056 = vmatpush1.bf16.msra.mxu1 %v6790_v54 }
 0xcf2   : > { %5057 = vmatprep.subr.bf16.mxu1 %v6878_v41 }
 0xcf4   : > { %4846 = vmatpush1.bf16.msra.mxu0 %v6783_v53 }
 0xcf5   : > { %5948 = vmatprep.subr.bf16.mxu0 %v6879_v38  ;;  %5058 = vmatpush1.bf16.msra.mxu1 %v6791_v55 }
 0xcf6   : > { %5059 = vmatprep.subr.bf16.mxu1 %v6878_v41 }
 0xcf7   : > { %5830 = vmatmul.mubr.msk.bf16.vlgmr.msra.gmra.mrb[44].mxu0 %vm2950_vm14, %v4281_v11 }
 0xcf8   : > { %4881 = vmatprep.mubr.bf16.mxu0 %v6878_v41 }
 0xcf9   : > { %5060 = vmatpush1.bf16.msra.mxu1 %v6792_v47 }
 0xcfa   : > { %5061 = vmatprep.subr.bf16.mxu1 %v6878_v41 }
 0xcfd   : > { %5062 = vmatpush1.bf16.msra.mxu1 %v6793_v48 }
 0xcfe   : > { %5063 = vmatprep.subr.bf16.mxu1 %v6878_v41 }
 0xcff   : > { %5831 = vmatmul.mubr.msk.bf16.gmra.mrb[48].mxu0 %vm2950_vm14, %v4286_v24 }
 0xd01   : > { %5064 = vmatpush1.bf16.msra.mxu1 %v6794_v39 }
 0xd02   : > { %5065 = vmatprep.subr.bf16.mxu1 %v6878_v41 }
 0xd05   : > { %5066 = vmatpush1.bf16.msra.mxu1 %v6795_v42 }
 0xd06   : > { %5920 = vmatprep.subr.bf16.mxu1 %v6879_v38 }
 0xdca   : > { %v4873_v57 = vpop.f32.mrb[44].mxu0 }
 0xdcb   : > { %v6000_v7 = vadd.f32 %v4873_v57, %v4364_v33  ;;  %v4875_v31 = vpop.f32.mrb[45].mxu0 }
 0xdcc   : > { %v6001_v34 = vadd.f32 %v4875_v31, %v4368_v37  ;;  %v4877_v32 = vpop.f32.mrb[46].mxu0 }
 0xdcd   : > { %v4890_v35 = vmax.f32 %v6000_v7, 0.0  ;;  %v6002_v14 = vadd.f32 %v4877_v32, %v4364_v33  ;;  %v4879_v44 = vpop.f32.mrb[47].mxu0 }
 0xdce   : > { %v4891_v61 = vmax.f32 %v6001_v34, 0.0  ;;  %v6003_v45 = vadd.f32 %v4879_v44, %v4368_v37 }
 0xdcf   : > { %v4892_v46 = vmax.f32 %v6002_v14, 0.0  ;;  %v4902_v27 = vrot.slane %v4890_v35, 1 }
 0xdd0   : > { %v4893_v49 = vmax.f32 %v6003_v45, 0.0  ;;  %v4905_v6 = vrot.slane %v4891_v61, 1 }
 0xdd1   : > { %v4903_v4 = vrot.slane %v4892_v46, 1 }
 0xdd2   : > { %v4906_v21 = vrot.slane %v4893_v49, 1  ;;  %v4883_v50 = vpop.f32.mrb[48].mxu0 }
 0xdd3   : > { %v6004_v1 = vadd.f32 %v4883_v50, %v4364_v33  ;;  %v4885_v25 = vpop.f32.mrb[49].mxu0  ;;  %v4904_v15 = vsel %vm1380_vm7, %v4902_v27, %v4903_v4  ;;  %v6799_v50 = vld [vmem:[%s8861_s22 + $0x18] sm:$0xff]  }
 0xdd4   : > { %v6005_v9 = vadd.f32 %v4885_v25, %v4368_v37  ;;  %v4887_v56 = vpop.f32.mrb[50].mxu0  ;;  %v4907_v17 = vsel %vm1380_vm7, %v4905_v6, %v4906_v21  ;;  %v4918_v10 = vmax.f32 %v4890_v35, %v4904_v15  ;;  %v6797_v6 = vld [vmem:[%s8861_s22 + $0x8] sm:$0xff]   ;;  %v6802_v15 = vld [vmem:[%s8861_s22 + $0x30] sm:$0xff]  }
 0xdd5   : > { %v4894_v59 = vmax.f32 %v6004_v1, 0.0  ;;  %v4888_v12 = vpop.f32.mrb[51].mxu0  ;;  %v4919_v26 = vmax.f32 %v4891_v61, %v4907_v17  ;;  %v5103_v61 = vsel %vm1125_vm0, 65535, %v6878_v41  ;;  %v6796_v41 = vld [vmem:[%s8861_s22] sm:$0xff]   ;;  %v6801_v25 = vld [vmem:[%s8861_s22 + $0x28] sm:$0xff]   ;;  %vm5434_vm0 = vcmask 319488  }
 0xdd6   : > { %v4895_v60 = vmax.f32 %v6005_v9, 0.0  ;;  %v6800_v1 = vld [vmem:[%s8861_s22 + $0x20] sm:$0xff]   ;;  %v6803_v9 = vld [vmem:[%s8861_s22 + $0x38] sm:$0xff]   ;;  %v6805_v17 = vld [vmem:[%s8863_s24 + $0x8] sm:$0xff]  }
 0xdd7   : > { %v4908_v23 = vrot.slane %v4894_v59, 1  ;;  %v6339_v62 = vpack.i.bf16 %v4919_v26, %v4918_v10  ;;  %v6804_v56 = vld [vmem:[%s8863_s24] sm:$0xff]  }
 0xdd8   : > { %v4910_v43 = vrot.slane %v4895_v60, 1  ;;  %5949 = vmatpush3.bf16.msra.mxu0 %v6804_v56 }
 0xdd9   : > { %v4922_v2 = vmax.f32 %v4894_v59, %v4908_v23  ;;  %6340 = vrot.lane.b32.xlu1 %v6339_v62, %s8929_s1  ;;  %v4909_v36 = vsel %vm1380_vm7, %v4903_v4, %v4908_v23  ;;  %v5095_v4 = vld [vmem:[%s8860_s21] sm:$0x7]  ;;  %5950 = vmatprep.subr.bf16.mxu0 %v6879_v38 }
 0xdda   : > { %v4923_v3 = vmax.f32 %v4895_v60, %v4910_v43  ;;  %v4911_v5 = vsel %vm1380_vm7, %v4906_v21, %v4910_v43  ;;  %v4920_v8 = vmax.f32 %v4892_v46, %v4909_v36  ;;  %vm6888_vm7 = vmmov 0   ;;  %v6798_v21 = vld [vmem:[%s8861_s22 + $0x10] sm:$0xff]   ;;  %v5845_v36 = vld [vmem:[%s8862_s23] ss:$0 sm:$0xff] }
 0xddb   : > { %v4921_v18 = vmax.f32 %v4893_v49, %v4911_v5  ;;  %5956 = vmatprep.mubr.msk.bf16.mxu0 %vm6888_vm7, %v6879_v38  ;;  %v6806_v43 = vld [vmem:[%s8863_s24 + $0x10] sm:$0xff]  }
 0xddc   : > { %v6349_v51 = vpack.i.bf16 %v4923_v3, %v4922_v2  ;;  %5951 = vmatpush3.bf16.msra.mxu0 %v6805_v17 }
 0xddd   : > { %v6344_v19 = vpack.i.bf16 %v4921_v18, %v4920_v8  ;;  %5952 = vmatprep.subr.bf16.mxu0 %v6879_v38 }
 0xdde   : > { %6350 = vrot.lane.b32.xlu1 %v6349_v51, %s8929_s1 }
 0xddf   : > { %6345 = vrot.lane.b32.xlu0 %v6344_v19, %s8929_s1  ;;  %s6812_s1 = scalar_lea.vmem %s8799_s30, 16 }
 0xde0   : > { %5953 = vmatpush3.bf16.msra.mxu0 %v6806_v43  ;;  %p6813_p11 = scmp.ne.s32.totalorder %s8799_s30, %s6812_s1 }
 0xde1   : > { %5954 = vmatprep.subr.bf16.mxu0 %v6879_v38 }
 0xde2   : > { %p6814_p12 = pnand %p6813_p11, %p7073_p5 }
 0xde4   : > { %p6815_p13 = pneg %p6814_p12 }
 0xe4b   : > { %v6341_v40 = vpop.permute.xlu1 %6340 }
 0xe4c   : > { %v6343_v52 = vunpack.i.h.bf16 %v6341_v40  ;;  %v6342_v20 = vunpack.i.l.bf16 %v6341_v40  ;;  %v6808_v40 = vld [vmem:[%s8865_s26] sm:$0xff]  }
 0xe4e   : > { %v4942_v30 = vsel %vm3351_vm15, %v6342_v20, %v6343_v52  ;;  %v4952_v24 = vmax.f32 %v4919_v26, %v6343_v52  ;;  %v6809_v52 = vld [vmem:[%s8865_s26 + $0x8] sm:$0xff]   ;;  %v6810_v20 = vld [vmem:[%s8865_s26 + $0x10] sm:$0xff]  }
 0xe4f   : > { %v4951_v54 = vmax.f32 %v4918_v10, %v4942_v30 }
 0xe50   : > { %v6351_v0 = vpop.permute.xlu1 %6350 }
 0xe51   : > { %v6353_v53 = vunpack.i.h.bf16 %v6351_v0  ;;  %v6346_v22 = vpop.permute.xlu0 %6345  ;;  %v6352_v13 = vunpack.i.l.bf16 %v6351_v0  ;;  %v6811_v0 = vld [vmem:[%s8865_s26 + $0x18] sm:$0xff]  }
 0xe52   : > { %v6348_v63 = vunpack.i.h.bf16 %v6346_v22  ;;  %v6347_v11 = vunpack.i.l.bf16 %v6346_v22 }
 0xe53   : > { %v4956_v28 = vmax.f32 %v4923_v3, %v6353_v53  ;;  %v4944_v37 = vsel %vm3351_vm15, %v6352_v13, %v6353_v53  ;;  %v5854_v53 = vld [vmem:[%s8864_s25] ss:$0 sm:$0xff] }
 0xe54   : > { %v4954_v29 = vmax.f32 %v4921_v18, %v6348_v63  ;;  %v4943_v58 = vsel %vm3351_vm15, %v6347_v11, %v6348_v63  ;;  %v4955_v57 = vmax.f32 %v4922_v2, %v4944_v37  ;;  %v6807_v2 = vld [vmem:[%s8863_s24 + $0x18] sm:$0xff]  }
 0xe55   : > { %v4953_v55 = vmax.f32 %v4920_v8, %v4943_v58  ;;  %v4960_v33 = vpack.c.bf16 %v4956_v28, %v4956_v28  ;;  %5955 = vmatpush3.bf16.msra.mxu0 %v6807_v2 }
 0xe56   : > { %v4958_v47 = vpack.c.bf16 %v4954_v29, %v4952_v24  ;;  %v4959_v7 = vpack.c.bf16 %v4955_v57, %v4955_v57 }
 0xe57   : > { %v4957_v16 = vpack.c.bf16 %v4953_v55, %v4951_v54 }
 0xe58   : > { %5842 = vmatprep.mubr.msk.bf16.mxu1 %vm1515_vm10, %v4958_v47 }
 0xe59   : > { %5080 = vmatmul.mubr.bf16.vlgmr.msra.gmra.mrb[44].mxu1 %v4957_v16 }
 0xe5a   : > { %5843 = vmatprep.mubr.msk.bf16.mxu1 %vm1515_vm10, %v4960_v33  ;;  %v5366_v33 = vld [vmem:[%s8930_s28] sm:$0x1]  ;;  %s6816_s28 = sshll.u32 %s6889_s8, 4  ;;  %s6817_s28 = int_to_ptr.vmem [resolvable:$false] %s6816_s28 }
 0xe5b   : > { %s6818_s29 = scalar_lea.vmem %s6817_s28, 32  ;;  %p6819_p0 = scmp.lt.s32.totalorder %s8799_s30, %s6817_s28 }
 0xe5c   : > { %p6820_p1 = scmp.lt.s32.totalorder %s6818_s29, %s6812_s1 }
 0xe5e   : > { %p6821_p2 = por %p6820_p1, %p6819_p0 }
 0xe60   : > { %p6822_p3 = pnand %p6821_p2, %p6815_p13 }
 0xe61   : > { %5088 = vmatmul.mubr.bf16.gmra.mrb[48].mxu1 %v4959_v7 }
 0xe62   : > { %5924 = vmatprep.mubr.msk.bf16.mxu1 %vm6888_vm7, %v6879_v38 }
 0xf2c   : > { %v5081_v31 = vpop.f32.mrb[44].mxu1 }
 0xf2d   : > { %v5083_v34 = vpop.f32.mrb[45].mxu1 }
 0xf2e   : > { %v5084_v32 = vpop.f32.mrb[46].mxu1 }
 0xf2f   : > { %v5096_v35 = vpack.c.bf16 %v5084_v32, %v5081_v31  ;;  %v5086_v14 = vpop.f32.mrb[47].mxu1 }
 0xf31   : > { %5921 = vmatpush3.bf16.msra.mxu1 %v5096_v35 }
 0xf32   : > { %5922 = vmatprep.subr.bf16.mxu1 %v6879_v38 }
 0xf34   : > { %v5089_v44 = vpop.f32.mrb[48].mxu1 }
 0xf35   : > { %v5097_v45 = vpack.c.bf16 %v5089_v44, %v5089_v44  ;;  %v5091_v46 = vpop.f32.mrb[49].mxu1 }
 0xf36   : > { %v5092_v48 = vpop.f32.mrb[50].mxu1 }
 0xf37   : > { %v5105_v49 = vand.u32 %v5103_v61, %v5097_v45  ;;  %v5093_v27 = vpop.f32.mrb[51].mxu1 }
 0xf39   : > { %5923 = vmatpush3.bf16.msra.mxu1 %v5105_v49 }
 0xf3a   : > { %5928 = vmatprep.subr.bf16.mxu1 %v6879_v38 }
 0xf3c   : > { %5925 = vmatmul.mubr.msk.bf16.vlgmr.msra.gmra.mrb[52].mxu1 %vm5098_vm8, %v5095_v4 }
 0xf3d   : > { %5944 = vmatprep.mubr.msk.bf16.mxu1 %vm6888_vm7, %v6879_v38  ;;  %5929 = vmatpush3.bf16.msra.mxu1 %v6796_v41 }
 0xf3e   : > { %5930 = vmatprep.subr.bf16.mxu1 %v6879_v38 }
 0xf41   : > { %5931 = vmatpush3.bf16.msra.mxu1 %v6797_v6 }
 0xf42   : > { %5932 = vmatprep.subr.bf16.mxu1 %v6879_v38 }
 0xf45   : > { %5933 = vmatpush3.bf16.msra.mxu1 %v6798_v21 }
 0xf46   : > { %5934 = vmatprep.subr.bf16.mxu1 %v6879_v38 }
 0xf49   : > { %5935 = vmatpush3.bf16.msra.mxu1 %v6799_v50 }
 0xf4a   : > { %5936 = vmatprep.subr.bf16.mxu1 %v6879_v38 }
 0xf4d   : > { %5937 = vmatpush3.bf16.msra.mxu1 %v6800_v1 }
 0xf4e   : > { %5938 = vmatprep.subr.bf16.mxu1 %v6879_v38 }
 0xf51   : > { %5939 = vmatpush3.bf16.msra.mxu1 %v6801_v25 }
 0xf52   : > { %5940 = vmatprep.subr.bf16.mxu1 %v6879_v38 }
 0xf55   : > { %5941 = vmatpush3.bf16.msra.mxu1 %v6802_v15 }
 0xf56   : > { %5942 = vmatprep.subr.bf16.mxu1 %v6879_v38 }
 0xf59   : > { %5943 = vmatpush3.bf16.msra.mxu1 %v6803_v9 }
 0xf5a   : > { %5960 = vmatprep.subr.bf16.mxu1 %v6879_v38 }
0x100f   : > { %v5141_v10 = vpop.f32.mrb[52].mxu1 }
0x1010   : > { %v5148_v59 = vrot.slane %v5141_v10, 3  ;;  %v5926_v12 = vpop.f32.mrb[53].mxu1 }
0x1011   : > { %v5144_v26 = vpop.f32.mrb[54].mxu1 }
0x1012   : > { %5149 = vrot.lane.b32.xlu0 %v5148_v59, %s8925_s27  ;;  %v5927_v60 = vpop.f32.mrb[55].mxu1  ;;  %s8932_s27 = sld [smem:[#allocation31_spill]] }
0x1018   : > { %s8797_s0 = scalar_lea.hbm %s8932_s27, %s5865_s9 }
0x1084   : > { %v5150_v23 = vpop.permute.xlu0 %5149 }
0x1085   : > { %v5152_v62 = vsel %vm2950_vm14, %v5141_v10, %v5150_v23 }
0x1086   : > { %v5153_v39 = vpack.c.bf16 %v5152_v62, %v5152_v62 }
0x1088   : > { %5945 = vmatmul.mubr.bf16.vlgmr.msra.gmra.mrb[56].mxu1 %v5153_v39 }
0x1089   : > { %5968 = vmatprep.mubr.msk.bf16.mxu1 %vm6888_vm7, %v6879_v38  ;;  %5961 = vmatpush3.bf16.msra.mxu1 %v6808_v40 }
0x108a   : > { %5962 = vmatprep.subr.bf16.mxu1 %v6879_v38 }
0x108d   : > { %5963 = vmatpush3.bf16.msra.mxu1 %v6809_v52 }
0x108e   : > { %5964 = vmatprep.subr.bf16.mxu1 %v6879_v38 }
0x1091   : > { %5965 = vmatpush3.bf16.msra.mxu1 %v6810_v20 }
0x1092   : > { %5966 = vmatprep.subr.bf16.mxu1 %v6879_v38 }
0x1095   : > { %5967 = vmatpush3.bf16.msra.mxu1 %v6811_v0 }
0x115b   : > { %v5259_v42 = vpop.f32.mrb[56].mxu1 }
0x115c   : > { %v5260_v3 = vadd.f32 %v5845_v36, %v5259_v42  ;;  %v5946_v5 = vpop.f32.mrb[57].mxu1 }
0x115d   : > { %v5262_v8 = vpop.f32.mrb[58].mxu1 }
0x115e   : > { %v5265_v18 = vmax.f32 %v5260_v3, 0.0  ;;  %v5947_v51 = vpop.f32.mrb[59].mxu1 }
0x1160   : > { %v5266_v19 = vpack.c.bf16 %v5265_v18, %v5265_v18 }
0x1162   : > { %5957 = vmatmul.mubr.msk.bf16.vlgmr.msra.gmra.mrb[52].mxu0 %vm2950_vm14, %v5266_v19 }
0x1235   : > { %v5343_v22 = vpop.f32.mrb[52].mxu0 }
0x1236   : > { %v5344_v30 = vadd.f32 %v5854_v53, %v5343_v22  ;;  %v5958_v63 = vpop.f32.mrb[53].mxu0 }
0x1237   : > { %v5346_v11 = vpop.f32.mrb[54].mxu0 }
0x1238   : > { %v5349_v24 = vmax.f32 %v5344_v30, 0.0  ;;  %v5959_v28 = vpop.f32.mrb[55].mxu0 }
0x123a   : > { %v5350_v13 = vsel %vm4201_vm5, %v5349_v24, -inf }
0x123b   : > { %v5351_v29 = vrot.slane %v5350_v13, 4 }
0x123d   : > { %v5352_v58 = vmax.f32 %v5350_v13, %v5351_v29 }
0x123f   : > { %v5353_v54 = vrot.slane %v5352_v58, 2 }
0x1241   : > { %v5354_v55 = vmax.f32 %v5352_v58, %v5353_v54 }
0x1243   : > { %v5355_v38 = vrot.slane %v5354_v55, 1 }
0x1245   : > { %v5356_v47 = vmax.f32 %v5354_v55, %v5355_v38 }
0x1247   : > { %v5357_v16 = vpack.c.bf16 %v5356_v47, %v5356_v47 }
0x1249   : > { %5969 = vmatmul.mubr.msk.bf16.vlgmr.msra.gmra.mrb[60].mxu1 %vm2950_vm14, %v5357_v16 }
0x131c   : > { %v5428_v37 = vpop.f32.mrb[60].mxu1 }
0x131d   : > { %v5429_v57 = vadd.f32 %v5428_v37, %v5366_v33  ;;  %v5970_v7 = vpop.f32.mrb[61].mxu1 }
0x131e   : > { %v5431_v31 = vpop.f32.mrb[62].mxu1 }
0x131f   : > { %v5971_v34 = vpop.f32.mrb[63].mxu1  ;;  %5435 = vst.msk [vmem:[%s837_s6] sm:$0x1] %vm5434_vm0, %v5429_v57 }
0x1320   : > { %6825 = shalt.err (!%p6822_p3)
}
0x1321   : > { %s6826_s11 = scalar_lea.hbm %s8797_s0, 16  ;;  %s6830_s2 = scalar_lea.hbm %s8932_s27, 32 }
0x1322   : > { %p6827_p4 = scmp.ne.s32.totalorder %s8797_s0, %s6826_s11  ;;  %p6831_p9 = scmp.lt.u32.totalorder %s8797_s0, %s8932_s27 }
0x1323   : > { %p6832_p10 = scmp.lt.u32.totalorder %s6830_s2, %s6826_s11  ;;  %p6834_p12 = scmp.lt.u32.totalorder %s6826_s11, %s8797_s0 }
0x1324   : > { %p6828_p7 = pnand %p6827_p4, %p7073_p5 }
0x1325   : > { %p6833_p11 = por %p6832_p10, %p6831_p9 }
0x1326   : > { %p6829_p8 = pneg %p6828_p7 }
0x1327   : > { %p6835_p13 = por %p6834_p12, %p6833_p11 }
0x1329   : > { %p6836_p0 = pnand %p6835_p13, %p6829_p8 }
0x132b   : > { %6839 = shalt.err (!%p6836_p0)
}
0x132c   : > { %6055 = dma.vmem_to_hbm [thread:$0]  (%p7073_p5), %s8799_s30, 16, %s8797_s0, %s5437_s3  }
0x132d PF: > { %s8933_s1 = sld [smem:[#allocation12_spill]]  ;;  %s8934_s29 = sld [smem:[#allocation10_spill]] }
0x1333   : > { %p6061_p1 = scmp.ge.s32.totalorder %s8933_s1, 2  ;;  %s5461_s6 = sand.u32 1, %s8934_s29  }
0x1334   : > { %s5462_s8 = scalar_lea.sflag [#allocation8], %s5461_s6 }
0x1335   : > { %p6058_p2 = pnand %p6061_p1, %p7077_p6 }
0x1337   : > { %6857 = dma.done.wait (!%p6058_p2), %s5462_s8, 16  }
0x1338   : > { %6859 = vsyncadd (!%p6058_p2), %s5462_s8, 4294967280  ;;  %s8936_s30 = sld [smem:[#allocation13_spill]]  ;;  %s8937_s11 = sld [smem:[#allocation11_spill]] }
0x1339   : > { %s8938_s9 = sld [smem:[#allocation14_spill]]  ;;  %s8939_s8 = smov %s6866_s5 }
0x133e   : > { %p38_p3 = scmp.ge.s32.totalorder %s8936_s30, 4   ;;  %s8940_s5 = smov %s8937_s11 }
0x1340   :  { %40 = sbr.rel (!%p38_p3) target bundleno = 19 (0x13), region = 170 }
0x1347   :  { %5466 = vsyncpa [#allocation8], 1 }
0x1348   :  { %5468 = vsyncpa [#allocation8 + $0x1], 1 }

</bundles_post_ra>
